<compile_context>
chip_gen: v7x
topology: tpu7x:2x2x1
jax: 0.10.0
libtpu: 0.0.40
codegen_flags: <defaults>
</compile_context>

<pallas_src>
import jax
import jax.numpy as jnp
from jax import lax
from jax.experimental import pallas as pl
from jax.experimental.pallas import tpu as pltpu

NEG_SLOPE = 0.01  # PyTorch nn.LeakyReLU() default


def _leaky(v):
    return jnp.where(v >= 0, v, NEG_SLOPE * v)


def _round_up(x, m):
    return (x + m - 1) // m * m


# ------------------------------ fused kernel ------------------------------- #
# Row layout of conv activations: h-major, batch-minor (row block for output
# row h = rows [h*Bt, (h+1)*Bt)).  Lane layout of conv outputs:
#   [even-w block | zero pad to 256 | odd-w block | zero pad to 512]
# so the W-direction 2x2 pool is max(left 256-lane half, right 256-lane half).

def _fused_cnn_kernel(x_ref, a1_ref, a2_ref, wf_ref, b1_ref, b2_ref, bfc_ref,
                      o_ref, p_scr, fc_scr):
    Bt = o_ref.shape[0]

    # x_ref: (26, Bt, 128) bf16 pre-windowed im2col rows (lane = kh*28 + w_in,
    # zero-padded 84 -> 128).  Merging leading dims is a free re-labelling.
    x1 = x_ref[...].reshape(26 * Bt, 128)

    # conv1: one bf16 MXU matmul -> raw (26*Bt, 512) f32 (bias/leaky deferred).
    y1 = jnp.dot(x1, a1_ref[...], preferred_element_type=jnp.float32)

    # pool1 (2x2) then bias + LeakyReLU on the pooled tile only.
    for i in range(13):
        r0 = y1[(2 * i) * Bt:(2 * i + 1) * Bt, :]
        r1 = y1[(2 * i + 1) * Bt:(2 * i + 2) * Bt, :]
        m = jnp.maximum(r0, r1)                       # H-direction pool
        p = jnp.maximum(m[:, :256], m[:, 256:])       # W-direction pool (aligned)
        p = _leaky(p + b1_ref[...])
        p_scr[i * Bt:(i + 1) * Bt, :] = p.astype(jnp.bfloat16)

    # conv2: sum of three shifted bf16 matmuls (one K=256 slab per kh).
    y2 = jnp.dot(p_scr[0:11 * Bt, :], a2_ref[0],
                 preferred_element_type=jnp.float32)
    for kh in range(1, 3):
        y2 = y2 + jnp.dot(p_scr[kh * Bt:(kh + 11) * Bt, :], a2_ref[kh],
                          preferred_element_type=jnp.float32)

    # pool2 (2x2, floor: h=10 never read, even w=10 lanes zeroed via fc weights),
    # then bias + LeakyReLU, then aligned 256-lane stores into the fc input.
    for j in range(5):
        q0 = y2[(2 * j) * Bt:(2 * j + 1) * Bt, :]
        q1 = y2[(2 * j + 1) * Bt:(2 * j + 2) * Bt, :]
        m = jnp.maximum(q0, q1)
        p = jnp.maximum(m[:, :256], m[:, 256:])
        p = _leaky(p + b2_ref[...])
        fc_scr[:, j * 256:(j + 1) * 256] = p.astype(jnp.bfloat16)

    # fc: one bf16 matmul (Bt, 1280) x (1280, 10).
    logits = jnp.dot(fc_scr[...], wf_ref[...], preferred_element_type=jnp.float32)
    o_ref[...] = logits + bfc_ref[...]


# --------------------- wrapper-side weight preprocessing -------------------- #

def _build_banded_conv1(W1):
    # W1: (16, 1, 3, 3) OIHW -> (128, 512) bf16.
    # Rows: kh*28 + w_in (84 real, padded to 128).
    # Cols: even w_out at [0,208), zeros [208,256), odd w_out at [256,464), zeros.
    KH, KW, Cout = 3, 3, 16
    Wi, Wo = 28, 26
    W1p = jnp.transpose(W1[:, 0], (1, 2, 0))                 # (KH, KW, Cout)

    def band(w_outs):
        w_in = jnp.arange(Wi)
        diff = w_in[:, None] - w_outs[None, :]               # (Wi, n)
        mask = (diff >= 0) & (diff < KW)
        kw = jnp.clip(diff, 0, KW - 1)
        A = jnp.where(mask[None, :, :, None], W1p[:, kw, :], 0.0)  # (KH,Wi,n,Cout)
        return A.reshape(KH * Wi, w_outs.shape[0] * Cout)     # (84, n*16)

    A_even = band(jnp.arange(0, Wo, 2))                       # (84, 208)
    A_odd = band(jnp.arange(1, Wo, 2))                        # (84, 208)
    A1 = jnp.zeros((128, 512), jnp.float32)
    A1 = A1.at[:84, 0:208].set(A_even)
    A1 = A1.at[:84, 256:464].set(A_odd)
    return A1.astype(jnp.bfloat16)


def _build_banded_conv2(W2):
    # W2: (32, 16, 3, 3) -> (3, 256, 512) bf16, one K-slab per kh.
    # Rows: w_in*16 + cin (208 real, padded to 256).
    # Cols: even w_out (0..10) at [0,192), zeros, odd w_out (1..9) at [256,416).
    Cout, Cin, KH, KW = 32, 16, 3, 3
    Wi, Wo = 13, 11
    W2p = jnp.transpose(W2, (2, 3, 1, 0))                    # (KH, KW, Cin, Cout)

    def band(kh, w_outs):
        w_in = jnp.arange(Wi)
        diff = w_in[:, None] - w_outs[None, :]               # (Wi, n)
        mask = (diff >= 0) & (diff < KW)
        kw = jnp.clip(diff, 0, KW - 1)
        A = jnp.where(mask[:, :, None, None], W2p[kh, kw, :, :], 0.0)  # (Wi,n,Cin,Cout)
        A = jnp.transpose(A, (0, 2, 1, 3))                   # (Wi, Cin, n, Cout)
        return A.reshape(Wi * Cin, w_outs.shape[0] * Cout)   # (208, n*32)

    evens = jnp.arange(0, Wo, 2)                             # 0,2,4,6,8,10
    odds = jnp.arange(1, Wo, 2)                              # 1,3,5,7,9
    slabs = []
    for kh in range(KH):
        S = jnp.zeros((256, 512), jnp.float32)
        S = S.at[:208, 0:192].set(band(kh, evens))
        S = S.at[:208, 256:416].set(band(kh, odds))
        slabs.append(S)
    return jnp.stack(slabs, 0).astype(jnp.bfloat16)          # (3, 256, 512)


def _build_fc_weight(Wfc):
    # PyTorch flattens NCHW -> index c*25 + h*5 + w; our fc input lane is
    # h*256 + w*32 + c with lanes [160,256) of each h-group being zero/garbage.
    W = Wfc.reshape(10, 32, 5, 5).transpose(2, 3, 1, 0)      # (h, w, c, o)
    W = W.reshape(5, 5 * 32, 10)                             # (h, w*32+c, o)
    W = jnp.pad(W, ((0, 0), (0, 96), (0, 0)))                # (h, 256, o)
    return W.reshape(5 * 256, 10).astype(jnp.bfloat16)       # (1280, 10)


@jax.jit
def pr_cnn_forward(x_nchw, params):
    """Forward pass equivalent to PR_CNN.forward.  x_nchw: (B, 1, 28, 28) f32."""
    W1, b1, W2, b2, Wfc, bfc = params
    B = x_nchw.shape[0]

    A1 = _build_banded_conv1(W1)                              # (128, 512)   bf16
    A2 = _build_banded_conv2(W2)                              # (3, 256, 512) bf16
    WF = _build_fc_weight(Wfc)                                # (1280, 10)   bf16
    b1c = jnp.concatenate([jnp.tile(b1.astype(jnp.float32), 13),
                           jnp.zeros((48,), jnp.float32)])[None, :]   # (1, 256)
    b2c = jnp.concatenate([jnp.tile(b2.astype(jnp.float32), 6),
                           jnp.zeros((64,), jnp.float32)])[None, :]   # (1, 256)
    bfcc = bfc[None, :].astype(jnp.float32)                            # (1, 10)

    # Batch tile: multiple of 8, capped at 64, >=2 grid steps when B > 8.
    if B <= 8:
        Bt = _round_up(max(B, 1), 8)
    else:
        Bt = min(64, _round_up(pl.cdiv(B, 2), 8))
    Bp = _round_up(B, Bt)

    # Lane-aligned pre-windowed conv1 im2col input: (26, Bp, 128) bf16, window h
    # holds input rows h..h+2 flattened (84 lanes) + 44 zero lanes.
    x = x_nchw.reshape(B, 28, 28).astype(jnp.bfloat16)
    if Bp != B:
        x = jnp.pad(x, ((0, Bp - B), (0, 0), (0, 0)))
    win = jnp.stack([x[:, h:h + 3, :].reshape(Bp, 84) for h in range(26)], axis=0)
    win = jnp.pad(win, ((0, 0), (0, 0), (0, 44)))             # (26, Bp, 128)

    out = pl.pallas_call(
        _fused_cnn_kernel,
        out_shape=jax.ShapeDtypeStruct((Bp, 10), jnp.float32),
        grid=(Bp // Bt,),
        in_specs=[
            pl.BlockSpec((26, Bt, 128), lambda i: (0, i, 0)),   # im2col windows
            pl.BlockSpec((128, 512), lambda i: (0, 0)),          # conv1 banded W
            pl.BlockSpec((3, 256, 512), lambda i: (0, 0, 0)),    # conv2 W slabs
            pl.BlockSpec((1280, 10), lambda i: (0, 0)),          # fc weights
            pl.BlockSpec((1, 256), lambda i: (0, 0)),            # conv1 bias
            pl.BlockSpec((1, 256), lambda i: (0, 0)),            # conv2 bias
            pl.BlockSpec((1, 10), lambda i: (0, 0)),             # fc bias
        ],
        out_specs=pl.BlockSpec((Bt, 10), lambda i: (i, 0)),
        scratch_shapes=[
            pltpu.VMEM((13 * Bt, 256), jnp.bfloat16),   # pooled conv1 rows
            pltpu.VMEM((Bt, 5 * 256), jnp.bfloat16),    # fc input (aligned groups)
        ],
        compiler_params=pltpu.CompilerParams(
            dimension_semantics=("parallel",),
            vmem_limit_bytes=32 * 1024 * 1024),
    )(win, A1, A2, WF, b1c, b2c, bfcc)
    return out[:B]


# ------------------------- pure-JAX reference (NCHW) ----------------------- #

def torch_reference(x, params):
    W1, b1, W2, b2, Wfc, bfc = params
    dn = ('NCHW', 'OIHW', 'NCHW')
    y = lax.conv_general_dilated(x, W1, (1, 1), 'VALID', dimension_numbers=dn)
    y = y + b1[None, :, None, None]
    y = jnp.where(y >= 0, y, NEG_SLOPE * y)
    y = lax.reduce_window(y, -jnp.inf, lax.max, (1, 1, 2, 2), (1, 1, 2, 2), 'VALID')
    y = lax.conv_general_dilated(y, W2, (1, 1), 'VALID', dimension_numbers=dn)
    y = y + b2[None, :, None, None]
    y = jnp.where(y >= 0, y, NEG_SLOPE * y)
    y = lax.reduce_window(y, -jnp.inf, lax.max, (1, 1, 2, 2), (1, 1, 2, 2), 'VALID')
    y = y.reshape(y.shape[0], -1)
    return y @ Wfc.T + bfc


if __name__ == "__main__":
    key = jax.random.PRNGKey(0)
    kx, k1, k2, k3, k4, k5, k6 = jax.random.split(key, 7)

    B = 2
    # PR_CNN's fc (32*5*5 -> 10) implies a 28x28 single-channel input.
    x = jax.random.normal(kx, (B, 1, 28, 28), jnp.float32)

    # Deterministic synthetic parameters in PyTorch layouts.
    W1 = 0.1 * jax.random.normal(k1, (16, 1, 3, 3), jnp.float32)
    b1 = 0.05 * jax.random.normal(k2, (16,), jnp.float32)
    W2 = 0.1 * jax.random.normal(k3, (32, 16, 3, 3), jnp.float32)
    b2 = 0.05 * jax.random.normal(k4, (32,), jnp.float32)
    Wfc = 0.05 * jax.random.normal(k5, (10, 32 * 5 * 5), jnp.float32)
    bfc = 0.05 * jax.random.normal(k6, (10,), jnp.float32)
    params = (W1, b1, W2, b2, Wfc, bfc)

    out = jax.block_until_ready(pr_cnn_forward(x, params))
    assert out.shape == (B, 10), out.shape

    ref = jax.block_until_ready(torch_reference(x, params))
    # bf16 throughout the fused kernel -> loose-ish tolerance; a layout bug would
    # produce errors orders of magnitude larger.
    if not jnp.allclose(out, ref, atol=5e-2, rtol=5e-2):
        raise AssertionError(
            f"Pallas/ref mismatch, max abs err = {float(jnp.max(jnp.abs(out - ref)))}")

    print("KERNEL_OK")
</pallas_src>

<mosaic_0001>
module attributes {stable_mosaic.version = 11 : i64} {
  func.func @_fused_cnn_kernel(%arg0: i32, %arg1: memref<26x8x128xbf16, #tpu.memory_space<vmem>>, %arg2: memref<128x512xbf16, #tpu.memory_space<vmem>>, %arg3: memref<3x256x512xbf16, #tpu.memory_space<vmem>>, %arg4: memref<1280x10xbf16, #tpu.memory_space<vmem>>, %arg5: memref<1x256xf32, #tpu.memory_space<vmem>>, %arg6: memref<1x256xf32, #tpu.memory_space<vmem>>, %arg7: memref<1x10xf32, #tpu.memory_space<vmem>>, %arg8: memref<8x10xf32, #tpu.memory_space<vmem>>, %arg9: memref<104x256xbf16, #tpu.memory_space<vmem>>, %arg10: memref<8x1280xbf16, #tpu.memory_space<vmem>>) attributes {dimension_semantics = [#tpu.dimension_semantics<parallel>], iteration_bounds = array<i64: 1>, scalar_prefetch = 0 : i64, scratch_operands = 2 : i64, tpu.core_type = #tpu.core_type<tc>, window_params = [{transform_indices = @transform_0, window_bounds = array<i64: 26, 8, 128>}, {pipeline_mode = #tpu.pipeline_mode<synchronous>, transform_indices = @transform_1, window_bounds = array<i64: 128, 512>}, {pipeline_mode = #tpu.pipeline_mode<synchronous>, transform_indices = @transform_2, window_bounds = array<i64: 3, 256, 512>}, {pipeline_mode = #tpu.pipeline_mode<synchronous>, transform_indices = @transform_3, window_bounds = array<i64: 1280, 10>}, {pipeline_mode = #tpu.pipeline_mode<synchronous>, transform_indices = @transform_4, window_bounds = array<i64: 1, 256>}, {pipeline_mode = #tpu.pipeline_mode<synchronous>, transform_indices = @transform_5, window_bounds = array<i64: 1, 256>}, {pipeline_mode = #tpu.pipeline_mode<synchronous>, transform_indices = @transform_6, window_bounds = array<i64: 1, 10>}, {transform_indices = @transform_7, window_bounds = array<i64: 8, 10>}]} {
    %c0 = arith.constant 0 : index
    %c0_0 = arith.constant 0 : index
    %c0_1 = arith.constant 0 : index
    %0 = vector.load %arg1[%c0, %c0_0, %c0_1] : memref<26x8x128xbf16, #tpu.memory_space<vmem>>, vector<26x8x128xbf16>
    %1 = vector.shape_cast %0 : vector<26x8x128xbf16> to vector<208x128xbf16>
    %c0_2 = arith.constant 0 : index
    %c0_3 = arith.constant 0 : index
    %2 = vector.load %arg2[%c0_2, %c0_3] : memref<128x512xbf16, #tpu.memory_space<vmem>>, vector<128x512xbf16>
    %cst = arith.constant dense<0.000000e+00> : vector<208x512xf32>
    %3 = tpu.matmul %1, %2, %cst {dimension_numbers = #tpu.dot_dimension_numbers<[1], [0], [0], [1], [0, 0, 1, 1], [], []>} : vector<208x128xbf16>, vector<128x512xbf16>, vector<208x512xf32> -> vector<208x512xf32>
    %4 = vector.extract_strided_slice %3 {offsets = [0, 0], sizes = [8, 512], strides = [1, 1]} : vector<208x512xf32> to vector<8x512xf32>
    %5 = vector.extract_strided_slice %3 {offsets = [8, 0], sizes = [8, 512], strides = [1, 1]} : vector<208x512xf32> to vector<8x512xf32>
    %6 = arith.maximumf %4, %5 : vector<8x512xf32>
    %7 = vector.extract_strided_slice %6 {offsets = [0, 0], sizes = [8, 256], strides = [1, 1]} : vector<8x512xf32> to vector<8x256xf32>
    %8 = vector.extract_strided_slice %6 {offsets = [0, 256], sizes = [8, 256], strides = [1, 1]} : vector<8x512xf32> to vector<8x256xf32>
    %9 = arith.maximumf %7, %8 : vector<8x256xf32>
    %c0_4 = arith.constant 0 : index
    %c0_5 = arith.constant 0 : index
    %10 = vector.load %arg5[%c0_4, %c0_5] : memref<1x256xf32, #tpu.memory_space<vmem>>, vector<1x256xf32>
    %11 = vector.broadcast %10 : vector<1x256xf32> to vector<8x256xf32>
    %12 = arith.addf %9, %11 : vector<8x256xf32>
    %cst_6 = arith.constant 0.000000e+00 : f32
    %13 = vector.broadcast %cst_6 : f32 to vector<8x256xf32>
    %14 = arith.cmpf oge, %12, %13 : vector<8x256xf32>
    %cst_7 = arith.constant 0.00999999977 : f32
    %15 = vector.broadcast %cst_7 : f32 to vector<8x256xf32>
    %16 = arith.mulf %15, %12 : vector<8x256xf32>
    %17 = arith.select %14, %12, %16 : vector<8x256xi1>, vector<8x256xf32>
    %18 = arith.truncf %17 : vector<8x256xf32> to vector<8x256xbf16>
    %c0_8 = arith.constant 0 : index
    %c0_9 = arith.constant 0 : index
    %19 = vector.load %arg9[%c0_8, %c0_9] : memref<104x256xbf16, #tpu.memory_space<vmem>>, vector<8x256xbf16>
    tpu.vector_store %arg9[%c0_8, %c0_9], %18 {strides = array<i32>} : memref<104x256xbf16, #tpu.memory_space<vmem>>, vector<8x256xbf16>,
    %20 = vector.extract_strided_slice %3 {offsets = [16, 0], sizes = [8, 512], strides = [1, 1]} : vector<208x512xf32> to vector<8x512xf32>
    %21 = vector.extract_strided_slice %3 {offsets = [24, 0], sizes = [8, 512], strides = [1, 1]} : vector<208x512xf32> to vector<8x512xf32>
    %22 = arith.maximumf %20, %21 : vector<8x512xf32>
    %23 = vector.extract_strided_slice %22 {offsets = [0, 0], sizes = [8, 256], strides = [1, 1]} : vector<8x512xf32> to vector<8x256xf32>
    %24 = vector.extract_strided_slice %22 {offsets = [0, 256], sizes = [8, 256], strides = [1, 1]} : vector<8x512xf32> to vector<8x256xf32>
    %25 = arith.maximumf %23, %24 : vector<8x256xf32>
    %c0_10 = arith.constant 0 : index
    %c0_11 = arith.constant 0 : index
    %26 = vector.load %arg5[%c0_10, %c0_11] : memref<1x256xf32, #tpu.memory_space<vmem>>, vector<1x256xf32>
    %27 = vector.broadcast %26 : vector<1x256xf32> to vector<8x256xf32>
    %28 = arith.addf %25, %27 : vector<8x256xf32>
    %cst_12 = arith.constant 0.000000e+00 : f32
    %29 = vector.broadcast %cst_12 : f32 to vector<8x256xf32>
    %30 = arith.cmpf oge, %28, %29 : vector<8x256xf32>
    %cst_13 = arith.constant 0.00999999977 : f32
    %31 = vector.broadcast %cst_13 : f32 to vector<8x256xf32>
    %32 = arith.mulf %31, %28 : vector<8x256xf32>
    %33 = arith.select %30, %28, %32 : vector<8x256xi1>, vector<8x256xf32>
    %34 = arith.truncf %33 : vector<8x256xf32> to vector<8x256xbf16>
    %c8 = arith.constant 8 : index
    %c0_14 = arith.constant 0 : index
    %35 = vector.load %arg9[%c8, %c0_14] : memref<104x256xbf16, #tpu.memory_space<vmem>>, vector<8x256xbf16>
    tpu.vector_store %arg9[%c8, %c0_14], %34 {strides = array<i32>} : memref<104x256xbf16, #tpu.memory_space<vmem>>, vector<8x256xbf16>,
    %36 = vector.extract_strided_slice %3 {offsets = [32, 0], sizes = [8, 512], strides = [1, 1]} : vector<208x512xf32> to vector<8x512xf32>
    %37 = vector.extract_strided_slice %3 {offsets = [40, 0], sizes = [8, 512], strides = [1, 1]} : vector<208x512xf32> to vector<8x512xf32>
    %38 = arith.maximumf %36, %37 : vector<8x512xf32>
    %39 = vector.extract_strided_slice %38 {offsets = [0, 0], sizes = [8, 256], strides = [1, 1]} : vector<8x512xf32> to vector<8x256xf32>
    %40 = vector.extract_strided_slice %38 {offsets = [0, 256], sizes = [8, 256], strides = [1, 1]} : vector<8x512xf32> to vector<8x256xf32>
    %41 = arith.maximumf %39, %40 : vector<8x256xf32>
    %c0_15 = arith.constant 0 : index
    %c0_16 = arith.constant 0 : index
    %42 = vector.load %arg5[%c0_15, %c0_16] : memref<1x256xf32, #tpu.memory_space<vmem>>, vector<1x256xf32>
    %43 = vector.broadcast %42 : vector<1x256xf32> to vector<8x256xf32>
    %44 = arith.addf %41, %43 : vector<8x256xf32>
    %cst_17 = arith.constant 0.000000e+00 : f32
    %45 = vector.broadcast %cst_17 : f32 to vector<8x256xf32>
    %46 = arith.cmpf oge, %44, %45 : vector<8x256xf32>
    %cst_18 = arith.constant 0.00999999977 : f32
    %47 = vector.broadcast %cst_18 : f32 to vector<8x256xf32>
    %48 = arith.mulf %47, %44 : vector<8x256xf32>
    %49 = arith.select %46, %44, %48 : vector<8x256xi1>, vector<8x256xf32>
    %50 = arith.truncf %49 : vector<8x256xf32> to vector<8x256xbf16>
    %c16 = arith.constant 16 : index
    %c0_19 = arith.constant 0 : index
    %51 = vector.load %arg9[%c16, %c0_19] : memref<104x256xbf16, #tpu.memory_space<vmem>>, vector<8x256xbf16>
    tpu.vector_store %arg9[%c16, %c0_19], %50 {strides = array<i32>} : memref<104x256xbf16, #tpu.memory_space<vmem>>, vector<8x256xbf16>,
    %52 = vector.extract_strided_slice %3 {offsets = [48, 0], sizes = [8, 512], strides = [1, 1]} : vector<208x512xf32> to vector<8x512xf32>
    %53 = vector.extract_strided_slice %3 {offsets = [56, 0], sizes = [8, 512], strides = [1, 1]} : vector<208x512xf32> to vector<8x512xf32>
    %54 = arith.maximumf %52, %53 : vector<8x512xf32>
    %55 = vector.extract_strided_slice %54 {offsets = [0, 0], sizes = [8, 256], strides = [1, 1]} : vector<8x512xf32> to vector<8x256xf32>
    %56 = vector.extract_strided_slice %54 {offsets = [0, 256], sizes = [8, 256], strides = [1, 1]} : vector<8x512xf32> to vector<8x256xf32>
    %57 = arith.maximumf %55, %56 : vector<8x256xf32>
    %c0_20 = arith.constant 0 : index
    %c0_21 = arith.constant 0 : index
    %58 = vector.load %arg5[%c0_20, %c0_21] : memref<1x256xf32, #tpu.memory_space<vmem>>, vector<1x256xf32>
    %59 = vector.broadcast %58 : vector<1x256xf32> to vector<8x256xf32>
    %60 = arith.addf %57, %59 : vector<8x256xf32>
    %cst_22 = arith.constant 0.000000e+00 : f32
    %61 = vector.broadcast %cst_22 : f32 to vector<8x256xf32>
    %62 = arith.cmpf oge, %60, %61 : vector<8x256xf32>
    %cst_23 = arith.constant 0.00999999977 : f32
    %63 = vector.broadcast %cst_23 : f32 to vector<8x256xf32>
    %64 = arith.mulf %63, %60 : vector<8x256xf32>
    %65 = arith.select %62, %60, %64 : vector<8x256xi1>, vector<8x256xf32>
    %66 = arith.truncf %65 : vector<8x256xf32> to vector<8x256xbf16>
    %c24 = arith.constant 24 : index
    %c0_24 = arith.constant 0 : index
    %67 = vector.load %arg9[%c24, %c0_24] : memref<104x256xbf16, #tpu.memory_space<vmem>>, vector<8x256xbf16>
    tpu.vector_store %arg9[%c24, %c0_24], %66 {strides = array<i32>} : memref<104x256xbf16, #tpu.memory_space<vmem>>, vector<8x256xbf16>,
    %68 = vector.extract_strided_slice %3 {offsets = [64, 0], sizes = [8, 512], strides = [1, 1]} : vector<208x512xf32> to vector<8x512xf32>
    %69 = vector.extract_strided_slice %3 {offsets = [72, 0], sizes = [8, 512], strides = [1, 1]} : vector<208x512xf32> to vector<8x512xf32>
    %70 = arith.maximumf %68, %69 : vector<8x512xf32>
    %71 = vector.extract_strided_slice %70 {offsets = [0, 0], sizes = [8, 256], strides = [1, 1]} : vector<8x512xf32> to vector<8x256xf32>
    %72 = vector.extract_strided_slice %70 {offsets = [0, 256], sizes = [8, 256], strides = [1, 1]} : vector<8x512xf32> to vector<8x256xf32>
    %73 = arith.maximumf %71, %72 : vector<8x256xf32>
    %c0_25 = arith.constant 0 : index
    %c0_26 = arith.constant 0 : index
    %74 = vector.load %arg5[%c0_25, %c0_26] : memref<1x256xf32, #tpu.memory_space<vmem>>, vector<1x256xf32>
    %75 = vector.broadcast %74 : vector<1x256xf32> to vector<8x256xf32>
    %76 = arith.addf %73, %75 : vector<8x256xf32>
    %cst_27 = arith.constant 0.000000e+00 : f32
    %77 = vector.broadcast %cst_27 : f32 to vector<8x256xf32>
    %78 = arith.cmpf oge, %76, %77 : vector<8x256xf32>
    %cst_28 = arith.constant 0.00999999977 : f32
    %79 = vector.broadcast %cst_28 : f32 to vector<8x256xf32>
    %80 = arith.mulf %79, %76 : vector<8x256xf32>
    %81 = arith.select %78, %76, %80 : vector<8x256xi1>, vector<8x256xf32>
    %82 = arith.truncf %81 : vector<8x256xf32> to vector<8x256xbf16>
    %c32 = arith.constant 32 : index
    %c0_29 = arith.constant 0 : index
    %83 = vector.load %arg9[%c32, %c0_29] : memref<104x256xbf16, #tpu.memory_space<vmem>>, vector<8x256xbf16>
    tpu.vector_store %arg9[%c32, %c0_29], %82 {strides = array<i32>} : memref<104x256xbf16, #tpu.memory_space<vmem>>, vector<8x256xbf16>,
    %84 = vector.extract_strided_slice %3 {offsets = [80, 0], sizes = [8, 512], strides = [1, 1]} : vector<208x512xf32> to vector<8x512xf32>
    %85 = vector.extract_strided_slice %3 {offsets = [88, 0], sizes = [8, 512], strides = [1, 1]} : vector<208x512xf32> to vector<8x512xf32>
    %86 = arith.maximumf %84, %85 : vector<8x512xf32>
    %87 = vector.extract_strided_slice %86 {offsets = [0, 0], sizes = [8, 256], strides = [1, 1]} : vector<8x512xf32> to vector<8x256xf32>
    %88 = vector.extract_strided_slice %86 {offsets = [0, 256], sizes = [8, 256], strides = [1, 1]} : vector<8x512xf32> to vector<8x256xf32>
    %89 = arith.maximumf %87, %88 : vector<8x256xf32>
    %c0_30 = arith.constant 0 : index
    %c0_31 = arith.constant 0 : index
    %90 = vector.load %arg5[%c0_30, %c0_31] : memref<1x256xf32, #tpu.memory_space<vmem>>, vector<1x256xf32>
    %91 = vector.broadcast %90 : vector<1x256xf32> to vector<8x256xf32>
    %92 = arith.addf %89, %91 : vector<8x256xf32>
    %cst_32 = arith.constant 0.000000e+00 : f32
    %93 = vector.broadcast %cst_32 : f32 to vector<8x256xf32>
    %94 = arith.cmpf oge, %92, %93 : vector<8x256xf32>
    %cst_33 = arith.constant 0.00999999977 : f32
    %95 = vector.broadcast %cst_33 : f32 to vector<8x256xf32>
    %96 = arith.mulf %95, %92 : vector<8x256xf32>
    %97 = arith.select %94, %92, %96 : vector<8x256xi1>, vector<8x256xf32>
    %98 = arith.truncf %97 : vector<8x256xf32> to vector<8x256xbf16>
    %c40 = arith.constant 40 : index
    %c0_34 = arith.constant 0 : index
    %99 = vector.load %arg9[%c40, %c0_34] : memref<104x256xbf16, #tpu.memory_space<vmem>>, vector<8x256xbf16>
    tpu.vector_store %arg9[%c40, %c0_34], %98 {strides = array<i32>} : memref<104x256xbf16, #tpu.memory_space<vmem>>, vector<8x256xbf16>,
    %100 = vector.extract_strided_slice %3 {offsets = [96, 0], sizes = [8, 512], strides = [1, 1]} : vector<208x512xf32> to vector<8x512xf32>
    %101 = vector.extract_strided_slice %3 {offsets = [104, 0], sizes = [8, 512], strides = [1, 1]} : vector<208x512xf32> to vector<8x512xf32>
    %102 = arith.maximumf %100, %101 : vector<8x512xf32>
    %103 = vector.extract_strided_slice %102 {offsets = [0, 0], sizes = [8, 256], strides = [1, 1]} : vector<8x512xf32> to vector<8x256xf32>
    %104 = vector.extract_strided_slice %102 {offsets = [0, 256], sizes = [8, 256], strides = [1, 1]} : vector<8x512xf32> to vector<8x256xf32>
    %105 = arith.maximumf %103, %104 : vector<8x256xf32>
    %c0_35 = arith.constant 0 : index
    %c0_36 = arith.constant 0 : index
    %106 = vector.load %arg5[%c0_35, %c0_36] : memref<1x256xf32, #tpu.memory_space<vmem>>, vector<1x256xf32>
    %107 = vector.broadcast %106 : vector<1x256xf32> to vector<8x256xf32>
    %108 = arith.addf %105, %107 : vector<8x256xf32>
    %cst_37 = arith.constant 0.000000e+00 : f32
    %109 = vector.broadcast %cst_37 : f32 to vector<8x256xf32>
    %110 = arith.cmpf oge, %108, %109 : vector<8x256xf32>
    %cst_38 = arith.constant 0.00999999977 : f32
    %111 = vector.broadcast %cst_38 : f32 to vector<8x256xf32>
    %112 = arith.mulf %111, %108 : vector<8x256xf32>
    %113 = arith.select %110, %108, %112 : vector<8x256xi1>, vector<8x256xf32>
    %114 = arith.truncf %113 : vector<8x256xf32> to vector<8x256xbf16>
    %c48 = arith.constant 48 : index
    %c0_39 = arith.constant 0 : index
    %115 = vector.load %arg9[%c48, %c0_39] : memref<104x256xbf16, #tpu.memory_space<vmem>>, vector<8x256xbf16>
    tpu.vector_store %arg9[%c48, %c0_39], %114 {strides = array<i32>} : memref<104x256xbf16, #tpu.memory_space<vmem>>, vector<8x256xbf16>,
    %116 = vector.extract_strided_slice %3 {offsets = [112, 0], sizes = [8, 512], strides = [1, 1]} : vector<208x512xf32> to vector<8x512xf32>
    %117 = vector.extract_strided_slice %3 {offsets = [120, 0], sizes = [8, 512], strides = [1, 1]} : vector<208x512xf32> to vector<8x512xf32>
    %118 = arith.maximumf %116, %117 : vector<8x512xf32>
    %119 = vector.extract_strided_slice %118 {offsets = [0, 0], sizes = [8, 256], strides = [1, 1]} : vector<8x512xf32> to vector<8x256xf32>
    %120 = vector.extract_strided_slice %118 {offsets = [0, 256], sizes = [8, 256], strides = [1, 1]} : vector<8x512xf32> to vector<8x256xf32>
    %121 = arith.maximumf %119, %120 : vector<8x256xf32>
    %c0_40 = arith.constant 0 : index
    %c0_41 = arith.constant 0 : index
    %122 = vector.load %arg5[%c0_40, %c0_41] : memref<1x256xf32, #tpu.memory_space<vmem>>, vector<1x256xf32>
    %123 = vector.broadcast %122 : vector<1x256xf32> to vector<8x256xf32>
    %124 = arith.addf %121, %123 : vector<8x256xf32>
    %cst_42 = arith.constant 0.000000e+00 : f32
    %125 = vector.broadcast %cst_42 : f32 to vector<8x256xf32>
    %126 = arith.cmpf oge, %124, %125 : vector<8x256xf32>
    %cst_43 = arith.constant 0.00999999977 : f32
    %127 = vector.broadcast %cst_43 : f32 to vector<8x256xf32>
    %128 = arith.mulf %127, %124 : vector<8x256xf32>
    %129 = arith.select %126, %124, %128 : vector<8x256xi1>, vector<8x256xf32>
    %130 = arith.truncf %129 : vector<8x256xf32> to vector<8x256xbf16>
    %c56 = arith.constant 56 : index
    %c0_44 = arith.constant 0 : index
    %131 = vector.load %arg9[%c56, %c0_44] : memref<104x256xbf16, #tpu.memory_space<vmem>>, vector<8x256xbf16>
    tpu.vector_store %arg9[%c56, %c0_44], %130 {strides = array<i32>} : memref<104x256xbf16, #tpu.memory_space<vmem>>, vector<8x256xbf16>,
    %132 = vector.extract_strided_slice %3 {offsets = [128, 0], sizes = [8, 512], strides = [1, 1]} : vector<208x512xf32> to vector<8x512xf32>
    %133 = vector.extract_strided_slice %3 {offsets = [136, 0], sizes = [8, 512], strides = [1, 1]} : vector<208x512xf32> to vector<8x512xf32>
    %134 = arith.maximumf %132, %133 : vector<8x512xf32>
    %135 = vector.extract_strided_slice %134 {offsets = [0, 0], sizes = [8, 256], strides = [1, 1]} : vector<8x512xf32> to vector<8x256xf32>
    %136 = vector.extract_strided_slice %134 {offsets = [0, 256], sizes = [8, 256], strides = [1, 1]} : vector<8x512xf32> to vector<8x256xf32>
    %137 = arith.maximumf %135, %136 : vector<8x256xf32>
    %c0_45 = arith.constant 0 : index
    %c0_46 = arith.constant 0 : index
    %138 = vector.load %arg5[%c0_45, %c0_46] : memref<1x256xf32, #tpu.memory_space<vmem>>, vector<1x256xf32>
    %139 = vector.broadcast %138 : vector<1x256xf32> to vector<8x256xf32>
    %140 = arith.addf %137, %139 : vector<8x256xf32>
    %cst_47 = arith.constant 0.000000e+00 : f32
    %141 = vector.broadcast %cst_47 : f32 to vector<8x256xf32>
    %142 = arith.cmpf oge, %140, %141 : vector<8x256xf32>
    %cst_48 = arith.constant 0.00999999977 : f32
    %143 = vector.broadcast %cst_48 : f32 to vector<8x256xf32>
    %144 = arith.mulf %143, %140 : vector<8x256xf32>
    %145 = arith.select %142, %140, %144 : vector<8x256xi1>, vector<8x256xf32>
    %146 = arith.truncf %145 : vector<8x256xf32> to vector<8x256xbf16>
    %c64 = arith.constant 64 : index
    %c0_49 = arith.constant 0 : index
    %147 = vector.load %arg9[%c64, %c0_49] : memref<104x256xbf16, #tpu.memory_space<vmem>>, vector<8x256xbf16>
    tpu.vector_store %arg9[%c64, %c0_49], %146 {strides = array<i32>} : memref<104x256xbf16, #tpu.memory_space<vmem>>, vector<8x256xbf16>,
    %148 = vector.extract_strided_slice %3 {offsets = [144, 0], sizes = [8, 512], strides = [1, 1]} : vector<208x512xf32> to vector<8x512xf32>
    %149 = vector.extract_strided_slice %3 {offsets = [152, 0], sizes = [8, 512], strides = [1, 1]} : vector<208x512xf32> to vector<8x512xf32>
    %150 = arith.maximumf %148, %149 : vector<8x512xf32>
    %151 = vector.extract_strided_slice %150 {offsets = [0, 0], sizes = [8, 256], strides = [1, 1]} : vector<8x512xf32> to vector<8x256xf32>
    %152 = vector.extract_strided_slice %150 {offsets = [0, 256], sizes = [8, 256], strides = [1, 1]} : vector<8x512xf32> to vector<8x256xf32>
    %153 = arith.maximumf %151, %152 : vector<8x256xf32>
    %c0_50 = arith.constant 0 : index
    %c0_51 = arith.constant 0 : index
    %154 = vector.load %arg5[%c0_50, %c0_51] : memref<1x256xf32, #tpu.memory_space<vmem>>, vector<1x256xf32>
    %155 = vector.broadcast %154 : vector<1x256xf32> to vector<8x256xf32>
    %156 = arith.addf %153, %155 : vector<8x256xf32>
    %cst_52 = arith.constant 0.000000e+00 : f32
    %157 = vector.broadcast %cst_52 : f32 to vector<8x256xf32>
    %158 = arith.cmpf oge, %156, %157 : vector<8x256xf32>
    %cst_53 = arith.constant 0.00999999977 : f32
    %159 = vector.broadcast %cst_53 : f32 to vector<8x256xf32>
    %160 = arith.mulf %159, %156 : vector<8x256xf32>
    %161 = arith.select %158, %156, %160 : vector<8x256xi1>, vector<8x256xf32>
    %162 = arith.truncf %161 : vector<8x256xf32> to vector<8x256xbf16>
    %c72 = arith.constant 72 : index
    %c0_54 = arith.constant 0 : index
    %163 = vector.load %arg9[%c72, %c0_54] : memref<104x256xbf16, #tpu.memory_space<vmem>>, vector<8x256xbf16>
    tpu.vector_store %arg9[%c72, %c0_54], %162 {strides = array<i32>} : memref<104x256xbf16, #tpu.memory_space<vmem>>, vector<8x256xbf16>,
    %164 = vector.extract_strided_slice %3 {offsets = [160, 0], sizes = [8, 512], strides = [1, 1]} : vector<208x512xf32> to vector<8x512xf32>
    %165 = vector.extract_strided_slice %3 {offsets = [168, 0], sizes = [8, 512], strides = [1, 1]} : vector<208x512xf32> to vector<8x512xf32>
    %166 = arith.maximumf %164, %165 : vector<8x512xf32>
    %167 = vector.extract_strided_slice %166 {offsets = [0, 0], sizes = [8, 256], strides = [1, 1]} : vector<8x512xf32> to vector<8x256xf32>
    %168 = vector.extract_strided_slice %166 {offsets = [0, 256], sizes = [8, 256], strides = [1, 1]} : vector<8x512xf32> to vector<8x256xf32>
    %169 = arith.maximumf %167, %168 : vector<8x256xf32>
    %c0_55 = arith.constant 0 : index
    %c0_56 = arith.constant 0 : index
    %170 = vector.load %arg5[%c0_55, %c0_56] : memref<1x256xf32, #tpu.memory_space<vmem>>, vector<1x256xf32>
    %171 = vector.broadcast %170 : vector<1x256xf32> to vector<8x256xf32>
    %172 = arith.addf %169, %171 : vector<8x256xf32>
    %cst_57 = arith.constant 0.000000e+00 : f32
    %173 = vector.broadcast %cst_57 : f32 to vector<8x256xf32>
    %174 = arith.cmpf oge, %172, %173 : vector<8x256xf32>
    %cst_58 = arith.constant 0.00999999977 : f32
    %175 = vector.broadcast %cst_58 : f32 to vector<8x256xf32>
    %176 = arith.mulf %175, %172 : vector<8x256xf32>
    %177 = arith.select %174, %172, %176 : vector<8x256xi1>, vector<8x256xf32>
    %178 = arith.truncf %177 : vector<8x256xf32> to vector<8x256xbf16>
    %c80 = arith.constant 80 : index
    %c0_59 = arith.constant 0 : index
    %179 = vector.load %arg9[%c80, %c0_59] : memref<104x256xbf16, #tpu.memory_space<vmem>>, vector<8x256xbf16>
    tpu.vector_store %arg9[%c80, %c0_59], %178 {strides = array<i32>} : memref<104x256xbf16, #tpu.memory_space<vmem>>, vector<8x256xbf16>,
    %180 = vector.extract_strided_slice %3 {offsets = [176, 0], sizes = [8, 512], strides = [1, 1]} : vector<208x512xf32> to vector<8x512xf32>
    %181 = vector.extract_strided_slice %3 {offsets = [184, 0], sizes = [8, 512], strides = [1, 1]} : vector<208x512xf32> to vector<8x512xf32>
    %182 = arith.maximumf %180, %181 : vector<8x512xf32>
    %183 = vector.extract_strided_slice %182 {offsets = [0, 0], sizes = [8, 256], strides = [1, 1]} : vector<8x512xf32> to vector<8x256xf32>
    %184 = vector.extract_strided_slice %182 {offsets = [0, 256], sizes = [8, 256], strides = [1, 1]} : vector<8x512xf32> to vector<8x256xf32>
    %185 = arith.maximumf %183, %184 : vector<8x256xf32>
    %c0_60 = arith.constant 0 : index
    %c0_61 = arith.constant 0 : index
    %186 = vector.load %arg5[%c0_60, %c0_61] : memref<1x256xf32, #tpu.memory_space<vmem>>, vector<1x256xf32>
    %187 = vector.broadcast %186 : vector<1x256xf32> to vector<8x256xf32>
    %188 = arith.addf %185, %187 : vector<8x256xf32>
    %cst_62 = arith.constant 0.000000e+00 : f32
    %189 = vector.broadcast %cst_62 : f32 to vector<8x256xf32>
    %190 = arith.cmpf oge, %188, %189 : vector<8x256xf32>
    %cst_63 = arith.constant 0.00999999977 : f32
    %191 = vector.broadcast %cst_63 : f32 to vector<8x256xf32>
    %192 = arith.mulf %191, %188 : vector<8x256xf32>
    %193 = arith.select %190, %188, %192 : vector<8x256xi1>, vector<8x256xf32>
    %194 = arith.truncf %193 : vector<8x256xf32> to vector<8x256xbf16>
    %c88 = arith.constant 88 : index
    %c0_64 = arith.constant 0 : index
    %195 = vector.load %arg9[%c88, %c0_64] : memref<104x256xbf16, #tpu.memory_space<vmem>>, vector<8x256xbf16>
    tpu.vector_store %arg9[%c88, %c0_64], %194 {strides = array<i32>} : memref<104x256xbf16, #tpu.memory_space<vmem>>, vector<8x256xbf16>,
    %196 = vector.extract_strided_slice %3 {offsets = [192, 0], sizes = [8, 512], strides = [1, 1]} : vector<208x512xf32> to vector<8x512xf32>
    %197 = vector.extract_strided_slice %3 {offsets = [200, 0], sizes = [8, 512], strides = [1, 1]} : vector<208x512xf32> to vector<8x512xf32>
    %198 = arith.maximumf %196, %197 : vector<8x512xf32>
    %199 = vector.extract_strided_slice %198 {offsets = [0, 0], sizes = [8, 256], strides = [1, 1]} : vector<8x512xf32> to vector<8x256xf32>
    %200 = vector.extract_strided_slice %198 {offsets = [0, 256], sizes = [8, 256], strides = [1, 1]} : vector<8x512xf32> to vector<8x256xf32>
    %201 = arith.maximumf %199, %200 : vector<8x256xf32>
    %c0_65 = arith.constant 0 : index
    %c0_66 = arith.constant 0 : index
    %202 = vector.load %arg5[%c0_65, %c0_66] : memref<1x256xf32, #tpu.memory_space<vmem>>, vector<1x256xf32>
    %203 = vector.broadcast %202 : vector<1x256xf32> to vector<8x256xf32>
    %204 = arith.addf %201, %203 : vector<8x256xf32>
    %cst_67 = arith.constant 0.000000e+00 : f32
    %205 = vector.broadcast %cst_67 : f32 to vector<8x256xf32>
    %206 = arith.cmpf oge, %204, %205 : vector<8x256xf32>
    %cst_68 = arith.constant 0.00999999977 : f32
    %207 = vector.broadcast %cst_68 : f32 to vector<8x256xf32>
    %208 = arith.mulf %207, %204 : vector<8x256xf32>
    %209 = arith.select %206, %204, %208 : vector<8x256xi1>, vector<8x256xf32>
    %210 = arith.truncf %209 : vector<8x256xf32> to vector<8x256xbf16>
    %c96 = arith.constant 96 : index
    %c0_69 = arith.constant 0 : index
    %211 = vector.load %arg9[%c96, %c0_69] : memref<104x256xbf16, #tpu.memory_space<vmem>>, vector<8x256xbf16>
    tpu.vector_store %arg9[%c96, %c0_69], %210 {strides = array<i32>} : memref<104x256xbf16, #tpu.memory_space<vmem>>, vector<8x256xbf16>,
    %c0_70 = arith.constant 0 : index
    %c0_71 = arith.constant 0 : index
    %212 = vector.load %arg9[%c0_70, %c0_71] : memref<104x256xbf16, #tpu.memory_space<vmem>>, vector<88x256xbf16>
    %c0_72 = arith.constant 0 : index
    %c0_73 = arith.constant 0 : index
    %c0_74 = arith.constant 0 : index
    %213 = vector.load %arg3[%c0_72, %c0_73, %c0_74] : memref<3x256x512xbf16, #tpu.memory_space<vmem>>, vector<1x256x512xbf16>
    %214 = vector.shape_cast %213 : vector<1x256x512xbf16> to vector<256x512xbf16>
    %cst_75 = arith.constant dense<0.000000e+00> : vector<88x512xf32>
    %215 = tpu.matmul %212, %214, %cst_75 {dimension_numbers = #tpu.dot_dimension_numbers<[1], [0], [0], [1], [0, 0, 1, 1], [], []>} : vector<88x256xbf16>, vector<256x512xbf16>, vector<88x512xf32> -> vector<88x512xf32>
    %c8_76 = arith.constant 8 : index
    %c0_77 = arith.constant 0 : index
    %216 = vector.load %arg9[%c8_76, %c0_77] : memref<104x256xbf16, #tpu.memory_space<vmem>>, vector<88x256xbf16>
    %c1 = arith.constant 1 : index
    %c0_78 = arith.constant 0 : index
    %c0_79 = arith.constant 0 : index
    %217 = vector.load %arg3[%c1, %c0_78, %c0_79] : memref<3x256x512xbf16, #tpu.memory_space<vmem>>, vector<1x256x512xbf16>
    %218 = vector.shape_cast %217 : vector<1x256x512xbf16> to vector<256x512xbf16>
    %cst_80 = arith.constant dense<0.000000e+00> : vector<88x512xf32>
    %219 = tpu.matmul %216, %218, %cst_80 {dimension_numbers = #tpu.dot_dimension_numbers<[1], [0], [0], [1], [0, 0, 1, 1], [], []>} : vector<88x256xbf16>, vector<256x512xbf16>, vector<88x512xf32> -> vector<88x512xf32>
    %220 = arith.addf %215, %219 : vector<88x512xf32>
    %c16_81 = arith.constant 16 : index
    %c0_82 = arith.constant 0 : index
    %221 = vector.load %arg9[%c16_81, %c0_82] : memref<104x256xbf16, #tpu.memory_space<vmem>>, vector<88x256xbf16>
    %c2 = arith.constant 2 : index
    %c0_83 = arith.constant 0 : index
    %c0_84 = arith.constant 0 : index
    %222 = vector.load %arg3[%c2, %c0_83, %c0_84] : memref<3x256x512xbf16, #tpu.memory_space<vmem>>, vector<1x256x512xbf16>
    %223 = vector.shape_cast %222 : vector<1x256x512xbf16> to vector<256x512xbf16>
    %cst_85 = arith.constant dense<0.000000e+00> : vector<88x512xf32>
    %224 = tpu.matmul %221, %223, %cst_85 {dimension_numbers = #tpu.dot_dimension_numbers<[1], [0], [0], [1], [0, 0, 1, 1], [], []>} : vector<88x256xbf16>, vector<256x512xbf16>, vector<88x512xf32> -> vector<88x512xf32>
    %225 = arith.addf %220, %224 : vector<88x512xf32>
    %226 = vector.extract_strided_slice %225 {offsets = [0, 0], sizes = [8, 512], strides = [1, 1]} : vector<88x512xf32> to vector<8x512xf32>
    %227 = vector.extract_strided_slice %225 {offsets = [8, 0], sizes = [8, 512], strides = [1, 1]} : vector<88x512xf32> to vector<8x512xf32>
    %228 = arith.maximumf %226, %227 : vector<8x512xf32>
    %229 = vector.extract_strided_slice %228 {offsets = [0, 0], sizes = [8, 256], strides = [1, 1]} : vector<8x512xf32> to vector<8x256xf32>
    %230 = vector.extract_strided_slice %228 {offsets = [0, 256], sizes = [8, 256], strides = [1, 1]} : vector<8x512xf32> to vector<8x256xf32>
    %231 = arith.maximumf %229, %230 : vector<8x256xf32>
    %c0_86 = arith.constant 0 : index
    %c0_87 = arith.constant 0 : index
    %232 = vector.load %arg6[%c0_86, %c0_87] : memref<1x256xf32, #tpu.memory_space<vmem>>, vector<1x256xf32>
    %233 = vector.broadcast %232 : vector<1x256xf32> to vector<8x256xf32>
    %234 = arith.addf %231, %233 : vector<8x256xf32>
    %cst_88 = arith.constant 0.000000e+00 : f32
    %235 = vector.broadcast %cst_88 : f32 to vector<8x256xf32>
    %236 = arith.cmpf oge, %234, %235 : vector<8x256xf32>
    %cst_89 = arith.constant 0.00999999977 : f32
    %237 = vector.broadcast %cst_89 : f32 to vector<8x256xf32>
    %238 = arith.mulf %237, %234 : vector<8x256xf32>
    %239 = arith.select %236, %234, %238 : vector<8x256xi1>, vector<8x256xf32>
    %240 = arith.truncf %239 : vector<8x256xf32> to vector<8x256xbf16>
    %c0_90 = arith.constant 0 : index
    %c0_91 = arith.constant 0 : index
    %241 = vector.load %arg10[%c0_90, %c0_91] : memref<8x1280xbf16, #tpu.memory_space<vmem>>, vector<8x256xbf16>
    tpu.vector_store %arg10[%c0_90, %c0_91], %240 {strides = array<i32>} : memref<8x1280xbf16, #tpu.memory_space<vmem>>, vector<8x256xbf16>,
    %242 = vector.extract_strided_slice %225 {offsets = [16, 0], sizes = [8, 512], strides = [1, 1]} : vector<88x512xf32> to vector<8x512xf32>
    %243 = vector.extract_strided_slice %225 {offsets = [24, 0], sizes = [8, 512], strides = [1, 1]} : vector<88x512xf32> to vector<8x512xf32>
    %244 = arith.maximumf %242, %243 : vector<8x512xf32>
    %245 = vector.extract_strided_slice %244 {offsets = [0, 0], sizes = [8, 256], strides = [1, 1]} : vector<8x512xf32> to vector<8x256xf32>
    %246 = vector.extract_strided_slice %244 {offsets = [0, 256], sizes = [8, 256], strides = [1, 1]} : vector<8x512xf32> to vector<8x256xf32>
    %247 = arith.maximumf %245, %246 : vector<8x256xf32>
    %c0_92 = arith.constant 0 : index
    %c0_93 = arith.constant 0 : index
    %248 = vector.load %arg6[%c0_92, %c0_93] : memref<1x256xf32, #tpu.memory_space<vmem>>, vector<1x256xf32>
    %249 = vector.broadcast %248 : vector<1x256xf32> to vector<8x256xf32>
    %250 = arith.addf %247, %249 : vector<8x256xf32>
    %cst_94 = arith.constant 0.000000e+00 : f32
    %251 = vector.broadcast %cst_94 : f32 to vector<8x256xf32>
    %252 = arith.cmpf oge, %250, %251 : vector<8x256xf32>
    %cst_95 = arith.constant 0.00999999977 : f32
    %253 = vector.broadcast %cst_95 : f32 to vector<8x256xf32>
    %254 = arith.mulf %253, %250 : vector<8x256xf32>
    %255 = arith.select %252, %250, %254 : vector<8x256xi1>, vector<8x256xf32>
    %256 = arith.truncf %255 : vector<8x256xf32> to vector<8x256xbf16>
    %c0_96 = arith.constant 0 : index
    %c256 = arith.constant 256 : index
    %257 = vector.load %arg10[%c0_96, %c256] : memref<8x1280xbf16, #tpu.memory_space<vmem>>, vector<8x256xbf16>
    tpu.vector_store %arg10[%c0_96, %c256], %256 {strides = array<i32>} : memref<8x1280xbf16, #tpu.memory_space<vmem>>, vector<8x256xbf16>,
    %258 = vector.extract_strided_slice %225 {offsets = [32, 0], sizes = [8, 512], strides = [1, 1]} : vector<88x512xf32> to vector<8x512xf32>
    %259 = vector.extract_strided_slice %225 {offsets = [40, 0], sizes = [8, 512], strides = [1, 1]} : vector<88x512xf32> to vector<8x512xf32>
    %260 = arith.maximumf %258, %259 : vector<8x512xf32>
    %261 = vector.extract_strided_slice %260 {offsets = [0, 0], sizes = [8, 256], strides = [1, 1]} : vector<8x512xf32> to vector<8x256xf32>
    %262 = vector.extract_strided_slice %260 {offsets = [0, 256], sizes = [8, 256], strides = [1, 1]} : vector<8x512xf32> to vector<8x256xf32>
    %263 = arith.maximumf %261, %262 : vector<8x256xf32>
    %c0_97 = arith.constant 0 : index
    %c0_98 = arith.constant 0 : index
    %264 = vector.load %arg6[%c0_97, %c0_98] : memref<1x256xf32, #tpu.memory_space<vmem>>, vector<1x256xf32>
    %265 = vector.broadcast %264 : vector<1x256xf32> to vector<8x256xf32>
    %266 = arith.addf %263, %265 : vector<8x256xf32>
    %cst_99 = arith.constant 0.000000e+00 : f32
    %267 = vector.broadcast %cst_99 : f32 to vector<8x256xf32>
    %268 = arith.cmpf oge, %266, %267 : vector<8x256xf32>
    %cst_100 = arith.constant 0.00999999977 : f32
    %269 = vector.broadcast %cst_100 : f32 to vector<8x256xf32>
    %270 = arith.mulf %269, %266 : vector<8x256xf32>
    %271 = arith.select %268, %266, %270 : vector<8x256xi1>, vector<8x256xf32>
    %272 = arith.truncf %271 : vector<8x256xf32> to vector<8x256xbf16>
    %c0_101 = arith.constant 0 : index
    %c512 = arith.constant 512 : index
    %273 = vector.load %arg10[%c0_101, %c512] : memref<8x1280xbf16, #tpu.memory_space<vmem>>, vector<8x256xbf16>
    tpu.vector_store %arg10[%c0_101, %c512], %272 {strides = array<i32>} : memref<8x1280xbf16, #tpu.memory_space<vmem>>, vector<8x256xbf16>,
    %274 = vector.extract_strided_slice %225 {offsets = [48, 0], sizes = [8, 512], strides = [1, 1]} : vector<88x512xf32> to vector<8x512xf32>
    %275 = vector.extract_strided_slice %225 {offsets = [56, 0], sizes = [8, 512], strides = [1, 1]} : vector<88x512xf32> to vector<8x512xf32>
    %276 = arith.maximumf %274, %275 : vector<8x512xf32>
    %277 = vector.extract_strided_slice %276 {offsets = [0, 0], sizes = [8, 256], strides = [1, 1]} : vector<8x512xf32> to vector<8x256xf32>
    %278 = vector.extract_strided_slice %276 {offsets = [0, 256], sizes = [8, 256], strides = [1, 1]} : vector<8x512xf32> to vector<8x256xf32>
    %279 = arith.maximumf %277, %278 : vector<8x256xf32>
    %c0_102 = arith.constant 0 : index
    %c0_103 = arith.constant 0 : index
    %280 = vector.load %arg6[%c0_102, %c0_103] : memref<1x256xf32, #tpu.memory_space<vmem>>, vector<1x256xf32>
    %281 = vector.broadcast %280 : vector<1x256xf32> to vector<8x256xf32>
    %282 = arith.addf %279, %281 : vector<8x256xf32>
    %cst_104 = arith.constant 0.000000e+00 : f32
    %283 = vector.broadcast %cst_104 : f32 to vector<8x256xf32>
    %284 = arith.cmpf oge, %282, %283 : vector<8x256xf32>
    %cst_105 = arith.constant 0.00999999977 : f32
    %285 = vector.broadcast %cst_105 : f32 to vector<8x256xf32>
    %286 = arith.mulf %285, %282 : vector<8x256xf32>
    %287 = arith.select %284, %282, %286 : vector<8x256xi1>, vector<8x256xf32>
    %288 = arith.truncf %287 : vector<8x256xf32> to vector<8x256xbf16>
    %c0_106 = arith.constant 0 : index
    %c768 = arith.constant 768 : index
    %289 = vector.load %arg10[%c0_106, %c768] : memref<8x1280xbf16, #tpu.memory_space<vmem>>, vector<8x256xbf16>
    tpu.vector_store %arg10[%c0_106, %c768], %288 {strides = array<i32>} : memref<8x1280xbf16, #tpu.memory_space<vmem>>, vector<8x256xbf16>,
    %290 = vector.extract_strided_slice %225 {offsets = [64, 0], sizes = [8, 512], strides = [1, 1]} : vector<88x512xf32> to vector<8x512xf32>
    %291 = vector.extract_strided_slice %225 {offsets = [72, 0], sizes = [8, 512], strides = [1, 1]} : vector<88x512xf32> to vector<8x512xf32>
    %292 = arith.maximumf %290, %291 : vector<8x512xf32>
    %293 = vector.extract_strided_slice %292 {offsets = [0, 0], sizes = [8, 256], strides = [1, 1]} : vector<8x512xf32> to vector<8x256xf32>
    %294 = vector.extract_strided_slice %292 {offsets = [0, 256], sizes = [8, 256], strides = [1, 1]} : vector<8x512xf32> to vector<8x256xf32>
    %295 = arith.maximumf %293, %294 : vector<8x256xf32>
    %c0_107 = arith.constant 0 : index
    %c0_108 = arith.constant 0 : index
    %296 = vector.load %arg6[%c0_107, %c0_108] : memref<1x256xf32, #tpu.memory_space<vmem>>, vector<1x256xf32>
    %297 = vector.broadcast %296 : vector<1x256xf32> to vector<8x256xf32>
    %298 = arith.addf %295, %297 : vector<8x256xf32>
    %cst_109 = arith.constant 0.000000e+00 : f32
    %299 = vector.broadcast %cst_109 : f32 to vector<8x256xf32>
    %300 = arith.cmpf oge, %298, %299 : vector<8x256xf32>
    %cst_110 = arith.constant 0.00999999977 : f32
    %301 = vector.broadcast %cst_110 : f32 to vector<8x256xf32>
    %302 = arith.mulf %301, %298 : vector<8x256xf32>
    %303 = arith.select %300, %298, %302 : vector<8x256xi1>, vector<8x256xf32>
    %304 = arith.truncf %303 : vector<8x256xf32> to vector<8x256xbf16>
    %c0_111 = arith.constant 0 : index
    %c1024 = arith.constant 1024 : index
    %305 = vector.load %arg10[%c0_111, %c1024] : memref<8x1280xbf16, #tpu.memory_space<vmem>>, vector<8x256xbf16>
    tpu.vector_store %arg10[%c0_111, %c1024], %304 {strides = array<i32>} : memref<8x1280xbf16, #tpu.memory_space<vmem>>, vector<8x256xbf16>,
    %c0_112 = arith.constant 0 : index
    %c0_113 = arith.constant 0 : index
    %306 = vector.load %arg10[%c0_112, %c0_113] : memref<8x1280xbf16, #tpu.memory_space<vmem>>, vector<8x1280xbf16>
    %c0_114 = arith.constant 0 : index
    %c0_115 = arith.constant 0 : index
    %307 = vector.load %arg4[%c0_114, %c0_115] : memref<1280x10xbf16, #tpu.memory_space<vmem>>, vector<1280x10xbf16>
    %cst_116 = arith.constant dense<0.000000e+00> : vector<8x10xf32>
    %308 = tpu.matmul %306, %307, %cst_116 {dimension_numbers = #tpu.dot_dimension_numbers<[1], [0], [0], [1], [0, 0, 1, 1], [], []>} : vector<8x1280xbf16>, vector<1280x10xbf16>, vector<8x10xf32> -> vector<8x10xf32>
    %c0_117 = arith.constant 0 : index
    %c0_118 = arith.constant 0 : index
    %309 = vector.load %arg7[%c0_117, %c0_118] : memref<1x10xf32, #tpu.memory_space<vmem>>, vector<1x10xf32>
    %310 = vector.broadcast %309 : vector<1x10xf32> to vector<8x10xf32>
    %311 = arith.addf %308, %310 : vector<8x10xf32>
    %c0_119 = arith.constant 0 : index
    %c0_120 = arith.constant 0 : index
    %312 = vector.load %arg8[%c0_119, %c0_120] : memref<8x10xf32, #tpu.memory_space<vmem>>, vector<8x10xf32>
    tpu.vector_store %arg8[%c0_119, %c0_120], %311 {strides = array<i32>} : memref<8x10xf32, #tpu.memory_space<vmem>>, vector<8x10xf32>,
    return
  }
  func.func @transform_0(%arg0: i32) -> (i32, i32, i32) {
    %c0_i32 = arith.constant 0 : i32
    %c0_i32_0 = arith.constant 0 : i32
    %c0_i32_1 = arith.constant 0 : i32
    return %c0_i32, %arg0, %c0_i32_0 : i32, i32, i32
  }
  func.func @transform_1(%arg0: i32) -> (i32, i32) {
    %c0_i32 = arith.constant 0 : i32
    %c0_i32_0 = arith.constant 0 : i32
    %c0_i32_1 = arith.constant 0 : i32
    return %c0_i32, %c0_i32_0 : i32, i32
  }
  func.func @transform_2(%arg0: i32) -> (i32, i32, i32) {
    %c0_i32 = arith.constant 0 : i32
    %c0_i32_0 = arith.constant 0 : i32
    %c0_i32_1 = arith.constant 0 : i32
    %c0_i32_2 = arith.constant 0 : i32
    return %c0_i32, %c0_i32_0, %c0_i32_1 : i32, i32, i32
  }
  func.func @transform_3(%arg0: i32) -> (i32, i32) {
    %c0_i32 = arith.constant 0 : i32
    %c0_i32_0 = arith.constant 0 : i32
    %c0_i32_1 = arith.constant 0 : i32
    return %c0_i32, %c0_i32_0 : i32, i32
  }
  func.func @transform_4(%arg0: i32) -> (i32, i32) {
    %c0_i32 = arith.constant 0 : i32
    %c0_i32_0 = arith.constant 0 : i32
    %c0_i32_1 = arith.constant 0 : i32
    return %c0_i32, %c0_i32_0 : i32, i32
  }
  func.func @transform_5(%arg0: i32) -> (i32, i32) {
    %c0_i32 = arith.constant 0 : i32
    %c0_i32_0 = arith.constant 0 : i32
    %c0_i32_1 = arith.constant 0 : i32
    return %c0_i32, %c0_i32_0 : i32, i32
  }
  func.func @transform_6(%arg0: i32) -> (i32, i32) {
    %c0_i32 = arith.constant 0 : i32
    %c0_i32_0 = arith.constant 0 : i32
    %c0_i32_1 = arith.constant 0 : i32
    return %c0_i32, %c0_i32_0 : i32, i32
  }
  func.func @transform_7(%arg0: i32) -> (i32, i32) {
    %c0_i32 = arith.constant 0 : i32
    %c0_i32_0 = arith.constant 0 : i32
    return %arg0, %c0_i32 : i32, i32
  }
}

</mosaic_0001>

<bundles_post_ra>
// kernel: tile.13
= control target key start
LH: loop header
LB: loop body
LE: loop exit
PB: predicated region body
PF: predicated region fallthrough
CT: control target
= control target key end

     0   :  { %s28_s0 = inlined_call_operand.vmem [shape: f32[16], index: 0, kind: input, shape index: {}]   ;;  %s29_s1 = inlined_call_operand.vmem [shape: f32[13,16], index: 1, kind: output, shape index: {}]  }
   0x1   :  { %v4_v0 = vld [vmem:[%s28_s0] ss:$0 sm:$0xff] }
   0x2   :  { %5 = vst [vmem:[%s29_s1] sm:$0xff] %v4_v0  ;;  %8 = vst [vmem:[%s29_s1 + $0x8] sm:$0xff] %v4_v0 }

// kernel: tile.14
= control target key start
LH: loop header
LB: loop body
LE: loop exit
PB: predicated region body
PF: predicated region fallthrough
CT: control target
= control target key end

     0   :  { %s72_s10 = smov 112   ;;  %s73_s11 = smov 80   ;;  %vm4_vm0 = vcmask 130048   ;;  %vm10_vm1 = vcmask 1048448   ;;  %vm16_vm2 = vcmask 917248   ;;  %vm22_vm3 = vcmask 786048   ;;  %s116_s0 = inlined_call_operand.vmem [shape: f32[13,16], index: 0, kind: input, shape index: {}]   ;;  %s117_s1 = inlined_call_operand.vmem [shape: f32[208], index: 1, kind: output, shape index: {}]  }
   0x1   :  { %v58_v0 = vld [vmem:[%s116_s0 + $0x7] sm:$0x1]   ;;  %v60_v1 = vld [vmem:[%s116_s0 + $0x5] sm:$0x1]   ;;  %s25_s12 = smov 3  ;;  %s32_s17 = smov 3 }
   0x2   :  { %8 = vrot.lane.b32.xlu0 %v58_v0, %s72_s10  ;;  %20 = vrot.lane.b32.xlu1 %v60_v1, %s73_s11  ;;  %v59_v2 = vld [vmem:[%s116_s0 + $0x6] sm:$0x1]   ;;  %s39_s18 = smov 3  ;;  %s74_s19 = smov 96   ;;  %vm29_vm4 = vcmask 654848   ;;  %vm36_vm5 = vcmask 523648  }
   0x3   :  { %v61_v3 = vld [vmem:[%s116_s0 + $0x4] ss:$8 sm:%s25_s12]   ;;  %s75_s20 = smov 64   ;;  %v62_v4 = vld [vmem:[%s116_s0 + $0x3] ss:$8 sm:%s32_s17]   ;;  %s2_s23 = smov 3 }
   0x4   :  { %v63_v5 = vld [vmem:[%s116_s0 + $0x2] ss:$8 sm:%s39_s18]   ;;  %v3_v6 = vld [vmem:[%s116_s0] ss:$8 sm:%s2_s23]   ;;  %s46_s28 = smov 3  ;;  %s76_s29 = smov 48  }
   0x5   :  { %5 = vst.msk [vmem:[#allocation0] sm:$0x3] %vm4_vm0, %v3_v6   ;;  %s77_s30 = smov 32   ;;  %v64_v7 = vld [vmem:[%s116_s0 + $0x1] ss:$8 sm:%s46_s28]   ;;  %s78_s0 = smov 16  }
   0x6   :  { %14 = vrot.lane.b32.xlu0 %v59_v2, %s74_s19  ;;  %27 = vrot.lane.b32.xlu1 %v61_v3, %s75_s20  ;;  %vm43_vm6 = vcmask 392448   ;;  %vm50_vm7 = vcmask 261248  }
   0xa   :  { %34 = vrot.lane.b32.xlu0 %v62_v4, %s76_s29  ;;  %41 = vrot.lane.b32.xlu1 %v63_v5, %s77_s30 }
   0xe   :  { %48 = vrot.lane.b32.xlu0 %v64_v7, %s78_s0 }
  0x74   :  { %v9_v8 = vpop.permute.xlu0 %8   ;;  %v21_v9 = vpop.permute.xlu1 %20  }
  0x75   :  { %11 = vst.msk [vmem:[#allocation0] sm:$0x1] %vm10_vm1, %v9_v8  }
  0x78   :  { %v15_v10 = vpop.permute.xlu0 %14   ;;  %v28_v11 = vpop.permute.xlu1 %27  }
  0x79   :  { %17 = vst.msk [vmem:[#allocation0] sm:$0x1] %vm16_vm2, %v15_v10  }
  0x7a   :  { %23 = vst.msk [vmem:[#allocation0] sm:$0x1] %vm22_vm3, %v21_v9  }
  0x7b   :  { %30 = vst.msk [vmem:[#allocation0] sm:$0x3] %vm29_vm4, %v28_v11  }
  0x7c   :  { %v35_v12 = vpop.permute.xlu0 %34   ;;  %v42_v13 = vpop.permute.xlu1 %41  }
  0x7d   :  { %37 = vst.msk [vmem:[#allocation0] sm:$0x3] %vm36_vm5, %v35_v12  }
  0x7e   :  { %44 = vst.msk [vmem:[#allocation0] sm:$0x3] %vm43_vm6, %v42_v13  }
  0x80   :  { %v49_v14 = vpop.permute.xlu0 %48  }
  0x81   :  { %51 = vst.msk [vmem:[#allocation0] sm:$0x3] %vm50_vm7, %v49_v14  }
  0x88   :  { %v55_v15 = vld [vmem:[#allocation0] sm:$0x3] }
  0x89   :  { %57 = vst [vmem:[%s117_s1] sm:$0x3] %v55_v15 }

// kernel: tile.18
= control target key start
LH: loop header
LB: loop body
LE: loop exit
PB: predicated region body
PF: predicated region fallthrough
CT: control target
= control target key end

     0   :  { %s22_s0 = inlined_call_operand.vmem [shape: f32[32], index: 0, kind: input, shape index: {}]   ;;  %s23_s1 = inlined_call_operand.vmem [shape: f32[6,32], index: 1, kind: output, shape index: {}]  }
   0x1   :  { %v4_v0 = vld [vmem:[%s22_s0] ss:$0 sm:$0xff] }
   0x2   :  { %5 = vst [vmem:[%s23_s1] sm:$0xff] %v4_v0 }

// kernel: tile.19
= control target key start
LH: loop header
LB: loop body
LE: loop exit
PB: predicated region body
PF: predicated region fallthrough
CT: control target
= control target key end

     0   :  { %s37_s8 = smov 96   ;;  %s19_s9 = smov 3  ;;  %vm4_vm0 = vcmask 261120   ;;  %vm10_vm1 = vcmask 1048320   ;;  %vm16_vm2 = vcmask 785920   ;;  %vm23_vm3 = vcmask 523520   ;;  %s65_s0 = inlined_call_operand.vmem [shape: f32[6,32], index: 0, kind: input, shape index: {}]   ;;  %s66_s1 = inlined_call_operand.vmem [shape: f32[192], index: 1, kind: output, shape index: {}]  }
   0x1   :  { %v31_v0 = vld [vmem:[%s65_s0 + $0x3] sm:$0x1]   ;;  %v32_v1 = vld [vmem:[%s65_s0 + $0x2] sm:$0x1]   ;;  %v33_v2 = vld [vmem:[%s65_s0 + $0x1] ss:$4 sm:%s19_s9]  }
   0x2   :  { %8 = vrot.lane.b32.xlu0 %v31_v0, %s37_s8  ;;  %s2_s14 = smov 3  ;;  %s38_s15 = smov 32  }
   0x3   :  { %21 = vrot.lane.b32.xlu1 %v33_v2, %s38_s15  ;;  %v3_v3 = vld [vmem:[%s65_s0] ss:$4 sm:%s2_s14]   ;;  %s39_s0 = smov 64  }
   0x4   :  { %5 = vst.msk [vmem:[#allocation0] sm:$0x3] %vm4_vm0, %v3_v3  }
   0x6   :  { %14 = vrot.lane.b32.xlu0 %v32_v1, %s39_s0 }
  0x74   :  { %v9_v4 = vpop.permute.xlu0 %8  }
  0x75   :  { %11 = vst.msk [vmem:[#allocation0] sm:$0x1] %vm10_vm1, %v9_v4   ;;  %v22_v5 = vpop.permute.xlu1 %21  }
  0x78   :  { %v15_v6 = vpop.permute.xlu0 %14  }
  0x79   :  { %17 = vst.msk [vmem:[#allocation0] sm:$0x1] %vm16_vm2, %v15_v6  }
  0x7a   :  { %24 = vst.msk [vmem:[#allocation0] sm:$0x3] %vm23_vm3, %v22_v5  }
  0x81   :  { %v28_v7 = vld [vmem:[#allocation0] sm:$0x3] }
  0x82   :  { %30 = vst [vmem:[%s66_s1] sm:$0x3] %v28_v7 }

// kernel: pr_cnn_forward.1
= control target key start
LH: loop header
LB: loop body
LE: loop exit
PB: predicated region body
PF: predicated region fallthrough
CT: control target
= control target key end

     0   :  { %v5250_v1 = vmov 0   ;;  %s6473_s1 = inlined_call_operand.vmem [shape: bf16[128,512], index: 1, kind: input, shape index: {}]   ;;  %s6474_s0 = inlined_call_operand.vmem [shape: bf16[26,8,128], index: 0, kind: input, shape index: {}]   ;;  %s6475_s2 = inlined_call_operand.vmem [shape: bf16[3,256,512], index: 2, kind: input, shape index: {}]   ;;  %s6476_s4 = inlined_call_operand.vmem [shape: f32[1,256], index: 4, kind: input, shape index: {}]   ;;  %s6477_s3 = inlined_call_operand.vmem [shape: bf16[1280,10], index: 3, kind: input, shape index: {}]   ;;  %s6478_s5 = inlined_call_operand.vmem [shape: f32[1,256], index: 5, kind: input, shape index: {}]   ;;  %s6479_s6 = inlined_call_operand.vmem [shape: f32[1,10], index: 6, kind: input, shape index: {}]   ;;  %s6480_s7 = inlined_call_operand.vmem [shape: f32[8,10], index: 7, kind: output, shape index: {}]  }
   0x1   :  { %v4821_v0 = vld [vmem:[%s6473_s1 + $0x4] ss:$16 sps:$4 sm:$0xff]   ;;  %355 = vmatprep.mubr.bf16.mxu0 %v5250_v1  ;;  %518 = vmatprep.mubr.bf16.mxu1 %v5250_v1  ;;  %v4823_v2 = vld [vmem:[%s6473_s1 + $0xc] ss:$16 sps:$4 sm:$0xff]   ;;  %v4825_v3 = vld [vmem:[%s6473_s1] ss:$16 sps:$4 sm:$0xff]  }
   0x2   :  { %323 = vmatprep.subr.bf16.mxu0 %v4821_v0  ;;  %v4826_v4 = vld [vmem:[%s6473_s1 + $0x8] ss:$16 sps:$4 sm:$0xff]   ;;  %486 = vmatprep.subr.bf16.mxu1 %v4823_v2  ;;  %v4827_v5 = vld [vmem:[%s6473_s1 + $0x24] ss:$16 sps:$4 sm:$0xff]   ;;  %v4829_v6 = vld [vmem:[%s6473_s1 + $0x2c] ss:$16 sps:$4 sm:$0xff]  }
   0x3   :  { %324 = vmatpush1.bf16.msra.mxu0 %v4825_v3  ;;  %487 = vmatpush1.bf16.msra.mxu1 %v4826_v4  ;;  %v4831_v7 = vld [vmem:[%s6473_s1 + $0x20] ss:$16 sps:$4 sm:$0xff]   ;;  %v4832_v8 = vld [vmem:[%s6473_s1 + $0x28] ss:$16 sps:$4 sm:$0xff]   ;;  %v4833_v9 = vld [vmem:[%s6473_s1 + $0x44] ss:$16 sps:$4 sm:$0xff]  }
   0x4   :  { %325 = vmatprep.subr.bf16.mxu0 %v4827_v5  ;;  %488 = vmatprep.subr.bf16.mxu1 %v4829_v6  ;;  %v4835_v10 = vld [vmem:[%s6473_s1 + $0x4c] ss:$16 sps:$4 sm:$0xff]   ;;  %v4837_v11 = vld [vmem:[%s6473_s1 + $0x40] ss:$16 sps:$4 sm:$0xff]   ;;  %v4838_v12 = vld [vmem:[%s6473_s1 + $0x48] ss:$16 sps:$4 sm:$0xff]  }
   0x5   :  { %v4839_v13 = vld [vmem:[%s6473_s1 + $0x64] ss:$16 sps:$4 sm:$0xff]   ;;  %v4841_v14 = vld [vmem:[%s6473_s1 + $0x6c] ss:$16 sps:$4 sm:$0xff]   ;;  %v4843_v15 = vld [vmem:[%s6473_s1 + $0x60] ss:$16 sps:$4 sm:$0xff]  }
   0x6   :  { %v4844_v16 = vld [vmem:[%s6473_s1 + $0x68] ss:$16 sps:$4 sm:$0xff]   ;;  %v4845_v17 = vld [vmem:[%s6473_s1 + $0x84] ss:$16 sps:$4 sm:$0xff]   ;;  %v4847_v18 = vld [vmem:[%s6473_s1 + $0x8c] ss:$16 sps:$4 sm:$0xff]  }
   0x7   :  { %326 = vmatpush1.bf16.msra.mxu0 %v4831_v7  ;;  %489 = vmatpush1.bf16.msra.mxu1 %v4832_v8  ;;  %v4849_v19 = vld [vmem:[%s6473_s1 + $0x80] ss:$16 sps:$4 sm:$0xff]   ;;  %v4850_v20 = vld [vmem:[%s6473_s1 + $0x88] ss:$16 sps:$4 sm:$0xff]   ;;  %v4851_v21 = vld [vmem:[%s6473_s1 + $0xa4] ss:$16 sps:$4 sm:$0xff]  }
   0x8   :  { %327 = vmatprep.subr.bf16.mxu0 %v4833_v9  ;;  %490 = vmatprep.subr.bf16.mxu1 %v4835_v10  ;;  %v4853_v22 = vld [vmem:[%s6473_s1 + $0xac] ss:$16 sps:$4 sm:$0xff]   ;;  %v4855_v23 = vld [vmem:[%s6473_s1 + $0xa0] ss:$16 sps:$4 sm:$0xff]   ;;  %v4856_v24 = vld [vmem:[%s6473_s1 + $0xa8] ss:$16 sps:$4 sm:$0xff]  }
   0x9   :  { %v4857_v25 = vld [vmem:[%s6473_s1 + $0xc4] ss:$16 sps:$4 sm:$0xff]   ;;  %v4859_v26 = vld [vmem:[%s6473_s1 + $0xcc] ss:$16 sps:$4 sm:$0xff]   ;;  %v4861_v27 = vld [vmem:[%s6473_s1 + $0xc0] ss:$16 sps:$4 sm:$0xff]  }
   0xa   :  { %v4862_v28 = vld [vmem:[%s6473_s1 + $0xc8] ss:$16 sps:$4 sm:$0xff]   ;;  %v4863_v29 = vld [vmem:[%s6473_s1 + $0xe4] ss:$16 sps:$4 sm:$0xff]   ;;  %v4865_v30 = vld [vmem:[%s6473_s1 + $0xec] ss:$16 sps:$4 sm:$0xff]  }
   0xb   :  { %328 = vmatpush1.bf16.msra.mxu0 %v4837_v11  ;;  %491 = vmatpush1.bf16.msra.mxu1 %v4838_v12  ;;  %v4867_v31 = vld [vmem:[%s6473_s1 + $0xe0] ss:$16 sps:$4 sm:$0xff]   ;;  %v4868_v32 = vld [vmem:[%s6473_s1 + $0xe8] ss:$16 sps:$4 sm:$0xff]   ;;  %v4883_v35 = vld [vmem:[%s6475_s2 + $0x204] ss:$16 sps:$4 sm:$0xff]  }
   0xc   :  { %329 = vmatprep.subr.bf16.mxu0 %v4839_v13  ;;  %492 = vmatprep.subr.bf16.mxu1 %v4841_v14  ;;  %v4869_v33 = vld [vmem:[%s6474_s0] sm:$0xff]   ;;  %v4884_v36 = vld [vmem:[%s6475_s2 + $0x208] ss:$16 sps:$4 sm:$0xff]   ;;  %v4886_v37 = vld [vmem:[%s6475_s2 + $0x20c] ss:$16 sps:$4 sm:$0xff]  }
   0xd   :  { %v4881_v34 = vld [vmem:[%s6475_s2 + $0x200] ss:$16 sps:$4 sm:$0xff]   ;;  %v4889_v39 = vld [vmem:[%s6475_s2 + $0x224] ss:$16 sps:$4 sm:$0xff]   ;;  %v4890_v40 = vld [vmem:[%s6475_s2 + $0x228] ss:$16 sps:$4 sm:$0xff]  }
   0xe   :  { %v4887_v38 = vld [vmem:[%s6475_s2 + $0x220] ss:$16 sps:$4 sm:$0xff]   ;;  %v4892_v41 = vld [vmem:[%s6475_s2 + $0x22c] ss:$16 sps:$4 sm:$0xff]   ;;  %v4895_v43 = vld [vmem:[%s6475_s2 + $0x244] ss:$16 sps:$4 sm:$0xff]  }
   0xf   :  { %330 = vmatpush1.bf16.msra.mxu0 %v4843_v15  ;;  %493 = vmatpush1.bf16.msra.mxu1 %v4844_v16  ;;  %v4870_v42 = vld [vmem:[%s6474_s0 + $0x8] sm:$0xff]   ;;  %v4893_v45 = vld [vmem:[%s6475_s2 + $0x240] ss:$16 sps:$4 sm:$0xff]   ;;  %v4901_v47 = vld [vmem:[%s6475_s2 + $0x264] ss:$16 sps:$4 sm:$0xff]  }
  0x10   :  { %331 = vmatprep.subr.bf16.mxu0 %v4845_v17  ;;  %494 = vmatprep.subr.bf16.mxu1 %v4847_v18  ;;  %v4898_v44 = vld [vmem:[%s6475_s2 + $0x24c] ss:$16 sps:$4 sm:$0xff]   ;;  %v4896_v46 = vld [vmem:[%s6475_s2 + $0x248] ss:$16 sps:$4 sm:$0xff]   ;;  %v4899_v49 = vld [vmem:[%s6475_s2 + $0x260] ss:$16 sps:$4 sm:$0xff]  }
  0x11   :  { %v4904_v48 = vld [vmem:[%s6475_s2 + $0x26c] ss:$16 sps:$4 sm:$0xff]   ;;  %v4902_v50 = vld [vmem:[%s6475_s2 + $0x268] ss:$16 sps:$4 sm:$0xff]   ;;  %v4871_v51 = vld [vmem:[%s6474_s0 + $0x10] sm:$0xff]  }
  0x12   :  { %v4907_v52 = vld [vmem:[%s6475_s2 + $0x284] ss:$16 sps:$4 sm:$0xff]   ;;  %v4910_v53 = vld [vmem:[%s6475_s2 + $0x28c] ss:$16 sps:$4 sm:$0xff]   ;;  %v4905_v54 = vld [vmem:[%s6475_s2 + $0x280] ss:$16 sps:$4 sm:$0xff]  }
  0x13   :  { %332 = vmatpush1.bf16.msra.mxu0 %v4849_v19  ;;  %495 = vmatpush1.bf16.msra.mxu1 %v4850_v20  ;;  %v4908_v55 = vld [vmem:[%s6475_s2 + $0x288] ss:$16 sps:$4 sm:$0xff]   ;;  %v4913_v56 = vld [vmem:[%s6475_s2 + $0x2a4] ss:$16 sps:$4 sm:$0xff]   ;;  %v4916_v57 = vld [vmem:[%s6475_s2 + $0x2ac] ss:$16 sps:$4 sm:$0xff]  }
  0x14   :  { %333 = vmatprep.subr.bf16.mxu0 %v4851_v21  ;;  %496 = vmatprep.subr.bf16.mxu1 %v4853_v22  ;;  %v4911_v58 = vld [vmem:[%s6475_s2 + $0x2a0] ss:$16 sps:$4 sm:$0xff]   ;;  %v4914_v59 = vld [vmem:[%s6475_s2 + $0x2a8] ss:$16 sps:$4 sm:$0xff]   ;;  %v4919_v61 = vld [vmem:[%s6475_s2 + $0x2c4] ss:$16 sps:$4 sm:$0xff]  }
  0x15   :  { %v4872_v60 = vld [vmem:[%s6474_s0 + $0x18] sm:$0xff]   ;;  %v4917_v62 = vld [vmem:[%s6475_s2 + $0x2c0] ss:$16 sps:$4 sm:$0xff]   ;;  %v4925_v2 = vld [vmem:[%s6475_s2 + $0x2e4] ss:$16 sps:$4 sm:$0xff]  }
  0x16   :  { %v4920_v63 = vld [vmem:[%s6475_s2 + $0x2c8] ss:$16 sps:$4 sm:$0xff]   ;;  %v4922_v0 = vld [vmem:[%s6475_s2 + $0x2cc] ss:$16 sps:$4 sm:$0xff]   ;;  %v4923_v4 = vld [vmem:[%s6475_s2 + $0x2e0] ss:$16 sps:$4 sm:$0xff]  }
  0x17   :  { %334 = vmatpush1.bf16.msra.mxu0 %v4855_v23  ;;  %497 = vmatpush1.bf16.msra.mxu1 %v4856_v24  ;;  %v4928_v3 = vld [vmem:[%s6475_s2 + $0x2ec] ss:$16 sps:$4 sm:$0xff]   ;;  %v4926_v5 = vld [vmem:[%s6475_s2 + $0x2e8] ss:$16 sps:$4 sm:$0xff]   ;;  %v4873_v6 = vld [vmem:[%s6474_s0 + $0x20] sm:$0xff]  }
  0x18   :  { %335 = vmatprep.subr.bf16.mxu0 %v4857_v25  ;;  %498 = vmatprep.subr.bf16.mxu1 %v4859_v26  ;;  %v4931_v7 = vld [vmem:[%s6475_s2 + $0x304] ss:$16 sps:$4 sm:$0xff]   ;;  %v4934_v8 = vld [vmem:[%s6475_s2 + $0x30c] ss:$16 sps:$4 sm:$0xff]   ;;  %v4929_v9 = vld [vmem:[%s6475_s2 + $0x300] ss:$16 sps:$4 sm:$0xff]  }
  0x19   :  { %v4932_v10 = vld [vmem:[%s6475_s2 + $0x308] ss:$16 sps:$4 sm:$0xff]   ;;  %v4875_v12 = vld [vmem:[%s6474_s0 + $0x30] sm:$0xff]   ;;  %v4877_v14 = vld [vmem:[%s6474_s0 + $0x40] sm:$0xff]  }
  0x1a   :  { %v4874_v11 = vld [vmem:[%s6474_s0 + $0x28] sm:$0xff]   ;;  %v4876_v13 = vld [vmem:[%s6474_s0 + $0x38] sm:$0xff]   ;;  %v4879_v16 = vld [vmem:[%s6474_s0 + $0x50] sm:$0xff]  }
  0x1b   :  { %336 = vmatpush1.bf16.msra.mxu0 %v4861_v27  ;;  %499 = vmatpush1.bf16.msra.mxu1 %v4862_v28  ;;  %v4878_v15 = vld [vmem:[%s6474_s0 + $0x48] sm:$0xff]   ;;  %v4880_v17 = vld [vmem:[%s6474_s0 + $0x58] sm:$0xff]   ;;  %v4937_v18 = vld [vmem:[%s6475_s2 + $0x324] ss:$16 sps:$4 sm:$0xff]  }
  0x1c   :  { %337 = vmatprep.subr.bf16.mxu0 %v4863_v29  ;;  %500 = vmatprep.subr.bf16.mxu1 %v4865_v30  ;;  %v4940_v19 = vld [vmem:[%s6475_s2 + $0x32c] ss:$16 sps:$4 sm:$0xff]   ;;  %v4935_v20 = vld [vmem:[%s6475_s2 + $0x320] ss:$16 sps:$4 sm:$0xff]   ;;  %v4938_v21 = vld [vmem:[%s6475_s2 + $0x328] ss:$16 sps:$4 sm:$0xff]  }
  0x1d   :  { %v4943_v22 = vld [vmem:[%s6475_s2 + $0x344] ss:$16 sps:$4 sm:$0xff]   ;;  %v4946_v23 = vld [vmem:[%s6475_s2 + $0x34c] ss:$16 sps:$4 sm:$0xff]   ;;  %v4941_v24 = vld [vmem:[%s6475_s2 + $0x340] ss:$16 sps:$4 sm:$0xff]  }
  0x1e   :  { %v4944_v25 = vld [vmem:[%s6475_s2 + $0x348] ss:$16 sps:$4 sm:$0xff]   ;;  %v4949_v26 = vld [vmem:[%s6475_s2 + $0x364] ss:$16 sps:$4 sm:$0xff]   ;;  %v4952_v27 = vld [vmem:[%s6475_s2 + $0x36c] ss:$16 sps:$4 sm:$0xff]  }
  0x1f   :  { %338 = vmatpush1.bf16.msra.mxu0 %v4867_v31  ;;  %501 = vmatpush1.bf16.msra.mxu1 %v4868_v32  ;;  %v4947_v28 = vld [vmem:[%s6475_s2 + $0x360] ss:$16 sps:$4 sm:$0xff]   ;;  %v4955_v29 = vld [vmem:[%s6475_s2 + $0x384] ss:$16 sps:$4 sm:$0xff]   ;;  %v4958_v30 = vld [vmem:[%s6475_s2 + $0x38c] ss:$16 sps:$4 sm:$0xff]  }
  0x20   :  { %1622 = vmatprep.subr.bf16.mxu0 %v4883_v35  ;;  %1711 = vmatprep.subr.bf16.mxu1 %v4886_v37  ;;  %v4953_v31 = vld [vmem:[%s6475_s2 + $0x380] ss:$16 sps:$4 sm:$0xff]   ;;  %v4956_v32 = vld [vmem:[%s6475_s2 + $0x388] ss:$16 sps:$4 sm:$0xff]  }
  0x21   :  { %v4959_v35 = vld [vmem:[%s6475_s2 + $0x3a0] ss:$16 sps:$4 sm:$0xff]  }
  0x22   :  { %356 = vmatmul.mubr.bf16.vlgmr.msra.gmra.mrb[0].mxu0 %v4869_v33  ;;  %519 = vmatmul.mubr.bf16.vlgmr.msra.gmra.mrb[0].mxu1 %v4869_v33  ;;  %v4961_v33 = vld [vmem:[%s6475_s2 + $0x3a4] ss:$16 sps:$4 sm:$0xff]  }
  0x23   :  { %365 = vmatprep.mubr.bf16.mxu0 %v5250_v1  ;;  %528 = vmatprep.mubr.bf16.mxu1 %v5250_v1  ;;  %v4965_v37 = vld [vmem:[%s6474_s0 + $0x60] sm:$0xff]  }
  0x24   :  { %1623 = vmatpush1.bf16.msra.mxu0 %v4881_v34  ;;  %1712 = vmatpush1.bf16.msra.mxu1 %v4884_v36  ;;  %v4964_v34 = vld [vmem:[%s6475_s2 + $0x3ac] ss:$16 sps:$4 sm:$0xff]   ;;  %v4962_v36 = vld [vmem:[%s6475_s2 + $0x3a8] ss:$16 sps:$4 sm:$0xff]  }
  0x25   :  { %1624 = vmatprep.subr.bf16.mxu0 %v4889_v39  ;;  %1713 = vmatprep.subr.bf16.mxu1 %v4892_v41  ;;  %v4971_v39 = vld [vmem:[%s6475_s2 + $0x3cc] ss:$16 sps:$4 sm:$0xff]   ;;  %v4969_v41 = vld [vmem:[%s6475_s2 + $0x3c8] ss:$16 sps:$4 sm:$0xff]  }
  0x28   :  { %1625 = vmatpush1.bf16.msra.mxu0 %v4887_v38  ;;  %1714 = vmatpush1.bf16.msra.mxu1 %v4890_v40  ;;  %v4968_v38 = vld [vmem:[%s6475_s2 + $0x3c4] ss:$16 sps:$4 sm:$0xff]   ;;  %v4966_v40 = vld [vmem:[%s6475_s2 + $0x3c0] ss:$16 sps:$4 sm:$0xff]  }
  0x29   :  { %1626 = vmatprep.subr.bf16.mxu0 %v4895_v43  ;;  %1715 = vmatprep.subr.bf16.mxu1 %v4898_v44  ;;  %v4977_v43 = vld [vmem:[%s6475_s2 + $0x3ec] ss:$16 sps:$4 sm:$0xff]   ;;  %v4972_v44 = vld [vmem:[%s6475_s2 + $0x3e0] ss:$16 sps:$4 sm:$0xff]  }
  0x2a   :  { %366 = vmatmul.mubr.bf16.gmra.mrb[4].mxu0 %v4870_v42  ;;  %529 = vmatmul.mubr.bf16.gmra.mrb[4].mxu1 %v4870_v42  ;;  %v4974_v42 = vld [vmem:[%s6475_s2 + $0x3e4] ss:$16 sps:$4 sm:$0xff]  }
  0x2b   :  { %375 = vmatprep.mubr.bf16.mxu0 %v5250_v1  ;;  %538 = vmatprep.mubr.bf16.mxu1 %v5250_v1 }
  0x2c   :  { %1627 = vmatpush1.bf16.msra.mxu0 %v4893_v45  ;;  %1716 = vmatpush1.bf16.msra.mxu1 %v4896_v46  ;;  %v4975_v45 = vld [vmem:[%s6475_s2 + $0x3e8] ss:$16 sps:$4 sm:$0xff]   ;;  %v4980_v46 = vld [vmem:[%s6475_s2 + $0x4] ss:$16 sps:$4 sm:$0xff]  }
  0x2d   :  { %1628 = vmatprep.subr.bf16.mxu0 %v4901_v47  ;;  %1717 = vmatprep.subr.bf16.mxu1 %v4904_v48  ;;  %v4983_v47 = vld [vmem:[%s6475_s2 + $0xc] ss:$16 sps:$4 sm:$0xff]   ;;  %v657_v48 = vlaneseq }
  0x30   :  { %1629 = vmatpush1.bf16.msra.mxu0 %v4899_v49  ;;  %1718 = vmatpush1.bf16.msra.mxu1 %v4902_v50  ;;  %v658_v49 = vshrl.u32 %v657_v48, 7 }
  0x31   :  { %1630 = vmatprep.subr.bf16.mxu0 %v4907_v52  ;;  %1719 = vmatprep.subr.bf16.mxu1 %v4910_v53 }
  0x32   :  { %376 = vmatmul.mubr.bf16.gmra.mrb[8].mxu0 %v4871_v51  ;;  %539 = vmatmul.mubr.bf16.gmra.mrb[8].mxu1 %v4871_v51 }
  0x33   :  { %385 = vmatprep.mubr.bf16.mxu0 %v5250_v1  ;;  %548 = vmatprep.mubr.bf16.mxu1 %v5250_v1 }
  0x34   :  { %1631 = vmatpush1.bf16.msra.mxu0 %v4905_v54  ;;  %1720 = vmatpush1.bf16.msra.mxu1 %v4908_v55 }
  0x35   :  { %1632 = vmatprep.subr.bf16.mxu0 %v4913_v56  ;;  %1721 = vmatprep.subr.bf16.mxu1 %v4916_v57  ;;  %v5650_v56 = vsub.s32 0, %v658_v49 }
  0x38   :  { %1633 = vmatpush1.bf16.msra.mxu0 %v4911_v58  ;;  %1722 = vmatpush1.bf16.msra.mxu1 %v4914_v59  ;;  %v655_v59 = vld [vmem:[%s6476_s4] sm:$0x3] }
  0x39   :  { %1634 = vmatprep.subr.bf16.mxu0 %v4919_v61  ;;  %1723 = vmatprep.subr.bf16.mxu1 %v4922_v0 }
  0x3a   :  { %386 = vmatmul.mubr.bf16.gmra.mrb[12].mxu0 %v4872_v60  ;;  %549 = vmatmul.mubr.bf16.gmra.mrb[12].mxu1 %v4872_v60 }
  0x3b   :  { %395 = vmatprep.mubr.bf16.mxu0 %v5250_v1  ;;  %558 = vmatprep.mubr.bf16.mxu1 %v5250_v1 }
  0x3c   :  { %1635 = vmatpush1.bf16.msra.mxu0 %v4917_v62  ;;  %1724 = vmatpush1.bf16.msra.mxu1 %v4920_v63  ;;  %v5655_v62 = vsub.s32 1, %v658_v49 }
  0x3d   :  { %1636 = vmatprep.subr.bf16.mxu0 %v4925_v2  ;;  %1725 = vmatprep.subr.bf16.mxu1 %v4928_v3  ;;  %v660_v3 = vrot.slane %v655_v59, %v5650_v56 }
  0x40   :  { %1637 = vmatpush1.bf16.msra.mxu0 %v4923_v4  ;;  %1726 = vmatpush1.bf16.msra.mxu1 %v4926_v5  ;;  %v664_v5 = vrot.slane %v655_v59, %v5655_v62 }
  0x41   :  { %1638 = vmatprep.subr.bf16.mxu0 %v4931_v7  ;;  %1727 = vmatprep.subr.bf16.mxu1 %v4934_v8  ;;  %v690_v8 = vld [vmem:[%s6476_s4] sm:$0x3] }
  0x42   :  { %396 = vmatmul.mubr.bf16.gmra.mrb[16].mxu0 %v4873_v6  ;;  %559 = vmatmul.mubr.bf16.gmra.mrb[16].mxu1 %v4873_v6 }
  0x43   :  { %405 = vmatprep.mubr.bf16.mxu0 %v5250_v1  ;;  %568 = vmatprep.mubr.bf16.mxu1 %v5250_v1 }
  0x44   :  { %1639 = vmatpush1.bf16.msra.mxu0 %v4929_v9  ;;  %1728 = vmatpush1.bf16.msra.mxu1 %v4932_v10 }
  0x45   :  { %1640 = vmatprep.subr.bf16.mxu0 %v4937_v18  ;;  %1729 = vmatprep.subr.bf16.mxu1 %v4940_v19 }
  0x48   :  { %1641 = vmatpush1.bf16.msra.mxu0 %v4935_v20  ;;  %1730 = vmatpush1.bf16.msra.mxu1 %v4938_v21 }
  0x49   :  { %1642 = vmatprep.subr.bf16.mxu0 %v4943_v22  ;;  %1731 = vmatprep.subr.bf16.mxu1 %v4946_v23  ;;  %v699_v22 = vrot.slane %v690_v8, %v5655_v62 }
  0x4a   :  { %406 = vmatmul.mubr.bf16.gmra.mrb[20].mxu0 %v4874_v11  ;;  %569 = vmatmul.mubr.bf16.gmra.mrb[20].mxu1 %v4874_v11 }
  0x4b   :  { %415 = vmatprep.mubr.bf16.mxu0 %v5250_v1  ;;  %578 = vmatprep.mubr.bf16.mxu1 %v5250_v1 }
  0x4c   :  { %1643 = vmatpush1.bf16.msra.mxu0 %v4941_v24  ;;  %1732 = vmatpush1.bf16.msra.mxu1 %v4944_v25 }
  0x4d   :  { %1644 = vmatprep.subr.bf16.mxu0 %v4949_v26  ;;  %1733 = vmatprep.subr.bf16.mxu1 %v4952_v27  ;;  %v725_v26 = vld [vmem:[%s6476_s4] sm:$0x3] }
  0x50   :  { %1645 = vmatpush1.bf16.msra.mxu0 %v4947_v28 }
  0x51   :  { %1646 = vmatprep.subr.bf16.mxu0 %v4955_v29 }
  0x52   :  { %416 = vmatmul.mubr.bf16.gmra.mrb[24].mxu0 %v4875_v12  ;;  %579 = vmatmul.mubr.bf16.gmra.mrb[24].mxu1 %v4875_v12 }
  0x53   :  { %425 = vmatprep.mubr.bf16.mxu0 %v5250_v1  ;;  %588 = vmatprep.mubr.bf16.mxu1 %v5250_v1 }
  0x54   :  { %1647 = vmatpush1.bf16.msra.mxu0 %v4953_v31 }
  0x55   :  { %1648 = vmatprep.subr.bf16.mxu0 %v4961_v33 }
  0x58   :  { %1649 = vmatpush1.bf16.msra.mxu0 %v4959_v35 }
  0x59   :  { %1650 = vmatprep.subr.bf16.mxu0 %v4968_v38 }
  0x5a   :  { %426 = vmatmul.mubr.bf16.gmra.mrb[28].mxu0 %v4876_v13  ;;  %589 = vmatmul.mubr.bf16.gmra.mrb[28].mxu1 %v4876_v13 }
  0x5b   :  { %435 = vmatprep.mubr.bf16.mxu0 %v5250_v1  ;;  %598 = vmatprep.mubr.bf16.mxu1 %v5250_v1 }
  0x5c   :  { %1651 = vmatpush1.bf16.msra.mxu0 %v4966_v40 }
  0x5d   :  { %1652 = vmatprep.subr.bf16.mxu0 %v4974_v42 }
  0x60   :  { %1653 = vmatpush1.bf16.msra.mxu0 %v4972_v44 }
  0x61   :  { %2147 = vmatprep.subr.bf16.mxu0 %v4980_v46 }
  0x62   :  { %436 = vmatmul.mubr.bf16.gmra.mrb[32].mxu0 %v4877_v14  ;;  %599 = vmatmul.mubr.bf16.gmra.mrb[32].mxu1 %v4877_v14 }
  0x63   :  { %445 = vmatprep.mubr.bf16.mxu0 %v5250_v1  ;;  %608 = vmatprep.mubr.bf16.mxu1 %v5250_v1 }
  0x6a   :  { %446 = vmatmul.mubr.bf16.gmra.mrb[36].mxu0 %v4878_v15  ;;  %609 = vmatmul.mubr.bf16.gmra.mrb[36].mxu1 %v4878_v15 }
  0x6b   :  { %455 = vmatprep.mubr.bf16.mxu0 %v5250_v1  ;;  %618 = vmatprep.mubr.bf16.mxu1 %v5250_v1 }
  0x72   :  { %456 = vmatmul.mubr.bf16.gmra.mrb[40].mxu0 %v4879_v16  ;;  %619 = vmatmul.mubr.bf16.gmra.mrb[40].mxu1 %v4879_v16 }
  0x73   :  { %465 = vmatprep.mubr.bf16.mxu0 %v5250_v1  ;;  %628 = vmatprep.mubr.bf16.mxu1 %v5250_v1 }
  0x7a   :  { %466 = vmatmul.mubr.bf16.gmra.mrb[44].mxu0 %v4880_v17  ;;  %629 = vmatmul.mubr.bf16.gmra.mrb[44].mxu1 %v4880_v17  ;;  %v695_v17 = vrot.slane %v690_v8, %v5650_v56 }
  0x7b   :  { %475 = vmatprep.mubr.bf16.mxu0 %v5250_v1  ;;  %638 = vmatprep.mubr.bf16.mxu1 %v5250_v1  ;;  %v4950_v1 = vld [vmem:[%s6475_s2 + $0x368] ss:$16 sps:$4 sm:$0xff]  }
  0x7c   :  { %1734 = vmatpush1.bf16.msra.mxu1 %v4950_v1 }
  0x7d   :  { %1735 = vmatprep.subr.bf16.mxu1 %v4958_v30 }
  0x80   :  { %1736 = vmatpush1.bf16.msra.mxu1 %v4956_v32 }
  0x81   :  { %1737 = vmatprep.subr.bf16.mxu1 %v4964_v34  ;;  %v730_v34 = vrot.slane %v725_v26, %v5650_v56 }
  0x82   :  { %476 = vmatmul.mubr.bf16.gmra.mrb[48].mxu0 %v4965_v37  ;;  %639 = vmatmul.mubr.bf16.gmra.mrb[48].mxu1 %v4965_v37 }
  0x84   :  { %1738 = vmatpush1.bf16.msra.mxu1 %v4962_v36 }
  0x85   :  { %1739 = vmatprep.subr.bf16.mxu1 %v4971_v39  ;;  %v734_v39 = vrot.slane %v725_v26, %v5655_v62 }
  0x88   :  { %1740 = vmatpush1.bf16.msra.mxu1 %v4969_v41 }
  0x89   :  { %1741 = vmatprep.subr.bf16.mxu1 %v4977_v43 }
  0x8c   :  { %1742 = vmatpush1.bf16.msra.mxu1 %v4975_v45 }
  0x8d   :  { %2236 = vmatprep.subr.bf16.mxu1 %v4983_v47 }
  0xf5   :  { %v357_v50 = vpop.f32.mrb[0].mxu0  ;;  %v520_v51 = vpop.f32.mrb[0].mxu1 }
  0xf6   :  { %v359_v52 = vpop.f32.mrb[1].mxu0  ;;  %v522_v53 = vpop.f32.mrb[1].mxu1 }
  0xf7   :  { %v361_v54 = vpop.f32.mrb[2].mxu0  ;;  %v524_v55 = vpop.f32.mrb[2].mxu1 }
  0xf8   :  { %v649_v57 = vmax.f32 %v357_v50, %v361_v54  ;;  %v651_v58 = vmax.f32 %v520_v51, %v524_v55  ;;  %v363_v60 = vpop.f32.mrb[3].mxu0  ;;  %v526_v61 = vpop.f32.mrb[3].mxu1  ;;  %v760_v54 = vld [vmem:[%s6476_s4] sm:$0x3] }
  0xf9   :  { %v650_v63 = vmax.f32 %v359_v52, %v363_v60  ;;  %v652_v0 = vmax.f32 %v522_v53, %v526_v61 }
  0xfa   :  { %v653_v2 = vmax.f32 %v649_v57, %v651_v58 }
  0xfb   :  { %v654_v4 = vmax.f32 %v650_v63, %v652_v0 }
  0xfc   :  { %v667_v11 = vadd.f32 %v660_v3, %v653_v2  ;;  %v765_v3 = vrot.slane %v760_v54, %v5650_v56 }
  0xfd   :  { %v367_v6 = vpop.f32.mrb[4].mxu0  ;;  %v530_v7 = vpop.f32.mrb[4].mxu1  ;;  %v668_v14 = vadd.f32 %v664_v5, %v654_v4 }
  0xfe   :  { %v369_v9 = vpop.f32.mrb[5].mxu0  ;;  %v532_v10 = vpop.f32.mrb[5].mxu1  ;;  %v671_v24 = vmul.f32 0.01, %v667_v11  ;;  %vm669_vm0 = vcmp.ge.f32.partialorder %v667_v11, 0.0 }
  0xff   :  { %v371_v12 = vpop.f32.mrb[6].mxu0  ;;  %v534_v13 = vpop.f32.mrb[6].mxu1  ;;  %v672_v27 = vmul.f32 0.01, %v668_v14  ;;  %vm670_vm1 = vcmp.ge.f32.partialorder %v668_v14, 0.0 }
 0x100   :  { %v684_v15 = vmax.f32 %v367_v6, %v371_v12  ;;  %v686_v16 = vmax.f32 %v530_v7, %v534_v13  ;;  %v373_v18 = vpop.f32.mrb[7].mxu0  ;;  %v536_v19 = vpop.f32.mrb[7].mxu1  ;;  %v673_v35 = vsel %vm669_vm0, %v667_v11, %v671_v24  ;;  %v4987_v24 = vld [vmem:[%s6475_s2 + $0x28] ss:$16 sps:$4 sm:$0xff]  }
 0x101   :  { %v685_v20 = vmax.f32 %v369_v9, %v373_v18  ;;  %v687_v21 = vmax.f32 %v532_v10, %v536_v19  ;;  %v674_v45 = vsel %vm670_vm1, %v668_v14, %v672_v27  ;;  %v769_v9 = vrot.slane %v760_v54, %v5655_v62  ;;  %v4986_v19 = vld [vmem:[%s6475_s2 + $0x24] ss:$16 sps:$4 sm:$0xff]   ;;  %v5001_v54 = vld [vmem:[%s6475_s2 + $0x6c] ss:$16 sps:$4 sm:$0xff]  }
 0x102   :  { %v688_v23 = vmax.f32 %v684_v15, %v686_v16  ;;  %v4978_v16 = vld [vmem:[%s6475_s2] ss:$16 sps:$4 sm:$0xff]  }
 0x103   :  { %v689_v25 = vmax.f32 %v685_v20, %v687_v21  ;;  %v4989_v20 = vld [vmem:[%s6475_s2 + $0x2c] ss:$16 sps:$4 sm:$0xff]  }
 0x104   :  { %v702_v28 = vadd.f32 %v695_v17, %v688_v23  ;;  %v4981_v17 = vld [vmem:[%s6475_s2 + $0x8] ss:$16 sps:$4 sm:$0xff]   ;;  %v4984_v23 = vld [vmem:[%s6475_s2 + $0x20] ss:$16 sps:$4 sm:$0xff]  }
 0x105   :  { %v703_v1 = vadd.f32 %v699_v22, %v689_v25  ;;  %v377_v29 = vpop.f32.mrb[8].mxu0  ;;  %v540_v30 = vpop.f32.mrb[8].mxu1  ;;  %v795_v22 = vld [vmem:[%s6476_s4] sm:$0x3] }
 0x106   :  { %vm704_vm2 = vcmp.ge.f32.partialorder %v702_v28, 0.0  ;;  %v706_v31 = vmul.f32 0.01, %v702_v28  ;;  %v379_v32 = vpop.f32.mrb[9].mxu0  ;;  %v542_v33 = vpop.f32.mrb[9].mxu1 }
 0x107   :  { %v707_v36 = vmul.f32 0.01, %v703_v1  ;;  %v381_v37 = vpop.f32.mrb[10].mxu0  ;;  %v544_v38 = vpop.f32.mrb[10].mxu1  ;;  %vm705_vm3 = vcmp.ge.f32.partialorder %v703_v1, 0.0 }
 0x108   :  { %v708_v40 = vsel %vm704_vm2, %v702_v28, %v706_v31  ;;  %v719_v41 = vmax.f32 %v377_v29, %v381_v37  ;;  %v721_v42 = vmax.f32 %v540_v30, %v544_v38  ;;  %v383_v43 = vpop.f32.mrb[11].mxu0  ;;  %v546_v44 = vpop.f32.mrb[11].mxu1  ;;  %v4992_v28 = vld [vmem:[%s6475_s2 + $0x44] ss:$16 sps:$4 sm:$0xff]  }
 0x109   :  { %v5670_v46 = vpack.c.bf16 %v708_v40, %v673_v35  ;;  %v720_v47 = vmax.f32 %v379_v32, %v383_v43  ;;  %v722_v48 = vmax.f32 %v542_v33, %v546_v44  ;;  %v709_v49 = vsel %vm705_vm3, %v703_v1, %v707_v36  ;;  %v4995_v1 = vld [vmem:[%s6475_s2 + $0x4c] ss:$16 sps:$4 sm:$0xff]  }
 0x10a   :  { %v723_v50 = vmax.f32 %v719_v41, %v721_v42  ;;  %v5672_v51 = vpack.c.bf16 %v709_v49, %v674_v45  ;;  %v800_v35 = vrot.slane %v795_v22, %v5650_v56 }
 0x10b   :  { %v724_v52 = vmax.f32 %v720_v47, %v722_v48 }
 0x10c   :  { %v737_v53 = vadd.f32 %v730_v34, %v723_v50  ;;  %v4993_v50 = vld [vmem:[%s6475_s2 + $0x48] ss:$16 sps:$4 sm:$0xff]  }
 0x10d   :  { %v738_v55 = vadd.f32 %v734_v39, %v724_v52  ;;  %v387_v57 = vpop.f32.mrb[12].mxu0  ;;  %v550_v58 = vpop.f32.mrb[12].mxu1 }
 0x10e   :  { %vm739_vm4 = vcmp.ge.f32.partialorder %v737_v53, 0.0  ;;  %v741_v59 = vmul.f32 0.01, %v737_v53  ;;  %v389_v60 = vpop.f32.mrb[13].mxu0  ;;  %v552_v61 = vpop.f32.mrb[13].mxu1 }
 0x10f   :  { %v742_v63 = vmul.f32 0.01, %v738_v55  ;;  %v391_v0 = vpop.f32.mrb[14].mxu0  ;;  %v554_v2 = vpop.f32.mrb[14].mxu1  ;;  %vm740_vm5 = vcmp.ge.f32.partialorder %v738_v55, 0.0 }
 0x110   :  { %v743_v4 = vsel %vm739_vm4, %v737_v53, %v741_v59  ;;  %v754_v5 = vmax.f32 %v387_v57, %v391_v0  ;;  %v756_v6 = vmax.f32 %v550_v58, %v554_v2  ;;  %v393_v7 = vpop.f32.mrb[15].mxu0  ;;  %v556_v8 = vpop.f32.mrb[15].mxu1  ;;  %v4998_v53 = vld [vmem:[%s6475_s2 + $0x64] ss:$16 sps:$4 sm:$0xff]   ;;  %v830_v57 = vld [vmem:[%s6476_s4] sm:$0x3] }
 0x111   :  { %v4592_v10 = vpack.c.bf16 %v743_v4, %v708_v40  ;;  %v755_v11 = vmax.f32 %v389_v60, %v393_v7  ;;  %v757_v12 = vmax.f32 %v552_v61, %v556_v8  ;;  %v744_v13 = vsel %vm740_vm5, %v738_v55, %v742_v63  ;;  %v4996_v58 = vld [vmem:[%s6475_s2 + $0x60] ss:$16 sps:$4 sm:$0xff]   ;;  %v4999_v59 = vld [vmem:[%s6475_s2 + $0x68] ss:$16 sps:$4 sm:$0xff]   ;;  %v5004_v0 = vld [vmem:[%s6475_s2 + $0x84] ss:$16 sps:$4 sm:$0xff]  }
 0x112   :  { %v758_v14 = vmax.f32 %v754_v5, %v756_v6  ;;  %v4593_v15 = vpack.c.bf16 %v744_v13, %v709_v49  ;;  %v804_v40 = vrot.slane %v795_v22, %v5655_v62  ;;  %v4990_v49 = vld [vmem:[%s6475_s2 + $0x40] ss:$16 sps:$4 sm:$0xff]   ;;  %v5007_v2 = vld [vmem:[%s6475_s2 + $0x8c] ss:$16 sps:$4 sm:$0xff]  }
 0x113   :  { %v759_v18 = vmax.f32 %v755_v11, %v757_v12  ;;  %v5002_v22 = vld [vmem:[%s6475_s2 + $0x80] ss:$16 sps:$4 sm:$0xff]  }
 0x114   :  { %v772_v21 = vadd.f32 %v765_v3, %v758_v14  ;;  %1654 = vmatprep.mubr.bf16.mxu0 %v4593_v15  ;;  %1743 = vmatprep.mubr.bf16.mxu1 %v4593_v15  ;;  %v839_v14 = vrot.slane %v830_v57, %v5655_v62 }
 0x115   :  { %v773_v25 = vadd.f32 %v769_v9, %v759_v18  ;;  %v397_v26 = vpop.f32.mrb[16].mxu0  ;;  %v560_v27 = vpop.f32.mrb[16].mxu1  ;;  %1655 = vmatmul.mubr.bf16.vlgmr.msra.gmra.mrb[52].mxu0 %v4592_v10  ;;  %1744 = vmatmul.mubr.bf16.vlgmr.msra.gmra.mrb[52].mxu1 %v4592_v10  ;;  %v835_v9 = vrot.slane %v830_v57, %v5650_v56 }
 0x116   :  { %v776_v29 = vmul.f32 0.01, %v772_v21  ;;  %v399_v30 = vpop.f32.mrb[17].mxu0  ;;  %v562_v31 = vpop.f32.mrb[17].mxu1  ;;  %vm774_vm6 = vcmp.ge.f32.partialorder %v772_v21, 0.0  ;;  %2148 = vmatpush1.bf16.msra.mxu0 %v4978_v16  ;;  %2237 = vmatpush1.bf16.msra.mxu1 %v4981_v17 }
 0x117   :  { %v777_v32 = vmul.f32 0.01, %v773_v25  ;;  %v401_v33 = vpop.f32.mrb[18].mxu0  ;;  %v564_v34 = vpop.f32.mrb[18].mxu1  ;;  %vm775_vm7 = vcmp.ge.f32.partialorder %v773_v25, 0.0  ;;  %2149 = vmatprep.subr.bf16.mxu0 %v4986_v19  ;;  %2238 = vmatprep.subr.bf16.mxu1 %v4989_v20 }
 0x118   :  { %v789_v36 = vmax.f32 %v397_v26, %v401_v33  ;;  %v791_v37 = vmax.f32 %v560_v27, %v564_v34  ;;  %v403_v38 = vpop.f32.mrb[19].mxu0  ;;  %v566_v39 = vpop.f32.mrb[19].mxu1  ;;  %v778_v41 = vsel %vm774_vm6, %v772_v21, %v776_v29  ;;  %v5013_v26 = vld [vmem:[%s6475_s2 + $0xac] ss:$16 sps:$4 sm:$0xff]   ;;  %v5011_v29 = vld [vmem:[%s6475_s2 + $0xa8] ss:$16 sps:$4 sm:$0xff]  }
 0x119   :  { %v790_v42 = vmax.f32 %v399_v30, %v403_v38  ;;  %v792_v43 = vmax.f32 %v562_v31, %v566_v39  ;;  %v779_v44 = vsel %vm775_vm7, %v773_v25, %v777_v32  ;;  %v5708_v45 = vpack.c.bf16 %v778_v41, %v743_v4  ;;  %v5010_v25 = vld [vmem:[%s6475_s2 + $0xa4] ss:$16 sps:$4 sm:$0xff]   ;;  %v5019_v34 = vld [vmem:[%s6475_s2 + $0xcc] ss:$16 sps:$4 sm:$0xff]  }
 0x11a   :  { %v793_v47 = vmax.f32 %v789_v36, %v791_v37  ;;  %v5710_v48 = vpack.c.bf16 %v779_v44, %v744_v13  ;;  %2150 = vmatpush1.bf16.msra.mxu0 %v4984_v23  ;;  %2239 = vmatpush1.bf16.msra.mxu1 %v4987_v24  ;;  %v5005_v23 = vld [vmem:[%s6475_s2 + $0x88] ss:$16 sps:$4 sm:$0xff]   ;;  %v5016_v33 = vld [vmem:[%s6475_s2 + $0xc4] ss:$16 sps:$4 sm:$0xff]  }
 0x11b   :  { %v794_v52 = vmax.f32 %v790_v42, %v792_v43  ;;  %2151 = vmatprep.subr.bf16.mxu0 %v4992_v28  ;;  %2240 = vmatprep.subr.bf16.mxu1 %v4995_v1  ;;  %v865_v28 = vld [vmem:[%s6476_s4] sm:$0x3] }
 0x11c   :  { %v807_v55 = vadd.f32 %v800_v35, %v793_v47  ;;  %v5008_v1 = vld [vmem:[%s6475_s2 + $0xa0] ss:$16 sps:$4 sm:$0xff]  }
 0x11d   :  { %v808_v60 = vadd.f32 %v804_v40, %v794_v52  ;;  %v407_v61 = vpop.f32.mrb[20].mxu0  ;;  %v570_v63 = vpop.f32.mrb[20].mxu1 }
 0x11e   :  { %v811_v3 = vmul.f32 0.01, %v807_v55  ;;  %v409_v4 = vpop.f32.mrb[21].mxu0  ;;  %v572_v5 = vpop.f32.mrb[21].mxu1  ;;  %vm809_vm8 = vcmp.ge.f32.partialorder %v807_v55, 0.0  ;;  %2152 = vmatpush1.bf16.msra.mxu0 %v4990_v49  ;;  %2241 = vmatpush1.bf16.msra.mxu1 %v4993_v50  ;;  %v874_v49 = vrot.slane %v865_v28, %v5655_v62 }
 0x11f   :  { %v812_v6 = vmul.f32 0.01, %v808_v60  ;;  %v411_v7 = vpop.f32.mrb[22].mxu0  ;;  %v574_v8 = vpop.f32.mrb[22].mxu1  ;;  %vm810_vm9 = vcmp.ge.f32.partialorder %v808_v60, 0.0  ;;  %2153 = vmatprep.subr.bf16.mxu0 %v4998_v53  ;;  %2242 = vmatprep.subr.bf16.mxu1 %v5001_v54 }
 0x120   :  { %v824_v10 = vmax.f32 %v407_v61, %v411_v7  ;;  %v826_v11 = vmax.f32 %v570_v63, %v574_v8  ;;  %v413_v12 = vpop.f32.mrb[23].mxu0  ;;  %v576_v13 = vpop.f32.mrb[23].mxu1  ;;  %v813_v15 = vsel %vm809_vm8, %v807_v55, %v811_v3  ;;  %v5022_v63 = vld [vmem:[%s6475_s2 + $0xe4] ss:$16 sps:$4 sm:$0xff]   ;;  %v900_v3 = vld [vmem:[%s6476_s4] sm:$0x3] }
 0x121   :  { %v825_v16 = vmax.f32 %v409_v4, %v413_v12  ;;  %v827_v17 = vmax.f32 %v572_v5, %v576_v13  ;;  %v814_v18 = vsel %vm810_vm9, %v808_v60, %v812_v6  ;;  %v4594_v19 = vpack.c.bf16 %v813_v15, %v778_v41  ;;  %v5017_v60 = vld [vmem:[%s6475_s2 + $0xc8] ss:$16 sps:$4 sm:$0xff]   ;;  %v5020_v4 = vld [vmem:[%s6475_s2 + $0xe0] ss:$16 sps:$4 sm:$0xff]  }
 0x122   :  { %v828_v20 = vmax.f32 %v824_v10, %v826_v11  ;;  %v4595_v21 = vpack.c.bf16 %v814_v18, %v779_v44  ;;  %2154 = vmatpush1.bf16.msra.mxu0 %v4996_v58  ;;  %2243 = vmatpush1.bf16.msra.mxu1 %v4999_v59  ;;  %v870_v41 = vrot.slane %v865_v28, %v5650_v56  ;;  %v5014_v59 = vld [vmem:[%s6475_s2 + $0xc0] ss:$16 sps:$4 sm:$0xff]   ;;  %v5023_v5 = vld [vmem:[%s6475_s2 + $0xe8] ss:$16 sps:$4 sm:$0xff]   ;;  %v5031_v10 = vld [vmem:[%s6475_s2 + $0x10c] ss:$16 sps:$4 sm:$0xff]  }
 0x123   :  { %v829_v24 = vmax.f32 %v825_v16, %v827_v17  ;;  %2155 = vmatprep.subr.bf16.mxu0 %v5004_v0  ;;  %2244 = vmatprep.subr.bf16.mxu1 %v5007_v2  ;;  %v5025_v0 = vld [vmem:[%s6475_s2 + $0xec] ss:$16 sps:$4 sm:$0xff]   ;;  %v905_v17 = vrot.slane %v900_v3, %v5650_v56 }
 0x124   :  { %v842_v27 = vadd.f32 %v835_v9, %v828_v20  ;;  %1664 = vmatprep.mubr.bf16.mxu0 %v4595_v21  ;;  %1753 = vmatprep.mubr.bf16.mxu1 %v4595_v21  ;;  %v5028_v9 = vld [vmem:[%s6475_s2 + $0x104] ss:$16 sps:$4 sm:$0xff]  }
 0x125   :  { %v843_v30 = vadd.f32 %v839_v14, %v829_v24  ;;  %v417_v31 = vpop.f32.mrb[24].mxu0  ;;  %v580_v32 = vpop.f32.mrb[24].mxu1  ;;  %1665 = vmatmul.mubr.bf16.gmra.mrb[56].mxu0 %v4594_v19  ;;  %1754 = vmatmul.mubr.bf16.gmra.mrb[56].mxu1 %v4594_v19 }
 0x126   :  { %v846_v35 = vmul.f32 0.01, %v842_v27  ;;  %v419_v36 = vpop.f32.mrb[25].mxu0  ;;  %v582_v37 = vpop.f32.mrb[25].mxu1  ;;  %vm844_vm10 = vcmp.ge.f32.partialorder %v842_v27, 0.0  ;;  %2156 = vmatpush1.bf16.msra.mxu0 %v5002_v22  ;;  %2245 = vmatpush1.bf16.msra.mxu1 %v5005_v23  ;;  %v909_v22 = vrot.slane %v900_v3, %v5655_v62 }
 0x127   :  { %v847_v38 = vmul.f32 0.01, %v843_v30  ;;  %v421_v39 = vpop.f32.mrb[26].mxu0  ;;  %v584_v40 = vpop.f32.mrb[26].mxu1  ;;  %vm845_vm11 = vcmp.ge.f32.partialorder %v843_v30, 0.0  ;;  %2157 = vmatprep.subr.bf16.mxu0 %v5010_v25  ;;  %2246 = vmatprep.subr.bf16.mxu1 %v5013_v26 }
 0x128   :  { %v859_v42 = vmax.f32 %v417_v31, %v421_v39  ;;  %v861_v43 = vmax.f32 %v580_v32, %v584_v40  ;;  %v423_v44 = vpop.f32.mrb[27].mxu0  ;;  %v586_v47 = vpop.f32.mrb[27].mxu1  ;;  %v848_v50 = vsel %vm844_vm10, %v842_v27, %v846_v35  ;;  %v5034_v32 = vld [vmem:[%s6475_s2 + $0x124] ss:$16 sps:$4 sm:$0xff]   ;;  %v935_v35 = vld [vmem:[%s6476_s4] sm:$0x3] }
 0x129   :  { %v860_v52 = vmax.f32 %v419_v36, %v423_v44  ;;  %v862_v53 = vmax.f32 %v582_v37, %v586_v47  ;;  %v849_v54 = vsel %vm845_vm11, %v843_v30, %v847_v38  ;;  %v5770_v55 = vpack.c.bf16 %v848_v50, %v813_v15  ;;  %v5029_v30 = vld [vmem:[%s6475_s2 + $0x108] ss:$16 sps:$4 sm:$0xff]   ;;  %v5032_v36 = vld [vmem:[%s6475_s2 + $0x120] ss:$16 sps:$4 sm:$0xff]  }
 0x12a   :  { %v863_v57 = vmax.f32 %v859_v42, %v861_v43  ;;  %v5772_v58 = vpack.c.bf16 %v849_v54, %v814_v18  ;;  %2158 = vmatpush1.bf16.msra.mxu0 %v5008_v1  ;;  %2247 = vmatpush1.bf16.msra.mxu1 %v5011_v29  ;;  %v5026_v29 = vld [vmem:[%s6475_s2 + $0x100] ss:$16 sps:$4 sm:$0xff]   ;;  %v5035_v37 = vld [vmem:[%s6475_s2 + $0x128] ss:$16 sps:$4 sm:$0xff]   ;;  %v5043_v42 = vld [vmem:[%s6475_s2 + $0x14c] ss:$16 sps:$4 sm:$0xff]  }
 0x12b   :  { %v864_v61 = vmax.f32 %v860_v52, %v862_v53  ;;  %2159 = vmatprep.subr.bf16.mxu0 %v5016_v33  ;;  %2248 = vmatprep.subr.bf16.mxu1 %v5019_v34  ;;  %v5037_v33 = vld [vmem:[%s6475_s2 + $0x12c] ss:$16 sps:$4 sm:$0xff]   ;;  %v940_v53 = vrot.slane %v935_v35, %v5650_v56 }
 0x12c   :  { %v877_v2 = vadd.f32 %v870_v41, %v863_v57  ;;  %v5040_v41 = vld [vmem:[%s6475_s2 + $0x144] ss:$16 sps:$4 sm:$0xff]  }
 0x12d   :  { %v878_v6 = vadd.f32 %v874_v49, %v864_v61  ;;  %v427_v7 = vpop.f32.mrb[28].mxu0  ;;  %v590_v8 = vpop.f32.mrb[28].mxu1  ;;  %v944_v61 = vrot.slane %v935_v35, %v5655_v62 }
 0x12e   :  { %v881_v11 = vmul.f32 0.01, %v877_v2  ;;  %v429_v12 = vpop.f32.mrb[29].mxu0  ;;  %v592_v13 = vpop.f32.mrb[29].mxu1  ;;  %vm879_vm12 = vcmp.ge.f32.partialorder %v877_v2, 0.0  ;;  %2160 = vmatpush1.bf16.msra.mxu0 %v5014_v59  ;;  %2249 = vmatpush1.bf16.msra.mxu1 %v5017_v60 }
 0x12f   :  { %v882_v14 = vmul.f32 0.01, %v878_v6  ;;  %v431_v15 = vpop.f32.mrb[30].mxu0  ;;  %v594_v16 = vpop.f32.mrb[30].mxu1  ;;  %vm880_vm13 = vcmp.ge.f32.partialorder %v878_v6, 0.0  ;;  %2161 = vmatprep.subr.bf16.mxu0 %v5022_v63  ;;  %2250 = vmatprep.subr.bf16.mxu1 %v5025_v0 }
 0x130   :  { %v894_v18 = vmax.f32 %v427_v7, %v431_v15  ;;  %v896_v19 = vmax.f32 %v590_v8, %v594_v16  ;;  %v433_v20 = vpop.f32.mrb[31].mxu0  ;;  %v596_v21 = vpop.f32.mrb[31].mxu1  ;;  %v883_v23 = vsel %vm879_vm12, %v877_v2, %v881_v11  ;;  %v5038_v7 = vld [vmem:[%s6475_s2 + $0x140] ss:$16 sps:$4 sm:$0xff]   ;;  %v5041_v8 = vld [vmem:[%s6475_s2 + $0x148] ss:$16 sps:$4 sm:$0xff]  }
 0x131   :  { %v895_v24 = vmax.f32 %v429_v12, %v433_v20  ;;  %v897_v25 = vmax.f32 %v592_v13, %v596_v21  ;;  %v884_v26 = vsel %vm880_vm13, %v878_v6, %v882_v14  ;;  %v4596_v27 = vpack.c.bf16 %v883_v23, %v848_v50  ;;  %v5049_v11 = vld [vmem:[%s6475_s2 + $0x16c] ss:$16 sps:$4 sm:$0xff]   ;;  %v970_v13 = vld [vmem:[%s6476_s4] sm:$0x3]  ;;  %v5047_v15 = vld [vmem:[%s6475_s2 + $0x168] ss:$16 sps:$4 sm:$0xff]  }
 0x132   :  { %v898_v28 = vmax.f32 %v894_v18, %v896_v19  ;;  %v4597_v1 = vpack.c.bf16 %v884_v26, %v849_v54  ;;  %2162 = vmatpush1.bf16.msra.mxu0 %v5020_v4  ;;  %2251 = vmatpush1.bf16.msra.mxu1 %v5023_v5  ;;  %v5044_v14 = vld [vmem:[%s6475_s2 + $0x160] ss:$16 sps:$4 sm:$0xff]   ;;  %v5052_v19 = vld [vmem:[%s6475_s2 + $0x184] ss:$16 sps:$4 sm:$0xff]   ;;  %v5055_v20 = vld [vmem:[%s6475_s2 + $0x18c] ss:$16 sps:$4 sm:$0xff]  }
 0x133   :  { %v899_v31 = vmax.f32 %v895_v24, %v897_v25  ;;  %2163 = vmatprep.subr.bf16.mxu0 %v5028_v9  ;;  %2252 = vmatprep.subr.bf16.mxu1 %v5031_v10  ;;  %v5046_v10 = vld [vmem:[%s6475_s2 + $0x164] ss:$16 sps:$4 sm:$0xff]  }
 0x134   :  { %v912_v34 = vadd.f32 %v905_v17, %v898_v28  ;;  %1674 = vmatprep.mubr.bf16.mxu0 %v4597_v1  ;;  %1763 = vmatprep.mubr.bf16.mxu1 %v4597_v1 }
 0x135   :  { %v913_v38 = vadd.f32 %v909_v22, %v899_v31  ;;  %v437_v39 = vpop.f32.mrb[32].mxu0  ;;  %v600_v40 = vpop.f32.mrb[32].mxu1  ;;  %1675 = vmatmul.mubr.bf16.gmra.mrb[60].mxu0 %v4596_v27  ;;  %1764 = vmatmul.mubr.bf16.gmra.mrb[60].mxu1 %v4596_v27  ;;  %v975_v27 = vrot.slane %v970_v13, %v5650_v56  ;;  %v979_v31 = vrot.slane %v970_v13, %v5655_v62 }
 0x136   :  { %v916_v43 = vmul.f32 0.01, %v912_v34  ;;  %v439_v44 = vpop.f32.mrb[33].mxu0  ;;  %v602_v47 = vpop.f32.mrb[33].mxu1  ;;  %vm914_vm14 = vcmp.ge.f32.partialorder %v912_v34, 0.0  ;;  %2164 = vmatpush1.bf16.msra.mxu0 %v5026_v29  ;;  %2253 = vmatpush1.bf16.msra.mxu1 %v5029_v30 }
 0x137   :  { %v917_v49 = vmul.f32 0.01, %v913_v38  ;;  %v441_v50 = vpop.f32.mrb[34].mxu0  ;;  %v604_v52 = vpop.f32.mrb[34].mxu1  ;;  %vm915_vm15 = vcmp.ge.f32.partialorder %v913_v38, 0.0  ;;  %2165 = vmatprep.subr.bf16.mxu0 %v5034_v32  ;;  %2254 = vmatprep.subr.bf16.mxu1 %v5037_v33 }
 0x138   :  { %v929_v54 = vmax.f32 %v437_v39, %v441_v50  ;;  %v931_v57 = vmax.f32 %v600_v40, %v604_v52  ;;  %v443_v59 = vpop.f32.mrb[35].mxu0  ;;  %v606_v60 = vpop.f32.mrb[35].mxu1  ;;  %v918_v63 = vsel %vm914_vm14, %v912_v34, %v916_v43  ;;  %v5050_v39 = vld [vmem:[%s6475_s2 + $0x180] ss:$16 sps:$4 sm:$0xff]   ;;  %v5053_v40 = vld [vmem:[%s6475_s2 + $0x188] ss:$16 sps:$4 sm:$0xff]  }
 0x139   :  { %v930_v0 = vmax.f32 %v439_v44, %v443_v59  ;;  %v932_v2 = vmax.f32 %v602_v47, %v606_v60  ;;  %v919_v3 = vsel %vm915_vm15, %v913_v38, %v917_v49  ;;  %v5832_v4 = vpack.c.bf16 %v918_v63, %v883_v23  ;;  %v5061_v43 = vld [vmem:[%s6475_s2 + $0x1ac] ss:$16 sps:$4 sm:$0xff]   ;;  %v1005_v47 = vld [vmem:[%s6476_s4] sm:$0x3]  ;;  %v5059_v50 = vld [vmem:[%s6475_s2 + $0x1a8] ss:$16 sps:$4 sm:$0xff]  }
 0x13a   :  { %v933_v5 = vmax.f32 %v929_v54, %v931_v57  ;;  %v5834_v6 = vpack.c.bf16 %v919_v3, %v884_v26  ;;  %2166 = vmatpush1.bf16.msra.mxu0 %v5032_v36  ;;  %2255 = vmatpush1.bf16.msra.mxu1 %v5035_v37  ;;  %v5056_v49 = vld [vmem:[%s6475_s2 + $0x1a0] ss:$16 sps:$4 sm:$0xff]   ;;  %v5064_v57 = vld [vmem:[%s6475_s2 + $0x1c4] ss:$16 sps:$4 sm:$0xff]   ;;  %v5067_v59 = vld [vmem:[%s6475_s2 + $0x1cc] ss:$16 sps:$4 sm:$0xff]  }
 0x13b   :  { %v934_v9 = vmax.f32 %v930_v0, %v932_v2  ;;  %2167 = vmatprep.subr.bf16.mxu0 %v5040_v41  ;;  %2256 = vmatprep.subr.bf16.mxu1 %v5043_v42  ;;  %v5058_v42 = vld [vmem:[%s6475_s2 + $0x1a4] ss:$16 sps:$4 sm:$0xff]  }
 0x13c   :  { %v947_v12 = vadd.f32 %v940_v53, %v933_v5  ;;  %v1010_v5 = vrot.slane %v1005_v47, %v5650_v56 }
 0x13d   :  { %v948_v16 = vadd.f32 %v944_v61, %v934_v9  ;;  %v447_v17 = vpop.f32.mrb[36].mxu0  ;;  %v610_v18 = vpop.f32.mrb[36].mxu1 }
 0x13e   :  { %v951_v21 = vmul.f32 0.01, %v947_v12  ;;  %v449_v22 = vpop.f32.mrb[37].mxu0  ;;  %v612_v23 = vpop.f32.mrb[37].mxu1  ;;  %vm949_vm0 = vcmp.ge.f32.partialorder %v947_v12, 0.0  ;;  %2168 = vmatpush1.bf16.msra.mxu0 %v5038_v7  ;;  %2257 = vmatpush1.bf16.msra.mxu1 %v5041_v8 }
 0x13f   :  { %v952_v24 = vmul.f32 0.01, %v948_v16  ;;  %v451_v25 = vpop.f32.mrb[38].mxu0  ;;  %v614_v26 = vpop.f32.mrb[38].mxu1  ;;  %vm950_vm1 = vcmp.ge.f32.partialorder %v948_v16, 0.0  ;;  %2169 = vmatprep.subr.bf16.mxu0 %v5046_v10  ;;  %2258 = vmatprep.subr.bf16.mxu1 %v5049_v11  ;;  %v1014_v11 = vrot.slane %v1005_v47, %v5655_v62 }
 0x140   :  { %v964_v28 = vmax.f32 %v447_v17, %v451_v25  ;;  %v966_v1 = vmax.f32 %v610_v18, %v614_v26  ;;  %v453_v29 = vpop.f32.mrb[39].mxu0  ;;  %v616_v30 = vpop.f32.mrb[39].mxu1  ;;  %v953_v32 = vsel %vm949_vm0, %v947_v12, %v951_v21  ;;  %v1040_v25 = vld [vmem:[%s6476_s4] sm:$0x3] }
 0x141   :  { %v965_v33 = vmax.f32 %v449_v22, %v453_v29  ;;  %v967_v34 = vmax.f32 %v612_v23, %v616_v30  ;;  %v954_v35 = vsel %vm950_vm1, %v948_v16, %v952_v24  ;;  %v4598_v36 = vpack.c.bf16 %v953_v32, %v918_v63  ;;  %v5070_v22 = vld [vmem:[%s6475_s2 + $0x1e4] ss:$16 sps:$4 sm:$0xff]   ;;  %v5073_v23 = vld [vmem:[%s6475_s2 + $0x1ec] ss:$16 sps:$4 sm:$0xff]   ;;  %v5068_v26 = vld [vmem:[%s6475_s2 + $0x1e0] ss:$16 sps:$4 sm:$0xff]  }
 0x142   :  { %v968_v37 = vmax.f32 %v964_v28, %v966_v1  ;;  %v4599_v38 = vpack.c.bf16 %v954_v35, %v919_v3  ;;  %2170 = vmatpush1.bf16.msra.mxu0 %v5044_v14  ;;  %2259 = vmatpush1.bf16.msra.mxu1 %v5047_v15  ;;  %v5076_v30 = vld [vmem:[%s6475_s2 + $0x404] ss:$16 sps:$4 sm:$0xff]  }
 0x143   :  { %v969_v41 = vmax.f32 %v965_v33, %v967_v34  ;;  %2171 = vmatprep.subr.bf16.mxu0 %v5052_v19  ;;  %2260 = vmatprep.subr.bf16.mxu1 %v5055_v20  ;;  %v5062_v19 = vld [vmem:[%s6475_s2 + $0x1c0] ss:$16 sps:$4 sm:$0xff]   ;;  %v5065_v20 = vld [vmem:[%s6475_s2 + $0x1c8] ss:$16 sps:$4 sm:$0xff]  }
 0x144   :  { %v982_v44 = vadd.f32 %v975_v27, %v968_v37  ;;  %1684 = vmatprep.mubr.bf16.mxu0 %v4599_v38  ;;  %1773 = vmatprep.mubr.bf16.mxu1 %v4599_v38  ;;  %v5071_v27 = vld [vmem:[%s6475_s2 + $0x1e8] ss:$16 sps:$4 sm:$0xff]   ;;  %v1045_v38 = vrot.slane %v1040_v25, %v5650_v56 }
 0x145   :  { %v983_v52 = vadd.f32 %v979_v31, %v969_v41  ;;  %v457_v53 = vpop.f32.mrb[40].mxu0  ;;  %v620_v54 = vpop.f32.mrb[40].mxu1  ;;  %1685 = vmatmul.mubr.bf16.gmra.mrb[64].mxu0 %v4598_v36  ;;  %1774 = vmatmul.mubr.bf16.gmra.mrb[64].mxu1 %v4598_v36  ;;  %v5079_v31 = vld [vmem:[%s6475_s2 + $0x40c] ss:$16 sps:$4 sm:$0xff]  }
 0x146   :  { %v986_v60 = vmul.f32 0.01, %v982_v44  ;;  %v459_v61 = vpop.f32.mrb[41].mxu0  ;;  %v622_v63 = vpop.f32.mrb[41].mxu1  ;;  %vm984_vm2 = vcmp.ge.f32.partialorder %v982_v44, 0.0  ;;  %2172 = vmatpush1.bf16.msra.mxu0 %v5050_v39  ;;  %2261 = vmatpush1.bf16.msra.mxu1 %v5053_v40 }
 0x147   :  { %v987_v0 = vmul.f32 0.01, %v983_v52  ;;  %v461_v2 = vpop.f32.mrb[42].mxu0  ;;  %v624_v3 = vpop.f32.mrb[42].mxu1  ;;  %vm985_vm3 = vcmp.ge.f32.partialorder %v983_v52, 0.0  ;;  %2173 = vmatprep.subr.bf16.mxu0 %v5058_v42  ;;  %2262 = vmatprep.subr.bf16.mxu1 %v5061_v43  ;;  %v1049_v43 = vrot.slane %v1040_v25, %v5655_v62 }
 0x148   :  { %v999_v7 = vmax.f32 %v457_v53, %v461_v2  ;;  %v1001_v8 = vmax.f32 %v620_v54, %v624_v3  ;;  %v463_v9 = vpop.f32.mrb[43].mxu0  ;;  %v626_v10 = vpop.f32.mrb[43].mxu1  ;;  %v988_v12 = vsel %vm984_vm2, %v982_v44, %v986_v60 }
 0x149   :  { %v1000_v13 = vmax.f32 %v459_v61, %v463_v9  ;;  %v1002_v14 = vmax.f32 %v622_v63, %v626_v10  ;;  %v989_v15 = vsel %vm985_vm3, %v983_v52, %v987_v0  ;;  %v5894_v16 = vpack.c.bf16 %v988_v12, %v953_v32 }
 0x14a   :  { %v1003_v17 = vmax.f32 %v999_v7, %v1001_v8  ;;  %v5896_v18 = vpack.c.bf16 %v989_v15, %v954_v35  ;;  %2174 = vmatpush1.bf16.msra.mxu0 %v5056_v49  ;;  %2263 = vmatpush1.bf16.msra.mxu1 %v5059_v50 }
 0x14b   :  { %v1004_v21 = vmax.f32 %v1000_v13, %v1002_v14  ;;  %2175 = vmatprep.subr.bf16.mxu0 %v5064_v57  ;;  %2264 = vmatprep.subr.bf16.mxu1 %v5067_v59  ;;  %v5074_v13 = vld [vmem:[%s6475_s2 + $0x400] ss:$16 sps:$4 sm:$0xff]   ;;  %v5077_v14 = vld [vmem:[%s6475_s2 + $0x408] ss:$16 sps:$4 sm:$0xff]  }
 0x14c   :  { %v1017_v24 = vadd.f32 %v1010_v5, %v1003_v17 }
 0x14d   :  { %v1018_v28 = vadd.f32 %v1014_v11, %v1004_v21  ;;  %v467_v1 = vpop.f32.mrb[44].mxu0  ;;  %v630_v29 = vpop.f32.mrb[44].mxu1 }
 0x14e   :  { %v1021_v32 = vmul.f32 0.01, %v1017_v24  ;;  %v469_v33 = vpop.f32.mrb[45].mxu0  ;;  %v632_v34 = vpop.f32.mrb[45].mxu1  ;;  %vm1019_vm4 = vcmp.ge.f32.partialorder %v1017_v24, 0.0  ;;  %2176 = vmatpush1.bf16.msra.mxu0 %v5062_v19  ;;  %2265 = vmatpush1.bf16.msra.mxu1 %v5065_v20 }
 0x14f   :  { %v1022_v35 = vmul.f32 0.01, %v1018_v28  ;;  %v471_v36 = vpop.f32.mrb[46].mxu0  ;;  %v634_v37 = vpop.f32.mrb[46].mxu1  ;;  %vm1020_vm5 = vcmp.ge.f32.partialorder %v1018_v28, 0.0  ;;  %2177 = vmatprep.subr.bf16.mxu0 %v5070_v22  ;;  %2266 = vmatprep.subr.bf16.mxu1 %v5073_v23 }
 0x150   :  { %v1034_v39 = vmax.f32 %v467_v1, %v471_v36  ;;  %v1036_v40 = vmax.f32 %v630_v29, %v634_v37  ;;  %v473_v41 = vpop.f32.mrb[47].mxu0  ;;  %v636_v42 = vpop.f32.mrb[47].mxu1  ;;  %v5927_v44 = vsel %vm1019_vm4, %v1017_v24, %v1021_v32  ;;  %v5085_v23 = vld [vmem:[%s6475_s2 + $0x42c] ss:$16 sps:$4 sm:$0xff]   ;;  %v5094_v32 = vld [vmem:[%s6475_s2 + $0x464] ss:$16 sps:$4 sm:$0xff]  }
 0x151   :  { %v1035_v47 = vmax.f32 %v469_v33, %v473_v41  ;;  %v1037_v49 = vmax.f32 %v632_v34, %v636_v42  ;;  %v5929_v50 = vsel %vm1020_vm5, %v1018_v28, %v1022_v35  ;;  %v4600_v52 = vpack.c.bf16 %v5927_v44, %v988_v12  ;;  %v5083_v28 = vld [vmem:[%s6475_s2 + $0x428] ss:$16 sps:$4 sm:$0xff]   ;;  %v5091_v29 = vld [vmem:[%s6475_s2 + $0x44c] ss:$16 sps:$4 sm:$0xff]   ;;  %v5092_v34 = vld [vmem:[%s6475_s2 + $0x460] ss:$16 sps:$4 sm:$0xff]  }
 0x152   :  { %v1038_v53 = vmax.f32 %v1034_v39, %v1036_v40  ;;  %v4601_v54 = vpack.c.bf16 %v5929_v50, %v989_v15  ;;  %2178 = vmatpush1.bf16.msra.mxu0 %v5068_v26  ;;  %2267 = vmatpush1.bf16.msra.mxu1 %v5071_v27  ;;  %v5080_v27 = vld [vmem:[%s6475_s2 + $0x420] ss:$16 sps:$4 sm:$0xff]   ;;  %v5097_v33 = vld [vmem:[%s6475_s2 + $0x46c] ss:$16 sps:$4 sm:$0xff]   ;;  %v5095_v35 = vld [vmem:[%s6475_s2 + $0x468] ss:$16 sps:$4 sm:$0xff]  }
 0x153   :  { %v1039_v57 = vmax.f32 %v1035_v47, %v1037_v49  ;;  %2778 = vmatprep.subr.bf16.mxu0 %v5076_v30  ;;  %2867 = vmatprep.subr.bf16.mxu1 %v5079_v31  ;;  %v5086_v30 = vld [vmem:[%s6475_s2 + $0x440] ss:$16 sps:$4 sm:$0xff]   ;;  %v5089_v31 = vld [vmem:[%s6475_s2 + $0x448] ss:$16 sps:$4 sm:$0xff]   ;;  %v5100_v36 = vld [vmem:[%s6475_s2 + $0x484] ss:$16 sps:$4 sm:$0xff]  }
 0x154   :  { %v1052_v59 = vadd.f32 %v1045_v38, %v1038_v53  ;;  %1694 = vmatprep.mubr.bf16.mxu0 %v4601_v54  ;;  %1783 = vmatprep.mubr.bf16.mxu1 %v4601_v54  ;;  %v5103_v37 = vld [vmem:[%s6475_s2 + $0x48c] ss:$16 sps:$4 sm:$0xff]   ;;  %v5098_v38 = vld [vmem:[%s6475_s2 + $0x480] ss:$16 sps:$4 sm:$0xff]   ;;  %v5101_v39 = vld [vmem:[%s6475_s2 + $0x488] ss:$16 sps:$4 sm:$0xff]  }
 0x155   :  { %v1053_v60 = vadd.f32 %v1049_v43, %v1039_v57  ;;  %1695 = vmatmul.mubr.bf16.gmra.mrb[68].mxu0 %v4600_v52  ;;  %1784 = vmatmul.mubr.bf16.gmra.mrb[68].mxu1 %v4600_v52  ;;  %v477_v9 = vpop.f32.mrb[48].mxu0  ;;  %v640_v10 = vpop.f32.mrb[48].mxu1  ;;  %v5106_v40 = vld [vmem:[%s6475_s2 + $0x4a4] ss:$16 sps:$4 sm:$0xff]   ;;  %v5109_v41 = vld [vmem:[%s6475_s2 + $0x4ac] ss:$16 sps:$4 sm:$0xff]  }
 0x156   :  { %v1056_v61 = vmul.f32 0.01, %v1052_v59  ;;  %vm1054_vm6 = vcmp.ge.f32.partialorder %v1052_v59, 0.0  ;;  %v479_v11 = vpop.f32.mrb[49].mxu0  ;;  %v642_v12 = vpop.f32.mrb[49].mxu1  ;;  %vm4058_vm4 = vcmask 80896  }
 0x157   :  { %v1057_v63 = vmul.f32 0.01, %v1053_v60  ;;  %vm1055_vm7 = vcmp.ge.f32.partialorder %v1053_v60, 0.0  ;;  %v481_v15 = vpop.f32.mrb[50].mxu0  ;;  %v644_v17 = vpop.f32.mrb[50].mxu1 }
 0x158   :  { %v1058_v0 = vsel %vm1054_vm6, %v1052_v59, %v1056_v61  ;;  %v1069_v19 = vmax.f32 %v477_v9, %v481_v15  ;;  %v1071_v20 = vmax.f32 %v640_v10, %v644_v17  ;;  %v483_v21 = vpop.f32.mrb[51].mxu0  ;;  %v646_v22 = vpop.f32.mrb[51].mxu1  ;;  %v5104_v42 = vld [vmem:[%s6475_s2 + $0x4a0] ss:$16 sps:$4 sm:$0xff]   ;;  %v5107_v43 = vld [vmem:[%s6475_s2 + $0x4a8] ss:$16 sps:$4 sm:$0xff]   ;;  %v4615_v9 = vpack.c.bf16 %v5929_v50, %v5929_v50 }
 0x159   :  { %v1059_v2 = vsel %vm1055_vm7, %v1053_v60, %v1057_v63  ;;  %v5934_v3 = vpack.c.bf16 %v1058_v0, %v5927_v44  ;;  %v4602_v8 = vpack.c.bf16 %v1058_v0, %v1058_v0  ;;  %v1070_v24 = vmax.f32 %v479_v11, %v483_v21  ;;  %v5112_v47 = vld [vmem:[%s6475_s2 + $0x4c4] ss:$16 sps:$4 sm:$0xff]   ;;  %v5115_v49 = vld [vmem:[%s6475_s2 + $0x4cc] ss:$16 sps:$4 sm:$0xff]   ;;  %v5110_v52 = vld [vmem:[%s6475_s2 + $0x4c0] ss:$16 sps:$4 sm:$0xff]  }
 0x15a   :  { %v4603_v5 = vpack.c.bf16 %v1059_v2, %v1059_v2  ;;  %v5937_v7 = vpack.c.bf16 %v1059_v2, %v5929_v50  ;;  %v1072_v25 = vmax.f32 %v642_v12, %v646_v22  ;;  %v5955_v26 = vmax.f32 %v1069_v19, %v1071_v20  ;;  %v5113_v53 = vld [vmem:[%s6475_s2 + $0x4c8] ss:$16 sps:$4 sm:$0xff]   ;;  %v5118_v54 = vld [vmem:[%s6475_s2 + $0x4e4] ss:$16 sps:$4 sm:$0xff]   ;;  %v5121_v57 = vld [vmem:[%s6475_s2 + $0x4ec] ss:$16 sps:$4 sm:$0xff]  }
 0x15b   :  { %v5116_v59 = vld [vmem:[%s6475_s2 + $0x4e0] ss:$16 sps:$4 sm:$0xff]   ;;  %v5119_v60 = vld [vmem:[%s6475_s2 + $0x4e8] ss:$16 sps:$4 sm:$0xff]   ;;  %v5124_v61 = vld [vmem:[%s6475_s2 + $0x504] ss:$16 sps:$4 sm:$0xff]   ;;  %v4614_v15 = vpack.c.bf16 %v5927_v44, %v5927_v44 }
 0x15c   :  { %1704 = vmatprep.mubr.bf16.mxu0 %v4603_v5  ;;  %1793 = vmatprep.mubr.bf16.mxu1 %v4603_v5  ;;  %v5963_v1 = vmax.f32 %v1070_v24, %v1072_v25  ;;  %v5127_v63 = vld [vmem:[%s6475_s2 + $0x50c] ss:$16 sps:$4 sm:$0xff]   ;;  %v5122_v0 = vld [vmem:[%s6475_s2 + $0x500] ss:$16 sps:$4 sm:$0xff]   ;;  %v5125_v2 = vld [vmem:[%s6475_s2 + $0x508] ss:$16 sps:$4 sm:$0xff]  }
 0x15d   :  { %1705 = vmatmul.mubr.bf16.gmra.mrb[72].mxu0 %v4602_v8  ;;  %1794 = vmatmul.mubr.bf16.gmra.mrb[72].mxu1 %v4602_v8  ;;  %v5130_v5 = vld [vmem:[%s6475_s2 + $0x524] ss:$16 sps:$4 sm:$0xff]   ;;  %v5133_v8 = vld [vmem:[%s6475_s2 + $0x52c] ss:$16 sps:$4 sm:$0xff]   ;;  %v5128_v10 = vld [vmem:[%s6475_s2 + $0x520] ss:$16 sps:$4 sm:$0xff]  }
 0x15e   :  { %2179 = vmatprep.mubr.bf16.mxu0 %v5672_v51  ;;  %2268 = vmatprep.mubr.bf16.mxu1 %v5672_v51  ;;  %v5082_v51 = vld [vmem:[%s6475_s2 + $0x424] ss:$16 sps:$4 sm:$0xff]   ;;  %v5131_v11 = vld [vmem:[%s6475_s2 + $0x528] ss:$16 sps:$4 sm:$0xff]   ;;  %v5139_v50 = vld [vmem:[%s6475_s2 + $0x54c] ss:$16 sps:$4 sm:$0xff]  }
 0x15f   :  { %v5136_v12 = vld [vmem:[%s6475_s2 + $0x544] ss:$16 sps:$4 sm:$0xff]   ;;  %v5145_v19 = vld [vmem:[%s6475_s2 + $0x56c] ss:$16 sps:$4 sm:$0xff]   ;;  %v5140_v20 = vld [vmem:[%s6475_s2 + $0x560] ss:$16 sps:$4 sm:$0xff]  }
 0x160   :  { %v5142_v17 = vld [vmem:[%s6475_s2 + $0x564] ss:$16 sps:$4 sm:$0xff]   ;;  %v5143_v44 = vld [vmem:[%s6475_s2 + $0x568] ss:$16 sps:$4 sm:$0xff]   ;;  %v5151_v22 = vld [vmem:[%s6475_s2 + $0x58c] ss:$16 sps:$4 sm:$0xff]  }
 0x161   :  { %v5148_v21 = vld [vmem:[%s6475_s2 + $0x584] ss:$16 sps:$4 sm:$0xff]   ;;  %v5157_v24 = vld [vmem:[%s6475_s2 + $0x5ac] ss:$16 sps:$4 sm:$0xff]   ;;  %v5152_v25 = vld [vmem:[%s6475_s2 + $0x5a0] ss:$16 sps:$4 sm:$0xff]  }
 0x165   :  { %2180 = vmatmul.mubr.bf16.vlgmr.msra.gmra.mrb[52].mxu0 %v5670_v46  ;;  %2269 = vmatmul.mubr.bf16.vlgmr.msra.gmra.mrb[52].mxu1 %v5670_v46  ;;  %v5088_v46 = vld [vmem:[%s6475_s2 + $0x444] ss:$16 sps:$4 sm:$0xff]  }
 0x166   :  { %2779 = vmatpush1.bf16.msra.mxu0 %v5074_v13  ;;  %2868 = vmatpush1.bf16.msra.mxu1 %v5077_v14  ;;  %v5134_v13 = vld [vmem:[%s6475_s2 + $0x540] ss:$16 sps:$4 sm:$0xff]   ;;  %v5137_v14 = vld [vmem:[%s6475_s2 + $0x548] ss:$16 sps:$4 sm:$0xff]  }
 0x167   :  { %2189 = vmatprep.mubr.bf16.mxu0 %v5710_v48  ;;  %2278 = vmatprep.mubr.bf16.mxu1 %v5710_v48 }
 0x168   :  { %2780 = vmatprep.subr.bf16.mxu0 %v5082_v51  ;;  %2869 = vmatprep.subr.bf16.mxu1 %v5085_v23  ;;  %v5146_v51 = vld [vmem:[%s6475_s2 + $0x580] ss:$16 sps:$4 sm:$0xff]   ;;  %v5154_v23 = vld [vmem:[%s6475_s2 + $0x5a4] ss:$16 sps:$4 sm:$0xff]  }
 0x16a   :  { %2781 = vmatpush1.bf16.msra.mxu0 %v5080_v27  ;;  %2870 = vmatpush1.bf16.msra.mxu1 %v5083_v28  ;;  %v5155_v27 = vld [vmem:[%s6475_s2 + $0x5a8] ss:$16 sps:$4 sm:$0xff]   ;;  %v5160_v28 = vld [vmem:[%s6475_s2 + $0x5c4] ss:$16 sps:$4 sm:$0xff]  }
 0x16b   :  { %2782 = vmatprep.subr.bf16.mxu0 %v5088_v46  ;;  %2871 = vmatprep.subr.bf16.mxu1 %v5091_v29  ;;  %v5163_v46 = vld [vmem:[%s6475_s2 + $0x5cc] ss:$16 sps:$4 sm:$0xff]   ;;  %v5158_v29 = vld [vmem:[%s6475_s2 + $0x5c0] ss:$16 sps:$4 sm:$0xff]  }
 0x16d   :  { %2190 = vmatmul.mubr.bf16.gmra.mrb[56].mxu0 %v5708_v45  ;;  %2279 = vmatmul.mubr.bf16.gmra.mrb[56].mxu1 %v5708_v45 }
 0x16e   :  { %2783 = vmatpush1.bf16.msra.mxu0 %v5086_v30  ;;  %2872 = vmatpush1.bf16.msra.mxu1 %v5089_v31  ;;  %v5161_v30 = vld [vmem:[%s6475_s2 + $0x5c8] ss:$16 sps:$4 sm:$0xff]   ;;  %v5166_v31 = vld [vmem:[%s6475_s2 + $0x5e4] ss:$16 sps:$4 sm:$0xff]  }
 0x16f   :  { %2199 = vmatprep.mubr.bf16.mxu0 %v5772_v58  ;;  %2288 = vmatprep.mubr.bf16.mxu1 %v5772_v58 }
 0x170   :  { %2784 = vmatprep.subr.bf16.mxu0 %v5094_v32  ;;  %2873 = vmatprep.subr.bf16.mxu1 %v5097_v33  ;;  %v5169_v32 = vld [vmem:[%s6475_s2 + $0x5ec] ss:$16 sps:$4 sm:$0xff]   ;;  %v5164_v33 = vld [vmem:[%s6475_s2 + $0x5e0] ss:$16 sps:$4 sm:$0xff]  }
 0x172   :  { %2785 = vmatpush1.bf16.msra.mxu0 %v5092_v34  ;;  %2874 = vmatpush1.bf16.msra.mxu1 %v5095_v35  ;;  %v5167_v34 = vld [vmem:[%s6475_s2 + $0x5e8] ss:$16 sps:$4 sm:$0xff]   ;;  %v1075_v35 = vld [vmem:[%s6476_s4] sm:$0x3] }
 0x173   :  { %2786 = vmatprep.subr.bf16.mxu0 %v5100_v36  ;;  %2875 = vmatprep.subr.bf16.mxu1 %v5103_v37  ;;  %v1080_v36 = vrot.slane %v1075_v35, %v5650_v56  ;;  %v1084_v37 = vrot.slane %v1075_v35, %v5655_v62 }
 0x175   :  { %2200 = vmatmul.mubr.bf16.gmra.mrb[60].mxu0 %v5770_v55  ;;  %2289 = vmatmul.mubr.bf16.gmra.mrb[60].mxu1 %v5770_v55 }
 0x176   :  { %2787 = vmatpush1.bf16.msra.mxu0 %v5098_v38  ;;  %2876 = vmatpush1.bf16.msra.mxu1 %v5101_v39 }
 0x177   :  { %2209 = vmatprep.mubr.bf16.mxu0 %v5834_v6  ;;  %2298 = vmatprep.mubr.bf16.mxu1 %v5834_v6 }
 0x178   :  { %2788 = vmatprep.subr.bf16.mxu0 %v5106_v40  ;;  %2877 = vmatprep.subr.bf16.mxu1 %v5109_v41  ;;  %v5170_v40 = vld [vmem:[%s6477_s3 + $0x40] sm:$0xff]  }
 0x17a   :  { %2789 = vmatpush1.bf16.msra.mxu0 %v5104_v42  ;;  %2878 = vmatpush1.bf16.msra.mxu1 %v5107_v43  ;;  %v5176_v42 = vld [vmem:[%s6477_s3 + $0x58] sm:$0xff]  }
 0x17b   :  { %2790 = vmatprep.subr.bf16.mxu0 %v5112_v47  ;;  %2879 = vmatprep.subr.bf16.mxu1 %v5115_v49  ;;  %v5177_v43 = vld [vmem:[%s6477_s3 + $0x18] sm:$0xff]   ;;  %v5181_v47 = vld [vmem:[%s6477_s3 + $0x80] sm:$0xff]   ;;  %v5182_v49 = vld [vmem:[%s6477_s3 + $0xc8] sm:$0xff]  }
 0x17d   :  { %2210 = vmatmul.mubr.bf16.gmra.mrb[64].mxu0 %v5832_v4  ;;  %2299 = vmatmul.mubr.bf16.gmra.mrb[64].mxu1 %v5832_v4 }
 0x17e   :  { %2791 = vmatpush1.bf16.msra.mxu0 %v5110_v52  ;;  %2880 = vmatpush1.bf16.msra.mxu1 %v5113_v53  ;;  %v5178_v52 = vld [vmem:[%s6477_s3 + $0x60] sm:$0xff]   ;;  %v5183_v53 = vld [vmem:[%s6477_s3 + $0x88] sm:$0xff]  }
 0x17f   :  { %2219 = vmatprep.mubr.bf16.mxu0 %v5896_v18  ;;  %2308 = vmatprep.mubr.bf16.mxu1 %v5896_v18 }
 0x180   :  { %2792 = vmatprep.subr.bf16.mxu0 %v5118_v54  ;;  %2881 = vmatprep.subr.bf16.mxu1 %v5121_v57  ;;  %v5186_v54 = vld [vmem:[%s6477_s3 + $0xd0] sm:$0xff]   ;;  %v5180_v57 = vld [vmem:[%s6477_s3 + $0x20] sm:$0xff]  }
 0x182   :  { %2793 = vmatpush1.bf16.msra.mxu0 %v5116_v59  ;;  %2882 = vmatpush1.bf16.msra.mxu1 %v5119_v60  ;;  %v5184_v59 = vld [vmem:[%s6477_s3 + $0x68] sm:$0xff]  }
 0x183   :  { %2794 = vmatprep.subr.bf16.mxu0 %v5124_v61  ;;  %2883 = vmatprep.subr.bf16.mxu1 %v5127_v63  ;;  %v5185_v60 = vld [vmem:[%s6477_s3 + $0x28] sm:$0xff]   ;;  %v5187_v61 = vld [vmem:[%s6477_s3 + $0x90] sm:$0xff]   ;;  %v5189_v63 = vld [vmem:[%s6477_s3 + $0xd8] sm:$0xff]  }
 0x185   :  { %2220 = vmatmul.mubr.bf16.gmra.mrb[68].mxu0 %v5894_v16  ;;  %2309 = vmatmul.mubr.bf16.gmra.mrb[68].mxu1 %v5894_v16 }
 0x186   :  { %2795 = vmatpush1.bf16.msra.mxu0 %v5122_v0  ;;  %2884 = vmatpush1.bf16.msra.mxu1 %v5125_v2  ;;  %v5191_v0 = vld [vmem:[%s6477_s3 + $0x98] sm:$0xff]   ;;  %v5188_v2 = vld [vmem:[%s6477_s3 + $0x70] sm:$0xff]  }
 0x187   :  { %2229 = vmatprep.mubr.bf16.mxu0 %v4615_v9  ;;  %2318 = vmatprep.mubr.bf16.mxu1 %v4615_v9  ;;  %v5193_v9 = vld [vmem:[%s6477_s3 + $0xa0] sm:$0xff]  }
 0x188   :  { %2796 = vmatprep.subr.bf16.mxu0 %v5130_v5  ;;  %2885 = vmatprep.subr.bf16.mxu1 %v5133_v8  ;;  %v5192_v5 = vld [vmem:[%s6477_s3 + $0xe0] sm:$0xff]   ;;  %v5190_v8 = vld [vmem:[%s6477_s3 + $0x30] sm:$0xff]  }
 0x18a   :  { %2797 = vmatpush1.bf16.msra.mxu0 %v5128_v10  ;;  %2886 = vmatpush1.bf16.msra.mxu1 %v5131_v11  ;;  %v5194_v10 = vld [vmem:[%s6477_s3 + $0x78] sm:$0xff]   ;;  %v5196_v11 = vld [vmem:[%s6477_s3 + $0xe8] sm:$0xff]  }
 0x18b   :  { %2798 = vmatprep.subr.bf16.mxu0 %v5136_v12  ;;  %2887 = vmatprep.subr.bf16.mxu1 %v5139_v50  ;;  %v5195_v12 = vld [vmem:[%s6477_s3 + $0x38] sm:$0xff]   ;;  %v5197_v50 = vld [vmem:[%s6477_s3 + $0xa8] sm:$0xff]  }
 0x18d   :  { %2230 = vmatmul.mubr.bf16.gmra.mrb[76].mxu0 %v4614_v15  ;;  %2319 = vmatmul.mubr.bf16.gmra.mrb[76].mxu1 %v4614_v15  ;;  %v5200_v15 = vld [vmem:[%s6477_s3 + $0xb0] sm:$0xff]  }
 0x18e   :  { %2799 = vmatpush1.bf16.msra.mxu0 %v5134_v13  ;;  %2888 = vmatpush1.bf16.msra.mxu1 %v5137_v14  ;;  %v5198_v13 = vld [vmem:[%s6477_s3 + $0xf0] sm:$0xff]   ;;  %v5199_v14 = vld [vmem:[%s6477_s3 + $0x140] sm:$0xff]  }
 0x18f   :  { %2810 = vmatprep.mubr.bf16.mxu0 %v5710_v48  ;;  %2899 = vmatprep.mubr.bf16.mxu1 %v5710_v48  ;;  %v5149_v48 = vld [vmem:[%s6475_s2 + $0x588] ss:$16 sps:$4 sm:$0xff]  }
 0x190   :  { %2800 = vmatprep.subr.bf16.mxu0 %v5142_v17  ;;  %2889 = vmatprep.subr.bf16.mxu1 %v5145_v19  ;;  %v5202_v17 = vld [vmem:[%s6477_s3 + $0xf8] sm:$0xff]  }
 0x191   :  { %v5204_v19 = vld [vmem:[%s6477_s3 + $0xb8] sm:$0xff]  }
 0x192   :  { %2801 = vmatpush1.bf16.msra.mxu0 %v5140_v20  ;;  %2890 = vmatpush1.bf16.msra.mxu1 %v5143_v44  ;;  %v5207_v20 = vld [vmem:[%s6477_s3 + $0x1c0] sm:$0xff]  }
 0x193   :  { %2802 = vmatprep.subr.bf16.mxu0 %v5148_v21  ;;  %2891 = vmatprep.subr.bf16.mxu1 %v5151_v22 }
 0x196   :  { %2803 = vmatpush1.bf16.msra.mxu0 %v5146_v51  ;;  %2892 = vmatpush1.bf16.msra.mxu1 %v5149_v48 }
 0x197   :  { %2804 = vmatprep.subr.bf16.mxu0 %v5154_v23  ;;  %2893 = vmatprep.subr.bf16.mxu1 %v5157_v24 }
 0x19a   :  { %2805 = vmatpush1.bf16.msra.mxu0 %v5152_v25  ;;  %2894 = vmatpush1.bf16.msra.mxu1 %v5155_v27 }
 0x19b   :  { %2806 = vmatprep.subr.bf16.mxu0 %v5160_v28  ;;  %2895 = vmatprep.subr.bf16.mxu1 %v5163_v46 }
 0x19e   :  { %2807 = vmatpush1.bf16.msra.mxu0 %v5158_v29  ;;  %2896 = vmatpush1.bf16.msra.mxu1 %v5161_v30 }
 0x19f   :  { %2808 = vmatprep.subr.bf16.mxu0 %v5166_v31  ;;  %2897 = vmatprep.subr.bf16.mxu1 %v5169_v32 }
 0x1a2   :  { %2809 = vmatpush1.bf16.msra.mxu0 %v5164_v33  ;;  %2898 = vmatpush1.bf16.msra.mxu1 %v5167_v34 }
 0x1a3   :  { %4630 = vmatprep.subr.bf16.mxu0 %v5170_v40 }
 0x1a5   :  { %2811 = vmatmul.mubr.bf16.vlgmr.msra.gmra.mrb[52].mxu0 %v5708_v45  ;;  %2900 = vmatmul.mubr.bf16.vlgmr.msra.gmra.mrb[52].mxu1 %v5708_v45  ;;  %v1087_v45 = vadd.f32 %v1080_v36, %v5955_v26  ;;  %v5173_v26 = vld [vmem:[%s6477_s3 + $0x8] sm:$0xff]   ;;  %v3002_v36 = vld [vmem:[%s6478_s5] sm:$0x3] }
 0x1a6   :  { %2820 = vmatprep.mubr.bf16.mxu0 %v5772_v58  ;;  %2909 = vmatprep.mubr.bf16.mxu1 %v5772_v58  ;;  %v1088_v58 = vadd.f32 %v1084_v37, %v5963_v1 }
 0x1a7   :  { %v1091_v39 = vmul.f32 0.01, %v1087_v45  ;;  %vm1089_vm9 = vcmp.ge.f32.partialorder %v1087_v45, 0.0 }
 0x1a8   :  { %v1092_v38 = vmul.f32 0.01, %v1088_v58  ;;  %vm1090_vm8 = vcmp.ge.f32.partialorder %v1088_v58, 0.0 }
 0x1a9   :  { %v1093_v1 = vsel %vm1089_vm9, %v1087_v45, %v1091_v39 }
 0x1aa   :  { %v4618_v41 = vpack.c.bf16 %v1093_v1, %v1093_v1  ;;  %v3011_v1 = vrot.slane %v3002_v36, %v5655_v62 }
 0x1ad   :  { %2821 = vmatmul.mubr.bf16.gmra.mrb[56].mxu0 %v5770_v55  ;;  %2910 = vmatmul.mubr.bf16.gmra.mrb[56].mxu1 %v5770_v55  ;;  %v5171_v55 = vld [vmem:[%s6477_s3] sm:$0xff]  }
 0x1ae   :  { %2830 = vmatprep.mubr.bf16.mxu0 %v5834_v6  ;;  %2919 = vmatprep.mubr.bf16.mxu1 %v5834_v6  ;;  %v5172_v6 = vld [vmem:[%s6477_s3 + $0x48] sm:$0xff]  }
 0x1af   :  { %4631 = vmatpush3.bf16.msra.mxu0 %v5171_v55  ;;  %v3007_v55 = vrot.slane %v3002_v36, %v5650_v56 }
 0x1b0   :  { %4632 = vmatprep.subr.bf16.mxu0 %v5172_v6 }
 0x1b3   :  { %4633 = vmatpush3.bf16.msra.mxu0 %v5173_v26 }
 0x1b5   :  { %2831 = vmatmul.mubr.bf16.gmra.mrb[60].mxu0 %v5832_v4  ;;  %2920 = vmatmul.mubr.bf16.gmra.mrb[60].mxu1 %v5832_v4  ;;  %v1094_v4 = vsel %vm1090_vm8, %v1088_v58, %v1092_v38 }
 0x1b6   :  { %2840 = vmatprep.mubr.bf16.mxu0 %v5896_v18  ;;  %2929 = vmatprep.mubr.bf16.mxu1 %v5896_v18  ;;  %v4619_v18 = vpack.c.bf16 %v1094_v4, %v1094_v4 }
 0x1bd   :  { %2841 = vmatmul.mubr.bf16.gmra.mrb[64].mxu0 %v5894_v16  ;;  %2930 = vmatmul.mubr.bf16.gmra.mrb[64].mxu1 %v5894_v16  ;;  %v5174_v16 = vld [vmem:[%s6477_s3 + $0x50] sm:$0xff]  }
 0x1be   :  { %2850 = vmatprep.mubr.bf16.mxu0 %v5937_v7  ;;  %2939 = vmatprep.mubr.bf16.mxu1 %v5937_v7  ;;  %v5175_v7 = vld [vmem:[%s6477_s3 + $0x10] sm:$0xff]  }
 0x1bf   :  { %4634 = vmatprep.subr.bf16.mxu0 %v5174_v16 }
 0x1c0   :  { %4635 = vmatpush3.bf16.msra.mxu0 %v5175_v7 }
 0x1c1   :  { %4636 = vmatprep.subr.bf16.mxu0 %v5176_v42 }
 0x1c4   :  { %4637 = vmatpush3.bf16.msra.mxu0 %v5177_v43 }
 0x1c5   :  { %2851 = vmatmul.mubr.bf16.gmra.mrb[68].mxu0 %v5934_v3  ;;  %2940 = vmatmul.mubr.bf16.gmra.mrb[68].mxu1 %v5934_v3  ;;  %v5179_v3 = vld [vmem:[%s6477_s3 + $0xc0] sm:$0xff]  }
 0x1c6   :  { %2860 = vmatprep.mubr.bf16.mxu0 %v4619_v18  ;;  %2949 = vmatprep.mubr.bf16.mxu1 %v4619_v18 }
 0x1c7   :  { %4652 = vmatprep.subr.bf16.mxu1 %v5179_v3  ;;  %4638 = vmatprep.subr.bf16.mxu0 %v5178_v52 }
 0x1c8   :  { %4653 = vmatpush3.bf16.msra.mxu1 %v5181_v47  ;;  %4639 = vmatpush3.bf16.msra.mxu0 %v5180_v57  ;;  %v3037_v47 = vld [vmem:[%s6478_s5] sm:$0x3] }
 0x1c9   :  { %4654 = vmatprep.subr.bf16.mxu1 %v5182_v49  ;;  %4640 = vmatprep.subr.bf16.mxu0 %v5184_v59 }
 0x1cc   :  { %4655 = vmatpush3.bf16.msra.mxu1 %v5183_v53  ;;  %4641 = vmatpush3.bf16.msra.mxu0 %v5185_v60 }
 0x1cd   :  { %2861 = vmatmul.mubr.bf16.gmra.mrb[80].mxu0 %v4618_v41  ;;  %2950 = vmatmul.mubr.bf16.gmra.mrb[80].mxu1 %v4618_v41 }
 0x1ce   :  { %4656 = vmatprep.subr.bf16.mxu1 %v5186_v54  ;;  %4642 = vmatprep.subr.bf16.mxu0 %v5188_v2 }
 0x1d0   :  { %4657 = vmatpush3.bf16.msra.mxu1 %v5187_v61  ;;  %4643 = vmatpush3.bf16.msra.mxu0 %v5190_v8 }
 0x1d1   :  { %4658 = vmatprep.subr.bf16.mxu1 %v5189_v63  ;;  %4644 = vmatprep.subr.bf16.mxu0 %v5194_v10  ;;  %v3046_v10 = vrot.slane %v3037_v47, %v5655_v62 }
 0x1d4   :  { %4659 = vmatpush3.bf16.msra.mxu1 %v5191_v0  ;;  %4645 = vmatpush3.bf16.msra.mxu0 %v5195_v12  ;;  %v3042_v0 = vrot.slane %v3037_v47, %v5650_v56 }
 0x1d5   :  { %4660 = vmatprep.subr.bf16.mxu1 %v5192_v5  ;;  %4674 = vmatprep.subr.bf16.mxu0 %v5199_v14 }
 0x1d8   :  { %4661 = vmatpush3.bf16.msra.mxu1 %v5193_v9 }
 0x1d9   :  { %4662 = vmatprep.subr.bf16.mxu1 %v5196_v11 }
 0x1dc   :  { %4663 = vmatpush3.bf16.msra.mxu1 %v5197_v50 }
 0x1dd   :  { %4664 = vmatprep.subr.bf16.mxu1 %v5198_v13  ;;  %v5201_v13 = vld [vmem:[%s6477_s3 + $0x100] sm:$0xff]  }
 0x1e0   :  { %4665 = vmatpush3.bf16.msra.mxu1 %v5200_v15 }
 0x1e1   :  { %4666 = vmatprep.subr.bf16.mxu1 %v5202_v17  ;;  %v5203_v17 = vld [vmem:[%s6477_s3 + $0x148] sm:$0xff]  }
 0x1e4   :  { %4667 = vmatpush3.bf16.msra.mxu1 %v5204_v19 }
 0x1e5   :  { %4696 = vmatprep.subr.bf16.mxu1 %v5207_v20 }
 0x230   :  { %v1706_v44 = vpop.f32.mrb[72].mxu0  ;;  %v1795_v21 = vpop.f32.mrb[72].mxu1 }
 0x231   :  { %v1707_v22 = vpop.f32.mrb[73].mxu0  ;;  %v1796_v51 = vpop.f32.mrb[73].mxu1 }
 0x232   :  { %v1708_v48 = vpop.f32.mrb[74].mxu0  ;;  %v1797_v23 = vpop.f32.mrb[74].mxu1  ;;  %v6301_v22 = vld [vmem:[%s6478_s5] sm:$0x3] }
 0x233   :  { %v1709_v24 = vpop.f32.mrb[75].mxu0  ;;  %v1798_v25 = vpop.f32.mrb[75].mxu1  ;;  %v3081_v36 = vrot.slane %v6301_v22, %v5655_v62 }
 0x234   :  { %v5205_v24 = vld [vmem:[%s6477_s3 + $0x108] sm:$0xff]  }
 0x260   :  { %v2231_v27 = vpop.f32.mrb[76].mxu0  ;;  %v2320_v28 = vpop.f32.mrb[76].mxu1 }
 0x261   :  { %v2232_v46 = vpop.f32.mrb[77].mxu0  ;;  %v2321_v29 = vpop.f32.mrb[77].mxu1 }
 0x262   :  { %v2233_v30 = vpop.f32.mrb[78].mxu0  ;;  %v2322_v31 = vpop.f32.mrb[78].mxu1  ;;  %v5206_v46 = vld [vmem:[%s6477_s3 + $0x150] sm:$0xff]  }
 0x263   :  { %v2234_v32 = vpop.f32.mrb[79].mxu0  ;;  %v2323_v33 = vpop.f32.mrb[79].mxu1 }
 0x278   :  { %v2812_v34 = vpop.f32.mrb[52].mxu0  ;;  %v2901_v35 = vpop.f32.mrb[52].mxu1 }
 0x279   :  { %v2814_v37 = vpop.f32.mrb[53].mxu0  ;;  %v2903_v45 = vpop.f32.mrb[53].mxu1 }
 0x27a   :  { %v2816_v58 = vpop.f32.mrb[54].mxu0  ;;  %v2905_v38 = vpop.f32.mrb[54].mxu1 }
 0x27b   :  { %v2996_v39 = vmax.f32 %v2812_v34, %v2816_v58  ;;  %v2998_v40 = vmax.f32 %v2901_v35, %v2905_v38  ;;  %v2818_v6 = vpop.f32.mrb[55].mxu0  ;;  %v2907_v26 = vpop.f32.mrb[55].mxu1  ;;  %v5208_v38 = vld [vmem:[%s6477_s3 + $0x110] sm:$0xff]  }
 0x27c   :  { %v2997_v4 = vmax.f32 %v2814_v37, %v2818_v6  ;;  %v2999_v18 = vmax.f32 %v2903_v45, %v2907_v26  ;;  %v5210_v6 = vld [vmem:[%s6477_s3 + $0x158] sm:$0xff]   ;;  %v5211_v26 = vld [vmem:[%s6477_s3 + $0x1c8] sm:$0xff]  }
 0x27d   :  { %v3000_v41 = vmax.f32 %v2996_v39, %v2998_v40  ;;  %v5209_v39 = vld [vmem:[%s6477_s3 + $0x180] sm:$0xff]  }
 0x27e   :  { %v3001_v16 = vmax.f32 %v2997_v4, %v2999_v18 }
 0x27f   :  { %v3014_v7 = vadd.f32 %v3007_v55, %v3000_v41  ;;  %v5212_v41 = vld [vmem:[%s6477_s3 + $0x118] sm:$0xff]  }
 0x280   :  { %v3015_v42 = vadd.f32 %v3011_v1, %v3001_v16  ;;  %v2822_v3 = vpop.f32.mrb[56].mxu0  ;;  %v2911_v43 = vpop.f32.mrb[56].mxu1 }
 0x281   :  { %vm3016_vm10 = vcmp.ge.f32.partialorder %v3014_v7, 0.0  ;;  %v3018_v49 = vmul.f32 0.01, %v3014_v7  ;;  %v2824_v52 = vpop.f32.mrb[57].mxu0  ;;  %v2913_v53 = vpop.f32.mrb[57].mxu1 }
 0x282   :  { %v2826_v54 = vpop.f32.mrb[58].mxu0  ;;  %v2915_v57 = vpop.f32.mrb[58].mxu1  ;;  %vm3017_vm11 = vcmp.ge.f32.partialorder %v3015_v42, 0.0  ;;  %v3019_v59 = vmul.f32 0.01, %v3015_v42 }
 0x283   :  { %v3020_v60 = vsel %vm3016_vm10, %v3014_v7, %v3018_v49  ;;  %v3031_v61 = vmax.f32 %v2822_v3, %v2826_v54  ;;  %v3033_v63 = vmax.f32 %v2911_v43, %v2915_v57  ;;  %v2828_v2 = vpop.f32.mrb[59].mxu0  ;;  %v2917_v5 = vpop.f32.mrb[59].mxu1  ;;  %v5213_v3 = vld [vmem:[%s6477_s3 + $0x188] sm:$0xff]   ;;  %v5214_v43 = vld [vmem:[%s6477_s3 + $0x160] sm:$0xff]  }
 0x284   :  { %v3032_v8 = vmax.f32 %v2824_v52, %v2828_v2  ;;  %v3034_v9 = vmax.f32 %v2913_v53, %v2917_v5  ;;  %v3021_v11 = vsel %vm3017_vm11, %v3015_v42, %v3019_v59  ;;  %v4620_v14 = vpack.c.bf16 %v3020_v60, %v3020_v60  ;;  %v6331_v42 = vld [vmem:[%s6478_s5] sm:$0x3]  ;;  %v5215_v53 = vld [vmem:[%s6477_s3 + $0x1d0] sm:$0xff]  }
 0x285   :  { %v3035_v12 = vmax.f32 %v3031_v61, %v3033_v63  ;;  %v4621_v50 = vpack.c.bf16 %v3021_v11, %v3021_v11 }
 0x286   :  { %v3036_v15 = vmax.f32 %v3032_v8, %v3034_v9  ;;  %v5216_v9 = vld [vmem:[%s6477_s3 + $0x120] sm:$0xff]  }
 0x287   :  { %v3049_v19 = vadd.f32 %v3042_v0, %v3035_v12  ;;  %3890 = vmatprep.mubr.bf16.mxu0 %v4621_v50  ;;  %v3116_v0 = vrot.slane %v6331_v42, %v5655_v62  ;;  %v5218_v12 = vld [vmem:[%s6477_s3 + $0x168] sm:$0xff]   ;;  %v5219_v50 = vld [vmem:[%s6477_s3 + $0x1d8] sm:$0xff]  }
 0x288   :  { %v3050_v20 = vadd.f32 %v3046_v10, %v3036_v15  ;;  %v2832_v44 = vpop.f32.mrb[60].mxu0  ;;  %v2921_v21 = vpop.f32.mrb[60].mxu1  ;;  %3891 = vmatmul.mubr.bf16.vlgmr.msra.gmra.mrb[84].mxu0 %v4620_v14  ;;  %v5217_v10 = vld [vmem:[%s6477_s3 + $0x190] sm:$0xff]  }
 0x289   :  { %vm3051_vm12 = vcmp.ge.f32.partialorder %v3049_v19, 0.0  ;;  %v3053_v51 = vmul.f32 0.01, %v3049_v19  ;;  %4675 = vmatpush3.bf16.msra.mxu0 %v5201_v13  ;;  %v2834_v48 = vpop.f32.mrb[61].mxu0  ;;  %v2923_v23 = vpop.f32.mrb[61].mxu1  ;;  %v3077_v13 = vrot.slane %v6301_v22, %v5650_v56  ;;  %v5221_v22 = vld [vmem:[%s6477_s3 + $0x198] sm:$0xff]  }
 0x28a   :  { %v2836_v25 = vpop.f32.mrb[62].mxu0  ;;  %v2925_v27 = vpop.f32.mrb[62].mxu1  ;;  %4676 = vmatprep.subr.bf16.mxu0 %v5203_v17  ;;  %vm3052_vm13 = vcmp.ge.f32.partialorder %v3050_v20, 0.0  ;;  %v3054_v28 = vmul.f32 0.01, %v3050_v20 }
 0x28b   :  { %v3055_v29 = vsel %vm3051_vm12, %v3049_v19, %v3053_v51  ;;  %v3066_v30 = vmax.f32 %v2832_v44, %v2836_v25  ;;  %v3068_v31 = vmax.f32 %v2921_v21, %v2925_v27  ;;  %v2838_v32 = vpop.f32.mrb[63].mxu0  ;;  %v2927_v33 = vpop.f32.mrb[63].mxu1  ;;  %v5220_v19 = vld [vmem:[%s6477_s3 + $0x128] sm:$0xff]   ;;  %v6366_v21 = vld [vmem:[%s6478_s5] sm:$0x3]  ;;  %v5222_v51 = vld [vmem:[%s6477_s3 + $0x170] sm:$0xff]  }
 0x28c   :  { %v3067_v34 = vmax.f32 %v2834_v48, %v2838_v32  ;;  %v3069_v35 = vmax.f32 %v2923_v23, %v2927_v33  ;;  %v3056_v37 = vsel %vm3052_vm13, %v3050_v20, %v3054_v28  ;;  %v4622_v40 = vpack.c.bf16 %v3055_v29, %v3055_v29 }
 0x28d   :  { %v6311_v45 = vmax.f32 %v3066_v30, %v3068_v31  ;;  %4677 = vmatpush3.bf16.msra.mxu0 %v5205_v24  ;;  %v4623_v58 = vpack.c.bf16 %v3056_v37, %v3056_v37  ;;  %v5223_v24 = vld [vmem:[%s6477_s3 + $0x1e0] sm:$0xff]   ;;  %v3151_v33 = vrot.slane %v6366_v21, %v5655_v62  ;;  %v5224_v37 = vld [vmem:[%s6477_s3 + $0x130] sm:$0xff]   ;;  %v5226_v62 = vld [vmem:[%s6477_s3 + $0x178] sm:$0xff]  }
 0x28e   :  { %v3071_v55 = vmax.f32 %v3067_v34, %v3069_v35  ;;  %4678 = vmatprep.subr.bf16.mxu0 %v5206_v46 }
 0x28f   :  { %3930 = vmatprep.mubr.bf16.mxu1 %v4623_v58  ;;  %v3084_v27 = vadd.f32 %v3077_v13, %v6311_v45  ;;  %v5225_v45 = vld [vmem:[%s6477_s3 + $0x1a0] sm:$0xff]   ;;  %v5241_v13 = vld [vmem:[%s6477_s3 + $0x218] sm:$0xff]  }
 0x290   :  { %v3085_v4 = vadd.f32 %v3081_v36, %v3071_v55  ;;  %v2842_v18 = vpop.f32.mrb[64].mxu0  ;;  %v2931_v1 = vpop.f32.mrb[64].mxu1  ;;  %3931 = vmatmul.mubr.bf16.vlgmr.msra.gmra.mrb[84].mxu1 %v4622_v40  ;;  %v3112_v40 = vrot.slane %v6331_v42, %v5650_v56 }
 0x291   :  { %4679 = vmatpush3.bf16.msra.mxu0 %v5208_v38  ;;  %4697 = vmatpush3.bf16.msra.mxu1 %v5209_v39  ;;  %v2844_v16 = vpop.f32.mrb[65].mxu0  ;;  %v2933_v7 = vpop.f32.mrb[65].mxu1  ;;  %v5227_v38 = vld [vmem:[%s6477_s3 + $0x1e8] sm:$0xff]   ;;  %v3088_v39 = vmul.f32 0.01, %v3084_v27  ;;  %vm3086_vm0 = vcmp.ge.f32.partialorder %v3084_v27, 0.0 }
 0x292   :  { %v2846_v47 = vpop.f32.mrb[66].mxu0  ;;  %v2935_v49 = vpop.f32.mrb[66].mxu1  ;;  %4680 = vmatprep.subr.bf16.mxu0 %v5210_v6  ;;  %4698 = vmatprep.subr.bf16.mxu1 %v5211_v26  ;;  %vm3087_vm14 = vcmp.ge.f32.partialorder %v3085_v4, 0.0  ;;  %v3089_v52 = vmul.f32 0.01, %v3085_v4 }
 0x293   :  { %v3101_v54 = vmax.f32 %v2842_v18, %v2846_v47  ;;  %v3103_v57 = vmax.f32 %v2931_v1, %v2935_v49  ;;  %v2848_v59 = vpop.f32.mrb[67].mxu0  ;;  %v2937_v60 = vpop.f32.mrb[67].mxu1  ;;  %v5229_v18 = vld [vmem:[%s6477_s3 + $0x1a8] sm:$0xff]   ;;  %v5230_v1 = vld [vmem:[%s6477_s3 + $0x1f0] sm:$0xff]   ;;  %v3090_v49 = vsel %vm3086_vm0, %v3084_v27, %v3088_v39 }
 0x294   :  { %v3102_v61 = vmax.f32 %v2844_v16, %v2848_v59  ;;  %v3104_v63 = vmax.f32 %v2933_v7, %v2937_v60  ;;  %v3091_v2 = vsel %vm3087_vm14, %v3085_v4, %v3089_v52  ;;  %v5228_v4 = vld [vmem:[%s6477_s3 + $0x138] sm:$0xff]   ;;  %v5231_v7 = vld [vmem:[%s6477_s3 + $0x240] sm:$0xff]   ;;  %v4624_v60 = vpack.c.bf16 %v3090_v49, %v3090_v49 }
 0x295   :  { %v6344_v5 = vmax.f32 %v3101_v54, %v3103_v57  ;;  %4681 = vmatpush3.bf16.msra.mxu0 %v5212_v41  ;;  %4699 = vmatpush3.bf16.msra.mxu1 %v5213_v3  ;;  %v4625_v8 = vpack.c.bf16 %v3091_v2, %v3091_v2  ;;  %v5232_v57 = vld [vmem:[%s6477_s3 + $0x1b0] sm:$0xff]   ;;  %v5233_v59 = vld [vmem:[%s6477_s3 + $0x200] sm:$0xff]   ;;  %v5235_v2 = vld [vmem:[%s6477_s3 + $0x248] sm:$0xff]  }
 0x296   :  { %v3106_v11 = vmax.f32 %v3102_v61, %v3104_v63  ;;  %4682 = vmatprep.subr.bf16.mxu0 %v5214_v43  ;;  %4700 = vmatprep.subr.bf16.mxu1 %v5215_v53  ;;  %v5234_v63 = vld [vmem:[%s6477_s3 + $0x1f8] sm:$0xff]  }
 0x297   :  { %3970 = vmatprep.mubr.bf16.mxu0 %v4625_v8  ;;  %v3119_v47 = vadd.f32 %v3112_v40, %v6344_v5  ;;  %v5236_v5 = vld [vmem:[%s6477_s3 + $0x1b8] sm:$0xff]   ;;  %v5237_v8 = vld [vmem:[%s6477_s3 + $0x208] sm:$0xff]  }
 0x298   :  { %v3120_v14 = vadd.f32 %v3116_v0, %v3106_v11  ;;  %v2852_v15 = vpop.f32.mrb[68].mxu0  ;;  %v2941_v17 = vpop.f32.mrb[68].mxu1  ;;  %v5239_v11 = vld [vmem:[%s6477_s3 + $0x210] sm:$0xff]  }
 0x299   :  { %4683 = vmatpush3.bf16.msra.mxu0 %v5216_v9  ;;  %4701 = vmatpush3.bf16.msra.mxu1 %v5217_v10  ;;  %v2854_v20 = vpop.f32.mrb[69].mxu0  ;;  %v2943_v44 = vpop.f32.mrb[69].mxu1  ;;  %v3123_v0 = vmul.f32 0.01, %v3119_v47  ;;  %vm3121_vm2 = vcmp.ge.f32.partialorder %v3119_v47, 0.0  ;;  %v5238_v9 = vld [vmem:[%s6477_s3 + $0x250] sm:$0xff]  }
 0x29a   :  { %v2856_v48 = vpop.f32.mrb[70].mxu0  ;;  %v2945_v23 = vpop.f32.mrb[70].mxu1  ;;  %4684 = vmatprep.subr.bf16.mxu0 %v5218_v12  ;;  %4702 = vmatprep.subr.bf16.mxu1 %v5219_v50  ;;  %vm3122_vm15 = vcmp.ge.f32.partialorder %v3120_v14, 0.0  ;;  %v3124_v25 = vmul.f32 0.01, %v3120_v14  ;;  %v5240_v50 = vld [vmem:[%s6477_s3 + $0x258] sm:$0xff]  }
 0x29b   :  { %v3136_v28 = vmax.f32 %v2852_v15, %v2856_v48  ;;  %v3138_v46 = vmax.f32 %v2941_v17, %v2945_v23  ;;  %v2858_v29 = vpop.f32.mrb[71].mxu0  ;;  %v2947_v30 = vpop.f32.mrb[71].mxu1  ;;  %v3125_v10 = vsel %vm3121_vm2, %v3119_v47, %v3123_v0  ;;  %v5243_v15 = vld [vmem:[%s6477_s3 + $0x220] sm:$0xff]   ;;  %v5244_v17 = vld [vmem:[%s6477_s3 + $0x268] sm:$0xff]   ;;  %v5249_v48 = vld [vmem:[%s6477_s3 + $0x238] sm:$0xff]  }
 0x29c   :  { %v3137_v31 = vmax.f32 %v2854_v20, %v2858_v29  ;;  %v3139_v32 = vmax.f32 %v2943_v44, %v2947_v30  ;;  %v3126_v34 = vsel %vm3122_vm15, %v3120_v14, %v3124_v25  ;;  %v4626_v12 = vpack.c.bf16 %v3125_v10, %v3125_v10  ;;  %v5242_v14 = vld [vmem:[%s6477_s3 + $0x260] sm:$0xff]   ;;  %v5245_v20 = vld [vmem:[%s6477_s3 + $0x228] sm:$0xff]   ;;  %v5246_v44 = vld [vmem:[%s6477_s3 + $0x270] sm:$0xff]  }
 0x29d   :  { %v6380_v35 = vmax.f32 %v3136_v28, %v3138_v46  ;;  %4685 = vmatpush3.bf16.msra.mxu0 %v5220_v19  ;;  %4703 = vmatpush3.bf16.msra.mxu1 %v5221_v22  ;;  %v4627_v36 = vpack.c.bf16 %v3126_v34, %v3126_v34  ;;  %v3147_v19 = vrot.slane %v6366_v21, %v5650_v56  ;;  %v5248_v56 = vld [vmem:[%s6477_s3 + $0x278] sm:$0xff]   ;;  %v4483_v30 = vld [vmem:[%s6479_s6] ss:$0 sm:$0xff] }
 0x29e   :  { %v3141_v58 = vmax.f32 %v3137_v31, %v3139_v32  ;;  %4686 = vmatprep.subr.bf16.mxu0 %v5222_v51  ;;  %4704 = vmatprep.subr.bf16.mxu1 %v5223_v24  ;;  %v5247_v51 = vld [vmem:[%s6477_s3 + $0x230] sm:$0xff]  }
 0x29f   :  { %4010 = vmatprep.mubr.bf16.mxu1 %v4627_v36  ;;  %v3154_v22 = vadd.f32 %v3147_v19, %v6380_v35 }
 0x2a0   :  { %v3155_v55 = vadd.f32 %v3151_v33, %v3141_v58  ;;  %v2862_v6 = vpop.f32.mrb[80].mxu0  ;;  %v2951_v26 = vpop.f32.mrb[80].mxu1 }
 0x2a1   :  { %4687 = vmatpush3.bf16.msra.mxu0 %v5224_v37  ;;  %4705 = vmatpush3.bf16.msra.mxu1 %v5225_v45  ;;  %v2863_v41 = vpop.f32.mrb[81].mxu0  ;;  %v2952_v16 = vpop.f32.mrb[81].mxu1  ;;  %v3158_v21 = vmul.f32 0.01, %v3154_v22  ;;  %vm3156_vm3 = vcmp.ge.f32.partialorder %v3154_v22, 0.0 }
 0x2a2   :  { %4688 = vmatprep.subr.bf16.mxu0 %v5226_v62  ;;  %4706 = vmatprep.subr.bf16.mxu1 %v5227_v38  ;;  %vm3157_vm1 = vcmp.ge.f32.partialorder %v3155_v55, 0.0  ;;  %v3159_v42 = vmul.f32 0.01, %v3155_v55  ;;  %v2864_v3 = vpop.f32.mrb[82].mxu0  ;;  %v2953_v43 = vpop.f32.mrb[82].mxu1 }
 0x2a3   :  { %v2865_v52 = vpop.f32.mrb[83].mxu0  ;;  %v2954_v53 = vpop.f32.mrb[83].mxu1  ;;  %v3160_v23 = vsel %vm3156_vm3, %v3154_v22, %v3158_v21 }
 0x2a4   :  { %v3161_v54 = vsel %vm3157_vm1, %v3155_v55, %v3159_v42  ;;  %v4628_v24 = vpack.c.bf16 %v3160_v23, %v3160_v23 }
 0x2a5   :  { %4689 = vmatpush3.bf16.msra.mxu0 %v5228_v4  ;;  %4707 = vmatpush3.bf16.msra.mxu1 %v5229_v18  ;;  %v4629_v61 = vpack.c.bf16 %v3161_v54, %v3161_v54 }
 0x2a6   :  { %4708 = vmatprep.subr.bf16.mxu1 %v5230_v1  ;;  %4718 = vmatprep.subr.bf16.mxu0 %v5231_v7 }
 0x2a8   :  { %3971 = vmatmul.mubr.bf16.vlgmr.msra.gmra.mrb[88].mxu0 %v4624_v60 }
 0x2a9   :  { %4709 = vmatpush3.bf16.msra.mxu1 %v5232_v57  ;;  %4719 = vmatpush3.bf16.msra.mxu0 %v5233_v59 }
 0x2aa   :  { %4050 = vmatprep.mubr.bf16.mxu0 %v4629_v61  ;;  %4710 = vmatprep.subr.bf16.mxu1 %v5234_v63 }
 0x2ab   :  { %4720 = vmatprep.subr.bf16.mxu0 %v5235_v2 }
 0x2ad   :  { %4711 = vmatpush3.bf16.msra.mxu1 %v5236_v5  ;;  %4721 = vmatpush3.bf16.msra.mxu0 %v5237_v8 }
 0x2ae   :  { %4722 = vmatprep.subr.bf16.mxu0 %v5238_v9 }
 0x2b0   :  { %4011 = vmatmul.mubr.bf16.vlgmr.msra.gmra.mrb[88].mxu1 %v4626_v12 }
 0x2b1   :  { %4723 = vmatpush3.bf16.msra.mxu0 %v5239_v11 }
 0x2b2   :  { %4724 = vmatprep.subr.bf16.mxu0 %v5240_v50 }
 0x2b5   :  { %4725 = vmatpush3.bf16.msra.mxu0 %v5241_v13 }
 0x2b6   :  { %4726 = vmatprep.subr.bf16.mxu0 %v5242_v14 }
 0x2b9   :  { %4727 = vmatpush3.bf16.msra.mxu0 %v5243_v15 }
 0x2ba   :  { %4728 = vmatprep.subr.bf16.mxu0 %v5244_v17 }
 0x2bd   :  { %4729 = vmatpush3.bf16.msra.mxu0 %v5245_v20 }
 0x2be   :  { %4730 = vmatprep.subr.bf16.mxu0 %v5246_v44 }
 0x2c1   :  { %4731 = vmatpush3.bf16.msra.mxu0 %v5247_v51 }
 0x2c2   :  { %4732 = vmatprep.subr.bf16.mxu0 %v5248_v56 }
 0x2c5   :  { %4733 = vmatpush3.bf16.msra.mxu0 %v5249_v48 }
 0x2c8   :  { %4051 = vmatmul.mubr.bf16.vlgmr.msra.gmra.mrb[92].mxu0 %v4628_v24 }
 0x35b   :  { %v4646_v25 = vpop.f32.mrb[84].mxu0 }
 0x35c   :  { %v4647_v27 = vpop.f32.mrb[85].mxu0 }
 0x35d   :  { %v4648_v28 = vadd.f32 %v4647_v27, %v4646_v25  ;;  %v4649_v46 = vpop.f32.mrb[86].mxu0 }
 0x35e   :  { %v4650_v29 = vpop.f32.mrb[87].mxu0 }
 0x35f   :  { %v3893_v33 = vadd.f32 %v4648_v28, %v4483_v30 }
 0x363   :  { %v4668_v31 = vpop.f32.mrb[84].mxu1 }
 0x364   :  { %v4669_v32 = vpop.f32.mrb[85].mxu1 }
 0x365   :  { %v4670_v34 = vadd.f32 %v4669_v32, %v4668_v31  ;;  %v4671_v35 = vpop.f32.mrb[86].mxu1 }
 0x366   :  { %v4672_v36 = vpop.f32.mrb[87].mxu1 }
 0x367   :  { %v3933_v37 = vadd.f32 %v4670_v34, %v3893_v33 }
 0x37b   :  { %v4690_v45 = vpop.f32.mrb[88].mxu0 }
 0x37c   :  { %v4691_v58 = vpop.f32.mrb[89].mxu0 }
 0x37d   :  { %v4692_v62 = vadd.f32 %v4691_v58, %v4690_v45  ;;  %v4693_v38 = vpop.f32.mrb[90].mxu0 }
 0x37e   :  { %v4694_v39 = vpop.f32.mrb[91].mxu0 }
 0x37f   :  { %v3973_v40 = vadd.f32 %v4692_v62, %v3933_v37 }
 0x383   :  { %v4712_v55 = vpop.f32.mrb[88].mxu1 }
 0x384   :  { %v4713_v6 = vpop.f32.mrb[89].mxu1 }
 0x385   :  { %v4714_v26 = vadd.f32 %v4713_v6, %v4712_v55  ;;  %v4715_v4 = vpop.f32.mrb[90].mxu1 }
 0x386   :  { %v4716_v18 = vpop.f32.mrb[91].mxu1 }
 0x387   :  { %v4013_v1 = vadd.f32 %v4714_v26, %v3973_v40 }
 0x39b   :  { %v4734_v41 = vpop.f32.mrb[92].mxu0 }
 0x39c   :  { %v4735_v16 = vpop.f32.mrb[93].mxu0 }
 0x39d   :  { %v4736_v7 = vadd.f32 %v4735_v16, %v4734_v41  ;;  %v4737_v42 = vpop.f32.mrb[94].mxu0 }
 0x39e   :  { %v4738_v3 = vpop.f32.mrb[95].mxu0 }
 0x39f   :  { %v4053_v43 = vadd.f32 %v4736_v7, %v4013_v1 }
 0x3a1   :  { %4059 = vst.msk [vmem:[%s6480_s7] sm:$0xff] %vm4058_vm4, %v4053_v43 }

</bundles_post_ra>
